<compile_context>
chip_gen: v7x
topology: tpu7x:2x2x1
jax: 0.10.0
libtpu: 0.0.40
codegen_flags: <defaults>
</compile_context>

<pallas_src>
import functools

import numpy as np
import jax
import jax.numpy as jnp
from jax import lax
from jax.experimental import pallas as pl
from jax.experimental.pallas import tpu as pltpu

# ---- loss hyper-parameters (module __init__ defaults) ----
SILOG_LAMBDA = 0.5
W_SILOG, W_GRAD, W_SSIM, W_EDGE, W_L1, W_VAR, W_RANGE = 0.5, 10.0, 5.0, 10.0, 1.0, 1.0, 1.0
SSIM_WIN, SSIM_SIGMA = 11, 1.5
SSIM_C1, SSIM_C2, SSIM_EPS = 0.01 ** 2, 0.03 ** 2, 1e-12
CLAMP_EPS = 1e-6


# -------------------- host-side constant operators --------------------
def _gaussian_1d(ws: int, sigma: float) -> np.ndarray:
    x = np.arange(ws, dtype=np.float64) - ws // 2
    g = np.exp(-(x ** 2) / (2.0 * sigma ** 2))
    return g / g.sum()


def _reflect(p: int, n: int) -> int:
    # PyTorch / kornia 'reflect' padding index (no edge repetition).
    if p < 0:
        p = -p
    if p >= n:
        p = 2 * n - 2 - p
    return p


def _blur_matrix(n: int, g: np.ndarray) -> np.ndarray:
    # A[src, out] such that (x @ A)[out] == reflect-padded 1-D filtering of x with g.
    ws = len(g)
    pad = ws // 2
    A = np.zeros((n, n), dtype=np.float64)
    for out in range(n):
        for k in range(ws):
            A[_reflect(out - pad + k, n), out] += g[k]
    return A


def _ssim_blur_operator(h: int, w: int) -> np.ndarray:
    g = _gaussian_1d(SSIM_WIN, SSIM_SIGMA)
    # M[i*W + j, h*W + w] = Ah[i, h] * Aw[j, w]  ->  blur_flat = x_flat @ M
    return np.kron(_blur_matrix(h, g), _blur_matrix(w, g)).astype(np.float32)


def _channel_mean_operator(n: int, c: int) -> np.ndarray:
    # (NC, NC) block matrix: dot(op, X) averages rows over each sample's channels
    # and broadcasts the mean back to every channel row of that sample.
    nc = n * c
    m = np.zeros((nc, nc), dtype=np.float32)
    for i in range(nc):
        for j in range(nc):
            if i // c == j // c:
                m[i, j] = 1.0 / c
    return m


# ----------------------------------- Pallas kernel -----------------------------------
def _loss_kernel(pf_ref, tf_ref, blur_hbm_ref, cavg_ref,
                 out_ref, blur_vmem, blur_sem, *, n, c, h, w):
    f32 = jnp.float32
    nc, hw = n * c, h * w
    n_el = nc * hw

    # Start the (HW, HW) blur-operator fetch now; it hides under the weight-map
    # phase and is only waited on right before the SSIM matmul.
    blur_cp = pltpu.make_async_copy(blur_hbm_ref, blur_vmem, blur_sem)
    blur_cp.start()

    p = pf_ref[...]              # (NC, HW) f32
    t = tf_ref[...]              # (NC, HW) f32
    cavg = cavg_ref[...]         # (NC, NC) f32

    # ---- weight map: 255 / count(target == value)   (== calc_weight_map) ----
    # counts[i] = #{j : target_flat[j] == target_flat[i]}, accumulated in vregs
    # by comparing `t` against every cyclic (sublane, lane) shift of itself:
    # the full 8 x 256 offset torus covers each element pair exactly once.
    unroll = 1
    for u_try in (8, 4, 2):
        if hw % u_try == 0:
            unroll = u_try
            break

    def lane_body(_, carry):
        counts, cur = carry
        s = (t == cur).astype(f32)
        for u in range(1, unroll):                       # static lane shifts, ILP
            s = s + (t == pltpu.roll(cur, u, axis=1)).astype(f32)
        return counts + s, pltpu.roll(cur, unroll, axis=1)

    counts = jnp.zeros((nc, hw), f32)
    for dr in range(nc):                                 # 8 static sublane shifts
        base = pltpu.roll(t, dr, axis=0) if dr else t
        counts, _ = lax.fori_loop(0, hw // unroll, lane_body, (counts, base))

    wmap = 255.0 * pl.reciprocal(jnp.maximum(counts, 1.0), approx=True)   # (NC, HW)

    # ---- boundary masks for x / y finite differences on the flat view ----
    # (each sublane row of the (NC, HW) view holds exactly one H*W image)
    lane_i = lax.broadcasted_iota(jnp.int32, (nc, hw), 1)
    if (w & (w - 1)) == 0:
        col_nonzero = jnp.bitwise_and(lane_i, w - 1) != 0
    else:
        lanef = lane_i.astype(f32)
        col_nonzero = (lanef - jnp.floor(lanef / float(w)) * float(w)) > 0.5
    mask_x = col_nonzero.astype(f32)                     # column index != 0
    mask_y = (lane_i >= w).astype(f32)                   # image row index != 0
    inv_nvx = 1.0 / float(nc * h * (w - 1))
    inv_nvy = 1.0 / float(nc * (h - 1) * w)

    rx = lambda a: pltpu.roll(a, 1, axis=1)
    ry = lambda a: pltpu.roll(a, w, axis=1)

    pgx, tgx = p - rx(p), t - rx(t)
    pgy, tgy = p - ry(p), t - ry(t)
    wx = wmap * rx(wmap) * mask_x
    wy = wmap * ry(wmap) * mask_y

    # ---- gradient L1 ----
    loss_grad = (jnp.sum(jnp.abs(pgx - tgx) * wx) * inv_nvx
                 + jnp.sum(jnp.abs(pgy - tgy) * wy) * inv_nvy)

    # ---- edge-aware smoothness (one fused channel-mean matmul) ----
    gabs = jnp.concatenate([jnp.abs(tgx) * mask_x, jnp.abs(tgy) * mask_y], axis=1)
    gavg = jnp.dot(cavg, gabs, preferred_element_type=f32)      # (NC, 2*HW)
    tax = gavg[:, :hw]
    tay = gavg[:, hw:]
    egx = pgx * jnp.exp(-tax * wx)
    egy = pgy * jnp.exp(-tay * wy)
    loss_edge = (jnp.sum(jnp.abs(egx) * mask_x) * inv_nvx
                 + jnp.sum(jnp.abs(egy) * mask_y) * inv_nvy)

    # ---- SILog ----
    d = (jnp.log(jnp.maximum(t, CLAMP_EPS)) - jnp.log(jnp.maximum(p, CLAMP_EPS))) * wmap
    md = jnp.sum(d) / n_el
    md2 = jnp.sum(d * d) / n_el
    loss_silog = jnp.sqrt(jnp.maximum(md2 - SILOG_LAMBDA * md * md, 0.0))

    # ---- weighted L1 ----
    loss_l1 = jnp.sum(jnp.abs(t - p) * wmap) / n_el

    # ---- SSIM (kornia SSIMLoss: window=11, sigma=1.5, reflect 'same') ----
    # single batched MXU matmul for all five Gaussian blurs
    blur_cp.wait()
    M = blur_vmem[...]                                           # (HW, HW)
    stack = jnp.concatenate([p, t, p * p, t * t, p * t], axis=0)  # (5*NC, HW)
    blurred = jnp.dot(stack, M, preferred_element_type=f32)      # (5*NC, HW)
    mu1 = blurred[0 * nc:1 * nc]
    mu2 = blurred[1 * nc:2 * nc]
    mu11 = blurred[2 * nc:3 * nc]
    mu22 = blurred[3 * nc:4 * nc]
    mu12 = blurred[4 * nc:5 * nc]
    mu1_sq, mu2_sq, mu1_mu2 = mu1 * mu1, mu2 * mu2, mu1 * mu2
    s1, s2, s12 = mu11 - mu1_sq, mu22 - mu2_sq, mu12 - mu1_mu2
    num = (2.0 * mu1_mu2 + SSIM_C1) * (2.0 * s12 + SSIM_C2)
    den = (mu1_sq + mu2_sq + SSIM_C1) * (s1 + s2 + SSIM_C2)
    ssim_map = num * pl.reciprocal(den + SSIM_EPS, approx=True)
    loss_ssim = jnp.sum(jnp.clip(0.5 * (1.0 - ssim_map), 0.0, 1.0)) / n_el

    # ---- variance loss (torch.var is unbiased) ----
    mp, mt = jnp.sum(p) / n_el, jnp.sum(t) / n_el
    pvar = jnp.sum((p - mp) ** 2) / (n_el - 1)
    tvar = jnp.sum((t - mt) ** 2) / (n_el - 1)
    loss_var = (pvar - tvar) ** 2

    # ---- range loss ----
    loss_range = ((jnp.min(p) - jnp.min(t)) ** 2
                  + (jnp.max(p) - jnp.max(t)) ** 2)

    total = (W_SILOG * loss_silog + W_GRAD * loss_grad + W_SSIM * loss_ssim
             + W_EDGE * loss_edge + W_L1 * loss_l1 + W_VAR * loss_var
             + W_RANGE * loss_range)
    out_ref[0, 0] = total


# ---------------------------------------- wrapper ----------------------------------------
@jax.jit
def weighted_combined_loss(pred, target):
    n, c, h, w = pred.shape
    nc, hw = n * c, h * w

    blur_op = jnp.asarray(_ssim_blur_operator(h, w))        # (HW, HW), stays in HBM
    cavg = jnp.asarray(_channel_mean_operator(n, c))        # (NC, NC)
    pf = pred.reshape(nc, hw).astype(jnp.float32)           # lane-dense working view
    tf = target.reshape(nc, hw).astype(jnp.float32)

    kernel = functools.partial(_loss_kernel, n=n, c=c, h=h, w=w)
    vmem = pl.BlockSpec(memory_space=pltpu.MemorySpace.VMEM)
    hbm = pl.BlockSpec(memory_space=pl.ANY)                  # manual DMA inside kernel
    smem = pl.BlockSpec(memory_space=pltpu.MemorySpace.SMEM)
    out = pl.pallas_call(
        kernel,
        out_shape=jax.ShapeDtypeStruct((1, 1), jnp.float32),
        in_specs=[vmem, vmem, hbm, vmem],
        out_specs=smem,
        scratch_shapes=[pltpu.VMEM((hw, hw), jnp.float32),
                        pltpu.SemaphoreType.DMA(())],
    )(pf, tf, blur_op, cavg)
    return out[0, 0]


# ------------------------------ pure-JAX reference (sanity) ------------------------------
def _reference_loss(pred, target):
    N, C, H, W = pred.shape
    flat = target.reshape(-1)
    counts = jnp.sum((flat[:, None] == flat[None, :]).astype(jnp.float32), axis=1)
    w = (255.0 / counts).reshape(target.shape)

    pc = jnp.maximum(pred, CLAMP_EPS)
    tc = jnp.maximum(target, CLAMP_EPS)
    d = (jnp.log(tc) - jnp.log(pc)) * w
    loss_silog = jnp.sqrt(jnp.maximum(jnp.mean(d * d) - SILOG_LAMBDA * jnp.mean(d) ** 2, 0.0))

    wx = w[:, :, :, 1:] * w[:, :, :, :-1]
    wy = w[:, :, 1:, :] * w[:, :, :-1, :]
    pgx = pred[:, :, :, 1:] - pred[:, :, :, :-1]
    tgx = target[:, :, :, 1:] - target[:, :, :, :-1]
    pgy = pred[:, :, 1:, :] - pred[:, :, :-1, :]
    tgy = target[:, :, 1:, :] - target[:, :, :-1, :]
    loss_grad = jnp.mean(jnp.abs(pgx - tgx) * wx) + jnp.mean(jnp.abs(pgy - tgy) * wy)

    M = jnp.asarray(_ssim_blur_operator(H, W))
    pf = pred.reshape(N * C, H * W)
    tf = target.reshape(N * C, H * W)
    blur = lambda x: jnp.dot(x, M, precision=jax.lax.Precision.HIGHEST)
    mu1, mu2 = blur(pf), blur(tf)
    s1 = blur(pf * pf) - mu1 ** 2
    s2 = blur(tf * tf) - mu2 ** 2
    s12 = blur(pf * tf) - mu1 * mu2
    num = (2 * mu1 * mu2 + SSIM_C1) * (2 * s12 + SSIM_C2)
    den = (mu1 ** 2 + mu2 ** 2 + SSIM_C1) * (s1 + s2 + SSIM_C2)
    loss_ssim = jnp.mean(jnp.clip(0.5 * (1 - num / (den + SSIM_EPS)), 0.0, 1.0))

    loss_l1 = jnp.mean(jnp.abs(target - pred) * w)

    egx = pred[:, :, :, :-1] - pred[:, :, :, 1:]
    egy = pred[:, :, :-1, :] - pred[:, :, 1:, :]
    tax = jnp.mean(jnp.abs(target[:, :, :, :-1] - target[:, :, :, 1:]), axis=1, keepdims=True)
    tay = jnp.mean(jnp.abs(target[:, :, :-1, :] - target[:, :, 1:, :]), axis=1, keepdims=True)
    loss_edge = (jnp.mean(jnp.abs(egx * jnp.exp(-tax * wx)))
                 + jnp.mean(jnp.abs(egy * jnp.exp(-tay * wy))))

    n = pred.size
    pvar = jnp.sum((pred - jnp.mean(pred)) ** 2) / (n - 1)
    tvar = jnp.sum((target - jnp.mean(target)) ** 2) / (n - 1)
    loss_var = (pvar - tvar) ** 2
    loss_range = ((jnp.min(pred) - jnp.min(target)) ** 2
                  + (jnp.max(pred) - jnp.max(target)) ** 2)

    return (W_SILOG * loss_silog + W_GRAD * loss_grad + W_SSIM * loss_ssim
            + W_EDGE * loss_edge + W_L1 * loss_l1 + W_VAR * loss_var
            + W_RANGE * loss_range)


if __name__ == "__main__":
    key = jax.random.PRNGKey(0)
    kp, kt = jax.random.split(key)
    N, C, H, W = 2, 4, 16, 16
    pred = jax.random.uniform(kp, (N, C, H, W), jnp.float32, minval=0.05, maxval=1.0)
    # Quantized target -> repeated values, so the unique-count weight map is non-trivial.
    target = jnp.floor(jax.random.uniform(kt, (N, C, H, W), jnp.float32) * 5.0) / 4.0

    loss = jax.block_until_ready(weighted_combined_loss(pred, target))
    ref = jax.block_until_ready(_reference_loss(pred, target))

    assert bool(jnp.isfinite(loss)), "kernel produced non-finite loss"
    assert abs(float(loss) - float(ref)) <= 2e-2 * max(1.0, abs(float(ref))), (
        float(loss), float(ref))
    print("KERNEL_OK")
</pallas_src>

<mosaic_0001>
module attributes {stable_mosaic.version = 11 : i64} {
  func.func @_loss_kernel(%arg0: memref<8x256xf32, #tpu.memory_space<vmem>>, %arg1: memref<8x256xf32, #tpu.memory_space<vmem>>, %arg2: memref<256x256xf32, #tpu.memory_space<any>>, %arg3: memref<8x8xf32, #tpu.memory_space<vmem>>, %arg4: memref<1x1xf32, #tpu.memory_space<smem>>, %arg5: memref<256x256xf32, #tpu.memory_space<vmem>>, %arg6: memref<!tpu.dma_semaphore, #tpu.memory_space<semaphore_mem>>) attributes {dimension_semantics = [], scalar_prefetch = 0 : i64, scratch_operands = 2 : i64, tpu.core_type = #tpu.core_type<tc>} {
    tpu.enqueue_dma source(%arg2 : memref<256x256xf32, #tpu.memory_space<any>>) target(%arg5 : memref<256x256xf32, #tpu.memory_space<vmem>>) target_semaphore(%arg6 : memref<!tpu.dma_semaphore, #tpu.memory_space<semaphore_mem>>)
    %c0 = arith.constant 0 : index
    %c0_0 = arith.constant 0 : index
    %0 = vector.load %arg0[%c0, %c0_0] : memref<8x256xf32, #tpu.memory_space<vmem>>, vector<8x256xf32>
    %c0_1 = arith.constant 0 : index
    %c0_2 = arith.constant 0 : index
    %1 = vector.load %arg1[%c0_1, %c0_2] : memref<8x256xf32, #tpu.memory_space<vmem>>, vector<8x256xf32>
    %c0_3 = arith.constant 0 : index
    %c0_4 = arith.constant 0 : index
    %2 = vector.load %arg3[%c0_3, %c0_4] : memref<8x8xf32, #tpu.memory_space<vmem>>, vector<8x8xf32>
    %cst = arith.constant 0.000000e+00 : f32
    %3 = vector.broadcast %cst : f32 to vector<8x256xf32>
    %c0_i32 = arith.constant 0 : i32
    %c32_i32 = arith.constant 32 : i32
    %4 = arith.addi %c0_i32, %c32_i32 : i32
    %c1_i32 = arith.constant 1 : i32
    %5:2 = scf.for %arg7 = %c0_i32 to %4 step %c1_i32 iter_args(%arg8 = %3, %arg9 = %1) -> (vector<8x256xf32>, vector<8x256xf32>)  : i32 {
      %252 = arith.cmpf oeq, %1, %arg9 : vector<8x256xf32>
      %253 = arith.extui %252 : vector<8x256xi1> to vector<8x256xi32>
      %254 = arith.sitofp %253 : vector<8x256xi32> to vector<8x256xf32>
      %c1_i32_94 = arith.constant 1 : i32
      %255 = tpu.dynamic_rotate %arg9 by %c1_i32_94 dim 1 : vector<8x256xf32>, i32 -> vector<8x256xf32>
      %256 = arith.cmpf oeq, %1, %255 : vector<8x256xf32>
      %257 = arith.extui %256 : vector<8x256xi1> to vector<8x256xi32>
      %258 = arith.sitofp %257 : vector<8x256xi32> to vector<8x256xf32>
      %259 = arith.addf %254, %258 : vector<8x256xf32>
      %c2_i32_95 = arith.constant 2 : i32
      %260 = tpu.dynamic_rotate %arg9 by %c2_i32_95 dim 1 : vector<8x256xf32>, i32 -> vector<8x256xf32>
      %261 = arith.cmpf oeq, %1, %260 : vector<8x256xf32>
      %262 = arith.extui %261 : vector<8x256xi1> to vector<8x256xi32>
      %263 = arith.sitofp %262 : vector<8x256xi32> to vector<8x256xf32>
      %264 = arith.addf %259, %263 : vector<8x256xf32>
      %c3_i32_96 = arith.constant 3 : i32
      %265 = tpu.dynamic_rotate %arg9 by %c3_i32_96 dim 1 : vector<8x256xf32>, i32 -> vector<8x256xf32>
      %266 = arith.cmpf oeq, %1, %265 : vector<8x256xf32>
      %267 = arith.extui %266 : vector<8x256xi1> to vector<8x256xi32>
      %268 = arith.sitofp %267 : vector<8x256xi32> to vector<8x256xf32>
      %269 = arith.addf %264, %268 : vector<8x256xf32>
      %c4_i32_97 = arith.constant 4 : i32
      %270 = tpu.dynamic_rotate %arg9 by %c4_i32_97 dim 1 : vector<8x256xf32>, i32 -> vector<8x256xf32>
      %271 = arith.cmpf oeq, %1, %270 : vector<8x256xf32>
      %272 = arith.extui %271 : vector<8x256xi1> to vector<8x256xi32>
      %273 = arith.sitofp %272 : vector<8x256xi32> to vector<8x256xf32>
      %274 = arith.addf %269, %273 : vector<8x256xf32>
      %c5_i32_98 = arith.constant 5 : i32
      %275 = tpu.dynamic_rotate %arg9 by %c5_i32_98 dim 1 : vector<8x256xf32>, i32 -> vector<8x256xf32>
      %276 = arith.cmpf oeq, %1, %275 : vector<8x256xf32>
      %277 = arith.extui %276 : vector<8x256xi1> to vector<8x256xi32>
      %278 = arith.sitofp %277 : vector<8x256xi32> to vector<8x256xf32>
      %279 = arith.addf %274, %278 : vector<8x256xf32>
      %c6_i32_99 = arith.constant 6 : i32
      %280 = tpu.dynamic_rotate %arg9 by %c6_i32_99 dim 1 : vector<8x256xf32>, i32 -> vector<8x256xf32>
      %281 = arith.cmpf oeq, %1, %280 : vector<8x256xf32>
      %282 = arith.extui %281 : vector<8x256xi1> to vector<8x256xi32>
      %283 = arith.sitofp %282 : vector<8x256xi32> to vector<8x256xf32>
      %284 = arith.addf %279, %283 : vector<8x256xf32>
      %c7_i32_100 = arith.constant 7 : i32
      %285 = tpu.dynamic_rotate %arg9 by %c7_i32_100 dim 1 : vector<8x256xf32>, i32 -> vector<8x256xf32>
      %286 = arith.cmpf oeq, %1, %285 : vector<8x256xf32>
      %287 = arith.extui %286 : vector<8x256xi1> to vector<8x256xi32>
      %288 = arith.sitofp %287 : vector<8x256xi32> to vector<8x256xf32>
      %289 = arith.addf %284, %288 : vector<8x256xf32>
      %290 = arith.addf %arg8, %289 : vector<8x256xf32>
      %c8_i32 = arith.constant 8 : i32
      %291 = tpu.dynamic_rotate %arg9 by %c8_i32 dim 1 : vector<8x256xf32>, i32 -> vector<8x256xf32>
      scf.yield %290, %291 : vector<8x256xf32>, vector<8x256xf32>
    }
    %c1_i32_5 = arith.constant 1 : i32
    %6 = tpu.dynamic_rotate %1 by %c1_i32_5 dim 0 : vector<8x256xf32>, i32 -> vector<8x256xf32>
    %c0_i32_6 = arith.constant 0 : i32
    %c32_i32_7 = arith.constant 32 : i32
    %7 = arith.addi %c0_i32_6, %c32_i32_7 : i32
    %c1_i32_8 = arith.constant 1 : i32
    %8:2 = scf.for %arg7 = %c0_i32_6 to %7 step %c1_i32_8 iter_args(%arg8 = %5#0, %arg9 = %6) -> (vector<8x256xf32>, vector<8x256xf32>)  : i32 {
      %252 = arith.cmpf oeq, %1, %arg9 : vector<8x256xf32>
      %253 = arith.extui %252 : vector<8x256xi1> to vector<8x256xi32>
      %254 = arith.sitofp %253 : vector<8x256xi32> to vector<8x256xf32>
      %c1_i32_94 = arith.constant 1 : i32
      %255 = tpu.dynamic_rotate %arg9 by %c1_i32_94 dim 1 : vector<8x256xf32>, i32 -> vector<8x256xf32>
      %256 = arith.cmpf oeq, %1, %255 : vector<8x256xf32>
      %257 = arith.extui %256 : vector<8x256xi1> to vector<8x256xi32>
      %258 = arith.sitofp %257 : vector<8x256xi32> to vector<8x256xf32>
      %259 = arith.addf %254, %258 : vector<8x256xf32>
      %c2_i32_95 = arith.constant 2 : i32
      %260 = tpu.dynamic_rotate %arg9 by %c2_i32_95 dim 1 : vector<8x256xf32>, i32 -> vector<8x256xf32>
      %261 = arith.cmpf oeq, %1, %260 : vector<8x256xf32>
      %262 = arith.extui %261 : vector<8x256xi1> to vector<8x256xi32>
      %263 = arith.sitofp %262 : vector<8x256xi32> to vector<8x256xf32>
      %264 = arith.addf %259, %263 : vector<8x256xf32>
      %c3_i32_96 = arith.constant 3 : i32
      %265 = tpu.dynamic_rotate %arg9 by %c3_i32_96 dim 1 : vector<8x256xf32>, i32 -> vector<8x256xf32>
      %266 = arith.cmpf oeq, %1, %265 : vector<8x256xf32>
      %267 = arith.extui %266 : vector<8x256xi1> to vector<8x256xi32>
      %268 = arith.sitofp %267 : vector<8x256xi32> to vector<8x256xf32>
      %269 = arith.addf %264, %268 : vector<8x256xf32>
      %c4_i32_97 = arith.constant 4 : i32
      %270 = tpu.dynamic_rotate %arg9 by %c4_i32_97 dim 1 : vector<8x256xf32>, i32 -> vector<8x256xf32>
      %271 = arith.cmpf oeq, %1, %270 : vector<8x256xf32>
      %272 = arith.extui %271 : vector<8x256xi1> to vector<8x256xi32>
      %273 = arith.sitofp %272 : vector<8x256xi32> to vector<8x256xf32>
      %274 = arith.addf %269, %273 : vector<8x256xf32>
      %c5_i32_98 = arith.constant 5 : i32
      %275 = tpu.dynamic_rotate %arg9 by %c5_i32_98 dim 1 : vector<8x256xf32>, i32 -> vector<8x256xf32>
      %276 = arith.cmpf oeq, %1, %275 : vector<8x256xf32>
      %277 = arith.extui %276 : vector<8x256xi1> to vector<8x256xi32>
      %278 = arith.sitofp %277 : vector<8x256xi32> to vector<8x256xf32>
      %279 = arith.addf %274, %278 : vector<8x256xf32>
      %c6_i32_99 = arith.constant 6 : i32
      %280 = tpu.dynamic_rotate %arg9 by %c6_i32_99 dim 1 : vector<8x256xf32>, i32 -> vector<8x256xf32>
      %281 = arith.cmpf oeq, %1, %280 : vector<8x256xf32>
      %282 = arith.extui %281 : vector<8x256xi1> to vector<8x256xi32>
      %283 = arith.sitofp %282 : vector<8x256xi32> to vector<8x256xf32>
      %284 = arith.addf %279, %283 : vector<8x256xf32>
      %c7_i32_100 = arith.constant 7 : i32
      %285 = tpu.dynamic_rotate %arg9 by %c7_i32_100 dim 1 : vector<8x256xf32>, i32 -> vector<8x256xf32>
      %286 = arith.cmpf oeq, %1, %285 : vector<8x256xf32>
      %287 = arith.extui %286 : vector<8x256xi1> to vector<8x256xi32>
      %288 = arith.sitofp %287 : vector<8x256xi32> to vector<8x256xf32>
      %289 = arith.addf %284, %288 : vector<8x256xf32>
      %290 = arith.addf %arg8, %289 : vector<8x256xf32>
      %c8_i32 = arith.constant 8 : i32
      %291 = tpu.dynamic_rotate %arg9 by %c8_i32 dim 1 : vector<8x256xf32>, i32 -> vector<8x256xf32>
      scf.yield %290, %291 : vector<8x256xf32>, vector<8x256xf32>
    }
    %c2_i32 = arith.constant 2 : i32
    %9 = tpu.dynamic_rotate %1 by %c2_i32 dim 0 : vector<8x256xf32>, i32 -> vector<8x256xf32>
    %c0_i32_9 = arith.constant 0 : i32
    %c32_i32_10 = arith.constant 32 : i32
    %10 = arith.addi %c0_i32_9, %c32_i32_10 : i32
    %c1_i32_11 = arith.constant 1 : i32
    %11:2 = scf.for %arg7 = %c0_i32_9 to %10 step %c1_i32_11 iter_args(%arg8 = %8#0, %arg9 = %9) -> (vector<8x256xf32>, vector<8x256xf32>)  : i32 {
      %252 = arith.cmpf oeq, %1, %arg9 : vector<8x256xf32>
      %253 = arith.extui %252 : vector<8x256xi1> to vector<8x256xi32>
      %254 = arith.sitofp %253 : vector<8x256xi32> to vector<8x256xf32>
      %c1_i32_94 = arith.constant 1 : i32
      %255 = tpu.dynamic_rotate %arg9 by %c1_i32_94 dim 1 : vector<8x256xf32>, i32 -> vector<8x256xf32>
      %256 = arith.cmpf oeq, %1, %255 : vector<8x256xf32>
      %257 = arith.extui %256 : vector<8x256xi1> to vector<8x256xi32>
      %258 = arith.sitofp %257 : vector<8x256xi32> to vector<8x256xf32>
      %259 = arith.addf %254, %258 : vector<8x256xf32>
      %c2_i32_95 = arith.constant 2 : i32
      %260 = tpu.dynamic_rotate %arg9 by %c2_i32_95 dim 1 : vector<8x256xf32>, i32 -> vector<8x256xf32>
      %261 = arith.cmpf oeq, %1, %260 : vector<8x256xf32>
      %262 = arith.extui %261 : vector<8x256xi1> to vector<8x256xi32>
      %263 = arith.sitofp %262 : vector<8x256xi32> to vector<8x256xf32>
      %264 = arith.addf %259, %263 : vector<8x256xf32>
      %c3_i32_96 = arith.constant 3 : i32
      %265 = tpu.dynamic_rotate %arg9 by %c3_i32_96 dim 1 : vector<8x256xf32>, i32 -> vector<8x256xf32>
      %266 = arith.cmpf oeq, %1, %265 : vector<8x256xf32>
      %267 = arith.extui %266 : vector<8x256xi1> to vector<8x256xi32>
      %268 = arith.sitofp %267 : vector<8x256xi32> to vector<8x256xf32>
      %269 = arith.addf %264, %268 : vector<8x256xf32>
      %c4_i32_97 = arith.constant 4 : i32
      %270 = tpu.dynamic_rotate %arg9 by %c4_i32_97 dim 1 : vector<8x256xf32>, i32 -> vector<8x256xf32>
      %271 = arith.cmpf oeq, %1, %270 : vector<8x256xf32>
      %272 = arith.extui %271 : vector<8x256xi1> to vector<8x256xi32>
      %273 = arith.sitofp %272 : vector<8x256xi32> to vector<8x256xf32>
      %274 = arith.addf %269, %273 : vector<8x256xf32>
      %c5_i32_98 = arith.constant 5 : i32
      %275 = tpu.dynamic_rotate %arg9 by %c5_i32_98 dim 1 : vector<8x256xf32>, i32 -> vector<8x256xf32>
      %276 = arith.cmpf oeq, %1, %275 : vector<8x256xf32>
      %277 = arith.extui %276 : vector<8x256xi1> to vector<8x256xi32>
      %278 = arith.sitofp %277 : vector<8x256xi32> to vector<8x256xf32>
      %279 = arith.addf %274, %278 : vector<8x256xf32>
      %c6_i32_99 = arith.constant 6 : i32
      %280 = tpu.dynamic_rotate %arg9 by %c6_i32_99 dim 1 : vector<8x256xf32>, i32 -> vector<8x256xf32>
      %281 = arith.cmpf oeq, %1, %280 : vector<8x256xf32>
      %282 = arith.extui %281 : vector<8x256xi1> to vector<8x256xi32>
      %283 = arith.sitofp %282 : vector<8x256xi32> to vector<8x256xf32>
      %284 = arith.addf %279, %283 : vector<8x256xf32>
      %c7_i32_100 = arith.constant 7 : i32
      %285 = tpu.dynamic_rotate %arg9 by %c7_i32_100 dim 1 : vector<8x256xf32>, i32 -> vector<8x256xf32>
      %286 = arith.cmpf oeq, %1, %285 : vector<8x256xf32>
      %287 = arith.extui %286 : vector<8x256xi1> to vector<8x256xi32>
      %288 = arith.sitofp %287 : vector<8x256xi32> to vector<8x256xf32>
      %289 = arith.addf %284, %288 : vector<8x256xf32>
      %290 = arith.addf %arg8, %289 : vector<8x256xf32>
      %c8_i32 = arith.constant 8 : i32
      %291 = tpu.dynamic_rotate %arg9 by %c8_i32 dim 1 : vector<8x256xf32>, i32 -> vector<8x256xf32>
      scf.yield %290, %291 : vector<8x256xf32>, vector<8x256xf32>
    }
    %c3_i32 = arith.constant 3 : i32
    %12 = tpu.dynamic_rotate %1 by %c3_i32 dim 0 : vector<8x256xf32>, i32 -> vector<8x256xf32>
    %c0_i32_12 = arith.constant 0 : i32
    %c32_i32_13 = arith.constant 32 : i32
    %13 = arith.addi %c0_i32_12, %c32_i32_13 : i32
    %c1_i32_14 = arith.constant 1 : i32
    %14:2 = scf.for %arg7 = %c0_i32_12 to %13 step %c1_i32_14 iter_args(%arg8 = %11#0, %arg9 = %12) -> (vector<8x256xf32>, vector<8x256xf32>)  : i32 {
      %252 = arith.cmpf oeq, %1, %arg9 : vector<8x256xf32>
      %253 = arith.extui %252 : vector<8x256xi1> to vector<8x256xi32>
      %254 = arith.sitofp %253 : vector<8x256xi32> to vector<8x256xf32>
      %c1_i32_94 = arith.constant 1 : i32
      %255 = tpu.dynamic_rotate %arg9 by %c1_i32_94 dim 1 : vector<8x256xf32>, i32 -> vector<8x256xf32>
      %256 = arith.cmpf oeq, %1, %255 : vector<8x256xf32>
      %257 = arith.extui %256 : vector<8x256xi1> to vector<8x256xi32>
      %258 = arith.sitofp %257 : vector<8x256xi32> to vector<8x256xf32>
      %259 = arith.addf %254, %258 : vector<8x256xf32>
      %c2_i32_95 = arith.constant 2 : i32
      %260 = tpu.dynamic_rotate %arg9 by %c2_i32_95 dim 1 : vector<8x256xf32>, i32 -> vector<8x256xf32>
      %261 = arith.cmpf oeq, %1, %260 : vector<8x256xf32>
      %262 = arith.extui %261 : vector<8x256xi1> to vector<8x256xi32>
      %263 = arith.sitofp %262 : vector<8x256xi32> to vector<8x256xf32>
      %264 = arith.addf %259, %263 : vector<8x256xf32>
      %c3_i32_96 = arith.constant 3 : i32
      %265 = tpu.dynamic_rotate %arg9 by %c3_i32_96 dim 1 : vector<8x256xf32>, i32 -> vector<8x256xf32>
      %266 = arith.cmpf oeq, %1, %265 : vector<8x256xf32>
      %267 = arith.extui %266 : vector<8x256xi1> to vector<8x256xi32>
      %268 = arith.sitofp %267 : vector<8x256xi32> to vector<8x256xf32>
      %269 = arith.addf %264, %268 : vector<8x256xf32>
      %c4_i32_97 = arith.constant 4 : i32
      %270 = tpu.dynamic_rotate %arg9 by %c4_i32_97 dim 1 : vector<8x256xf32>, i32 -> vector<8x256xf32>
      %271 = arith.cmpf oeq, %1, %270 : vector<8x256xf32>
      %272 = arith.extui %271 : vector<8x256xi1> to vector<8x256xi32>
      %273 = arith.sitofp %272 : vector<8x256xi32> to vector<8x256xf32>
      %274 = arith.addf %269, %273 : vector<8x256xf32>
      %c5_i32_98 = arith.constant 5 : i32
      %275 = tpu.dynamic_rotate %arg9 by %c5_i32_98 dim 1 : vector<8x256xf32>, i32 -> vector<8x256xf32>
      %276 = arith.cmpf oeq, %1, %275 : vector<8x256xf32>
      %277 = arith.extui %276 : vector<8x256xi1> to vector<8x256xi32>
      %278 = arith.sitofp %277 : vector<8x256xi32> to vector<8x256xf32>
      %279 = arith.addf %274, %278 : vector<8x256xf32>
      %c6_i32_99 = arith.constant 6 : i32
      %280 = tpu.dynamic_rotate %arg9 by %c6_i32_99 dim 1 : vector<8x256xf32>, i32 -> vector<8x256xf32>
      %281 = arith.cmpf oeq, %1, %280 : vector<8x256xf32>
      %282 = arith.extui %281 : vector<8x256xi1> to vector<8x256xi32>
      %283 = arith.sitofp %282 : vector<8x256xi32> to vector<8x256xf32>
      %284 = arith.addf %279, %283 : vector<8x256xf32>
      %c7_i32_100 = arith.constant 7 : i32
      %285 = tpu.dynamic_rotate %arg9 by %c7_i32_100 dim 1 : vector<8x256xf32>, i32 -> vector<8x256xf32>
      %286 = arith.cmpf oeq, %1, %285 : vector<8x256xf32>
      %287 = arith.extui %286 : vector<8x256xi1> to vector<8x256xi32>
      %288 = arith.sitofp %287 : vector<8x256xi32> to vector<8x256xf32>
      %289 = arith.addf %284, %288 : vector<8x256xf32>
      %290 = arith.addf %arg8, %289 : vector<8x256xf32>
      %c8_i32 = arith.constant 8 : i32
      %291 = tpu.dynamic_rotate %arg9 by %c8_i32 dim 1 : vector<8x256xf32>, i32 -> vector<8x256xf32>
      scf.yield %290, %291 : vector<8x256xf32>, vector<8x256xf32>
    }
    %c4_i32 = arith.constant 4 : i32
    %15 = tpu.dynamic_rotate %1 by %c4_i32 dim 0 : vector<8x256xf32>, i32 -> vector<8x256xf32>
    %c0_i32_15 = arith.constant 0 : i32
    %c32_i32_16 = arith.constant 32 : i32
    %16 = arith.addi %c0_i32_15, %c32_i32_16 : i32
    %c1_i32_17 = arith.constant 1 : i32
    %17:2 = scf.for %arg7 = %c0_i32_15 to %16 step %c1_i32_17 iter_args(%arg8 = %14#0, %arg9 = %15) -> (vector<8x256xf32>, vector<8x256xf32>)  : i32 {
      %252 = arith.cmpf oeq, %1, %arg9 : vector<8x256xf32>
      %253 = arith.extui %252 : vector<8x256xi1> to vector<8x256xi32>
      %254 = arith.sitofp %253 : vector<8x256xi32> to vector<8x256xf32>
      %c1_i32_94 = arith.constant 1 : i32
      %255 = tpu.dynamic_rotate %arg9 by %c1_i32_94 dim 1 : vector<8x256xf32>, i32 -> vector<8x256xf32>
      %256 = arith.cmpf oeq, %1, %255 : vector<8x256xf32>
      %257 = arith.extui %256 : vector<8x256xi1> to vector<8x256xi32>
      %258 = arith.sitofp %257 : vector<8x256xi32> to vector<8x256xf32>
      %259 = arith.addf %254, %258 : vector<8x256xf32>
      %c2_i32_95 = arith.constant 2 : i32
      %260 = tpu.dynamic_rotate %arg9 by %c2_i32_95 dim 1 : vector<8x256xf32>, i32 -> vector<8x256xf32>
      %261 = arith.cmpf oeq, %1, %260 : vector<8x256xf32>
      %262 = arith.extui %261 : vector<8x256xi1> to vector<8x256xi32>
      %263 = arith.sitofp %262 : vector<8x256xi32> to vector<8x256xf32>
      %264 = arith.addf %259, %263 : vector<8x256xf32>
      %c3_i32_96 = arith.constant 3 : i32
      %265 = tpu.dynamic_rotate %arg9 by %c3_i32_96 dim 1 : vector<8x256xf32>, i32 -> vector<8x256xf32>
      %266 = arith.cmpf oeq, %1, %265 : vector<8x256xf32>
      %267 = arith.extui %266 : vector<8x256xi1> to vector<8x256xi32>
      %268 = arith.sitofp %267 : vector<8x256xi32> to vector<8x256xf32>
      %269 = arith.addf %264, %268 : vector<8x256xf32>
      %c4_i32_97 = arith.constant 4 : i32
      %270 = tpu.dynamic_rotate %arg9 by %c4_i32_97 dim 1 : vector<8x256xf32>, i32 -> vector<8x256xf32>
      %271 = arith.cmpf oeq, %1, %270 : vector<8x256xf32>
      %272 = arith.extui %271 : vector<8x256xi1> to vector<8x256xi32>
      %273 = arith.sitofp %272 : vector<8x256xi32> to vector<8x256xf32>
      %274 = arith.addf %269, %273 : vector<8x256xf32>
      %c5_i32_98 = arith.constant 5 : i32
      %275 = tpu.dynamic_rotate %arg9 by %c5_i32_98 dim 1 : vector<8x256xf32>, i32 -> vector<8x256xf32>
      %276 = arith.cmpf oeq, %1, %275 : vector<8x256xf32>
      %277 = arith.extui %276 : vector<8x256xi1> to vector<8x256xi32>
      %278 = arith.sitofp %277 : vector<8x256xi32> to vector<8x256xf32>
      %279 = arith.addf %274, %278 : vector<8x256xf32>
      %c6_i32_99 = arith.constant 6 : i32
      %280 = tpu.dynamic_rotate %arg9 by %c6_i32_99 dim 1 : vector<8x256xf32>, i32 -> vector<8x256xf32>
      %281 = arith.cmpf oeq, %1, %280 : vector<8x256xf32>
      %282 = arith.extui %281 : vector<8x256xi1> to vector<8x256xi32>
      %283 = arith.sitofp %282 : vector<8x256xi32> to vector<8x256xf32>
      %284 = arith.addf %279, %283 : vector<8x256xf32>
      %c7_i32_100 = arith.constant 7 : i32
      %285 = tpu.dynamic_rotate %arg9 by %c7_i32_100 dim 1 : vector<8x256xf32>, i32 -> vector<8x256xf32>
      %286 = arith.cmpf oeq, %1, %285 : vector<8x256xf32>
      %287 = arith.extui %286 : vector<8x256xi1> to vector<8x256xi32>
      %288 = arith.sitofp %287 : vector<8x256xi32> to vector<8x256xf32>
      %289 = arith.addf %284, %288 : vector<8x256xf32>
      %290 = arith.addf %arg8, %289 : vector<8x256xf32>
      %c8_i32 = arith.constant 8 : i32
      %291 = tpu.dynamic_rotate %arg9 by %c8_i32 dim 1 : vector<8x256xf32>, i32 -> vector<8x256xf32>
      scf.yield %290, %291 : vector<8x256xf32>, vector<8x256xf32>
    }
    %c5_i32 = arith.constant 5 : i32
    %18 = tpu.dynamic_rotate %1 by %c5_i32 dim 0 : vector<8x256xf32>, i32 -> vector<8x256xf32>
    %c0_i32_18 = arith.constant 0 : i32
    %c32_i32_19 = arith.constant 32 : i32
    %19 = arith.addi %c0_i32_18, %c32_i32_19 : i32
    %c1_i32_20 = arith.constant 1 : i32
    %20:2 = scf.for %arg7 = %c0_i32_18 to %19 step %c1_i32_20 iter_args(%arg8 = %17#0, %arg9 = %18) -> (vector<8x256xf32>, vector<8x256xf32>)  : i32 {
      %252 = arith.cmpf oeq, %1, %arg9 : vector<8x256xf32>
      %253 = arith.extui %252 : vector<8x256xi1> to vector<8x256xi32>
      %254 = arith.sitofp %253 : vector<8x256xi32> to vector<8x256xf32>
      %c1_i32_94 = arith.constant 1 : i32
      %255 = tpu.dynamic_rotate %arg9 by %c1_i32_94 dim 1 : vector<8x256xf32>, i32 -> vector<8x256xf32>
      %256 = arith.cmpf oeq, %1, %255 : vector<8x256xf32>
      %257 = arith.extui %256 : vector<8x256xi1> to vector<8x256xi32>
      %258 = arith.sitofp %257 : vector<8x256xi32> to vector<8x256xf32>
      %259 = arith.addf %254, %258 : vector<8x256xf32>
      %c2_i32_95 = arith.constant 2 : i32
      %260 = tpu.dynamic_rotate %arg9 by %c2_i32_95 dim 1 : vector<8x256xf32>, i32 -> vector<8x256xf32>
      %261 = arith.cmpf oeq, %1, %260 : vector<8x256xf32>
      %262 = arith.extui %261 : vector<8x256xi1> to vector<8x256xi32>
      %263 = arith.sitofp %262 : vector<8x256xi32> to vector<8x256xf32>
      %264 = arith.addf %259, %263 : vector<8x256xf32>
      %c3_i32_96 = arith.constant 3 : i32
      %265 = tpu.dynamic_rotate %arg9 by %c3_i32_96 dim 1 : vector<8x256xf32>, i32 -> vector<8x256xf32>
      %266 = arith.cmpf oeq, %1, %265 : vector<8x256xf32>
      %267 = arith.extui %266 : vector<8x256xi1> to vector<8x256xi32>
      %268 = arith.sitofp %267 : vector<8x256xi32> to vector<8x256xf32>
      %269 = arith.addf %264, %268 : vector<8x256xf32>
      %c4_i32_97 = arith.constant 4 : i32
      %270 = tpu.dynamic_rotate %arg9 by %c4_i32_97 dim 1 : vector<8x256xf32>, i32 -> vector<8x256xf32>
      %271 = arith.cmpf oeq, %1, %270 : vector<8x256xf32>
      %272 = arith.extui %271 : vector<8x256xi1> to vector<8x256xi32>
      %273 = arith.sitofp %272 : vector<8x256xi32> to vector<8x256xf32>
      %274 = arith.addf %269, %273 : vector<8x256xf32>
      %c5_i32_98 = arith.constant 5 : i32
      %275 = tpu.dynamic_rotate %arg9 by %c5_i32_98 dim 1 : vector<8x256xf32>, i32 -> vector<8x256xf32>
      %276 = arith.cmpf oeq, %1, %275 : vector<8x256xf32>
      %277 = arith.extui %276 : vector<8x256xi1> to vector<8x256xi32>
      %278 = arith.sitofp %277 : vector<8x256xi32> to vector<8x256xf32>
      %279 = arith.addf %274, %278 : vector<8x256xf32>
      %c6_i32_99 = arith.constant 6 : i32
      %280 = tpu.dynamic_rotate %arg9 by %c6_i32_99 dim 1 : vector<8x256xf32>, i32 -> vector<8x256xf32>
      %281 = arith.cmpf oeq, %1, %280 : vector<8x256xf32>
      %282 = arith.extui %281 : vector<8x256xi1> to vector<8x256xi32>
      %283 = arith.sitofp %282 : vector<8x256xi32> to vector<8x256xf32>
      %284 = arith.addf %279, %283 : vector<8x256xf32>
      %c7_i32_100 = arith.constant 7 : i32
      %285 = tpu.dynamic_rotate %arg9 by %c7_i32_100 dim 1 : vector<8x256xf32>, i32 -> vector<8x256xf32>
      %286 = arith.cmpf oeq, %1, %285 : vector<8x256xf32>
      %287 = arith.extui %286 : vector<8x256xi1> to vector<8x256xi32>
      %288 = arith.sitofp %287 : vector<8x256xi32> to vector<8x256xf32>
      %289 = arith.addf %284, %288 : vector<8x256xf32>
      %290 = arith.addf %arg8, %289 : vector<8x256xf32>
      %c8_i32 = arith.constant 8 : i32
      %291 = tpu.dynamic_rotate %arg9 by %c8_i32 dim 1 : vector<8x256xf32>, i32 -> vector<8x256xf32>
      scf.yield %290, %291 : vector<8x256xf32>, vector<8x256xf32>
    }
    %c6_i32 = arith.constant 6 : i32
    %21 = tpu.dynamic_rotate %1 by %c6_i32 dim 0 : vector<8x256xf32>, i32 -> vector<8x256xf32>
    %c0_i32_21 = arith.constant 0 : i32
    %c32_i32_22 = arith.constant 32 : i32
    %22 = arith.addi %c0_i32_21, %c32_i32_22 : i32
    %c1_i32_23 = arith.constant 1 : i32
    %23:2 = scf.for %arg7 = %c0_i32_21 to %22 step %c1_i32_23 iter_args(%arg8 = %20#0, %arg9 = %21) -> (vector<8x256xf32>, vector<8x256xf32>)  : i32 {
      %252 = arith.cmpf oeq, %1, %arg9 : vector<8x256xf32>
      %253 = arith.extui %252 : vector<8x256xi1> to vector<8x256xi32>
      %254 = arith.sitofp %253 : vector<8x256xi32> to vector<8x256xf32>
      %c1_i32_94 = arith.constant 1 : i32
      %255 = tpu.dynamic_rotate %arg9 by %c1_i32_94 dim 1 : vector<8x256xf32>, i32 -> vector<8x256xf32>
      %256 = arith.cmpf oeq, %1, %255 : vector<8x256xf32>
      %257 = arith.extui %256 : vector<8x256xi1> to vector<8x256xi32>
      %258 = arith.sitofp %257 : vector<8x256xi32> to vector<8x256xf32>
      %259 = arith.addf %254, %258 : vector<8x256xf32>
      %c2_i32_95 = arith.constant 2 : i32
      %260 = tpu.dynamic_rotate %arg9 by %c2_i32_95 dim 1 : vector<8x256xf32>, i32 -> vector<8x256xf32>
      %261 = arith.cmpf oeq, %1, %260 : vector<8x256xf32>
      %262 = arith.extui %261 : vector<8x256xi1> to vector<8x256xi32>
      %263 = arith.sitofp %262 : vector<8x256xi32> to vector<8x256xf32>
      %264 = arith.addf %259, %263 : vector<8x256xf32>
      %c3_i32_96 = arith.constant 3 : i32
      %265 = tpu.dynamic_rotate %arg9 by %c3_i32_96 dim 1 : vector<8x256xf32>, i32 -> vector<8x256xf32>
      %266 = arith.cmpf oeq, %1, %265 : vector<8x256xf32>
      %267 = arith.extui %266 : vector<8x256xi1> to vector<8x256xi32>
      %268 = arith.sitofp %267 : vector<8x256xi32> to vector<8x256xf32>
      %269 = arith.addf %264, %268 : vector<8x256xf32>
      %c4_i32_97 = arith.constant 4 : i32
      %270 = tpu.dynamic_rotate %arg9 by %c4_i32_97 dim 1 : vector<8x256xf32>, i32 -> vector<8x256xf32>
      %271 = arith.cmpf oeq, %1, %270 : vector<8x256xf32>
      %272 = arith.extui %271 : vector<8x256xi1> to vector<8x256xi32>
      %273 = arith.sitofp %272 : vector<8x256xi32> to vector<8x256xf32>
      %274 = arith.addf %269, %273 : vector<8x256xf32>
      %c5_i32_98 = arith.constant 5 : i32
      %275 = tpu.dynamic_rotate %arg9 by %c5_i32_98 dim 1 : vector<8x256xf32>, i32 -> vector<8x256xf32>
      %276 = arith.cmpf oeq, %1, %275 : vector<8x256xf32>
      %277 = arith.extui %276 : vector<8x256xi1> to vector<8x256xi32>
      %278 = arith.sitofp %277 : vector<8x256xi32> to vector<8x256xf32>
      %279 = arith.addf %274, %278 : vector<8x256xf32>
      %c6_i32_99 = arith.constant 6 : i32
      %280 = tpu.dynamic_rotate %arg9 by %c6_i32_99 dim 1 : vector<8x256xf32>, i32 -> vector<8x256xf32>
      %281 = arith.cmpf oeq, %1, %280 : vector<8x256xf32>
      %282 = arith.extui %281 : vector<8x256xi1> to vector<8x256xi32>
      %283 = arith.sitofp %282 : vector<8x256xi32> to vector<8x256xf32>
      %284 = arith.addf %279, %283 : vector<8x256xf32>
      %c7_i32_100 = arith.constant 7 : i32
      %285 = tpu.dynamic_rotate %arg9 by %c7_i32_100 dim 1 : vector<8x256xf32>, i32 -> vector<8x256xf32>
      %286 = arith.cmpf oeq, %1, %285 : vector<8x256xf32>
      %287 = arith.extui %286 : vector<8x256xi1> to vector<8x256xi32>
      %288 = arith.sitofp %287 : vector<8x256xi32> to vector<8x256xf32>
      %289 = arith.addf %284, %288 : vector<8x256xf32>
      %290 = arith.addf %arg8, %289 : vector<8x256xf32>
      %c8_i32 = arith.constant 8 : i32
      %291 = tpu.dynamic_rotate %arg9 by %c8_i32 dim 1 : vector<8x256xf32>, i32 -> vector<8x256xf32>
      scf.yield %290, %291 : vector<8x256xf32>, vector<8x256xf32>
    }
    %c7_i32 = arith.constant 7 : i32
    %24 = tpu.dynamic_rotate %1 by %c7_i32 dim 0 : vector<8x256xf32>, i32 -> vector<8x256xf32>
    %c0_i32_24 = arith.constant 0 : i32
    %c32_i32_25 = arith.constant 32 : i32
    %25 = arith.addi %c0_i32_24, %c32_i32_25 : i32
    %c1_i32_26 = arith.constant 1 : i32
    %26:2 = scf.for %arg7 = %c0_i32_24 to %25 step %c1_i32_26 iter_args(%arg8 = %23#0, %arg9 = %24) -> (vector<8x256xf32>, vector<8x256xf32>)  : i32 {
      %252 = arith.cmpf oeq, %1, %arg9 : vector<8x256xf32>
      %253 = arith.extui %252 : vector<8x256xi1> to vector<8x256xi32>
      %254 = arith.sitofp %253 : vector<8x256xi32> to vector<8x256xf32>
      %c1_i32_94 = arith.constant 1 : i32
      %255 = tpu.dynamic_rotate %arg9 by %c1_i32_94 dim 1 : vector<8x256xf32>, i32 -> vector<8x256xf32>
      %256 = arith.cmpf oeq, %1, %255 : vector<8x256xf32>
      %257 = arith.extui %256 : vector<8x256xi1> to vector<8x256xi32>
      %258 = arith.sitofp %257 : vector<8x256xi32> to vector<8x256xf32>
      %259 = arith.addf %254, %258 : vector<8x256xf32>
      %c2_i32_95 = arith.constant 2 : i32
      %260 = tpu.dynamic_rotate %arg9 by %c2_i32_95 dim 1 : vector<8x256xf32>, i32 -> vector<8x256xf32>
      %261 = arith.cmpf oeq, %1, %260 : vector<8x256xf32>
      %262 = arith.extui %261 : vector<8x256xi1> to vector<8x256xi32>
      %263 = arith.sitofp %262 : vector<8x256xi32> to vector<8x256xf32>
      %264 = arith.addf %259, %263 : vector<8x256xf32>
      %c3_i32_96 = arith.constant 3 : i32
      %265 = tpu.dynamic_rotate %arg9 by %c3_i32_96 dim 1 : vector<8x256xf32>, i32 -> vector<8x256xf32>
      %266 = arith.cmpf oeq, %1, %265 : vector<8x256xf32>
      %267 = arith.extui %266 : vector<8x256xi1> to vector<8x256xi32>
      %268 = arith.sitofp %267 : vector<8x256xi32> to vector<8x256xf32>
      %269 = arith.addf %264, %268 : vector<8x256xf32>
      %c4_i32_97 = arith.constant 4 : i32
      %270 = tpu.dynamic_rotate %arg9 by %c4_i32_97 dim 1 : vector<8x256xf32>, i32 -> vector<8x256xf32>
      %271 = arith.cmpf oeq, %1, %270 : vector<8x256xf32>
      %272 = arith.extui %271 : vector<8x256xi1> to vector<8x256xi32>
      %273 = arith.sitofp %272 : vector<8x256xi32> to vector<8x256xf32>
      %274 = arith.addf %269, %273 : vector<8x256xf32>
      %c5_i32_98 = arith.constant 5 : i32
      %275 = tpu.dynamic_rotate %arg9 by %c5_i32_98 dim 1 : vector<8x256xf32>, i32 -> vector<8x256xf32>
      %276 = arith.cmpf oeq, %1, %275 : vector<8x256xf32>
      %277 = arith.extui %276 : vector<8x256xi1> to vector<8x256xi32>
      %278 = arith.sitofp %277 : vector<8x256xi32> to vector<8x256xf32>
      %279 = arith.addf %274, %278 : vector<8x256xf32>
      %c6_i32_99 = arith.constant 6 : i32
      %280 = tpu.dynamic_rotate %arg9 by %c6_i32_99 dim 1 : vector<8x256xf32>, i32 -> vector<8x256xf32>
      %281 = arith.cmpf oeq, %1, %280 : vector<8x256xf32>
      %282 = arith.extui %281 : vector<8x256xi1> to vector<8x256xi32>
      %283 = arith.sitofp %282 : vector<8x256xi32> to vector<8x256xf32>
      %284 = arith.addf %279, %283 : vector<8x256xf32>
      %c7_i32_100 = arith.constant 7 : i32
      %285 = tpu.dynamic_rotate %arg9 by %c7_i32_100 dim 1 : vector<8x256xf32>, i32 -> vector<8x256xf32>
      %286 = arith.cmpf oeq, %1, %285 : vector<8x256xf32>
      %287 = arith.extui %286 : vector<8x256xi1> to vector<8x256xi32>
      %288 = arith.sitofp %287 : vector<8x256xi32> to vector<8x256xf32>
      %289 = arith.addf %284, %288 : vector<8x256xf32>
      %290 = arith.addf %arg8, %289 : vector<8x256xf32>
      %c8_i32 = arith.constant 8 : i32
      %291 = tpu.dynamic_rotate %arg9 by %c8_i32 dim 1 : vector<8x256xf32>, i32 -> vector<8x256xf32>
      scf.yield %290, %291 : vector<8x256xf32>, vector<8x256xf32>
    }
    %cst_27 = arith.constant 1.000000e+00 : f32
    %27 = vector.broadcast %cst_27 : f32 to vector<8x256xf32>
    %28 = arith.maximumf %26#0, %27 : vector<8x256xf32>
    %29 = tpu.reciprocal %28 {approx = true} : vector<8x256xf32> -> vector<8x256xf32>
    %cst_28 = arith.constant 2.550000e+02 : f32
    %30 = vector.broadcast %cst_28 : f32 to vector<8x256xf32>
    %31 = arith.mulf %30, %29 : vector<8x256xf32>
    %32 = tpu.iota {dimensions = array<i32: 1>} : vector<8x256xi32>
    %c15_i32 = arith.constant 15 : i32
    %33 = vector.broadcast %c15_i32 : i32 to vector<8x256xi32>
    %34 = arith.andi %32, %33 : vector<8x256xi32>
    %c0_i32_29 = arith.constant 0 : i32
    %35 = vector.broadcast %c0_i32_29 : i32 to vector<8x256xi32>
    %36 = arith.cmpi ne, %34, %35 : vector<8x256xi32>
    %37 = arith.extui %36 : vector<8x256xi1> to vector<8x256xi32>
    %38 = arith.sitofp %37 : vector<8x256xi32> to vector<8x256xf32>
    %c16_i32 = arith.constant 16 : i32
    %39 = vector.broadcast %c16_i32 : i32 to vector<8x256xi32>
    %40 = arith.cmpi sge, %32, %39 : vector<8x256xi32>
    %41 = arith.extui %40 : vector<8x256xi1> to vector<8x256xi32>
    %42 = arith.sitofp %41 : vector<8x256xi32> to vector<8x256xf32>
    %c1_i32_30 = arith.constant 1 : i32
    %43 = tpu.dynamic_rotate %0 by %c1_i32_30 dim 1 : vector<8x256xf32>, i32 -> vector<8x256xf32>
    %44 = arith.subf %0, %43 : vector<8x256xf32>
    %c1_i32_31 = arith.constant 1 : i32
    %45 = tpu.dynamic_rotate %1 by %c1_i32_31 dim 1 : vector<8x256xf32>, i32 -> vector<8x256xf32>
    %46 = arith.subf %1, %45 : vector<8x256xf32>
    %c16_i32_32 = arith.constant 16 : i32
    %47 = tpu.dynamic_rotate %0 by %c16_i32_32 dim 1 : vector<8x256xf32>, i32 -> vector<8x256xf32>
    %48 = arith.subf %0, %47 : vector<8x256xf32>
    %c16_i32_33 = arith.constant 16 : i32
    %49 = tpu.dynamic_rotate %1 by %c16_i32_33 dim 1 : vector<8x256xf32>, i32 -> vector<8x256xf32>
    %50 = arith.subf %1, %49 : vector<8x256xf32>
    %c1_i32_34 = arith.constant 1 : i32
    %51 = tpu.dynamic_rotate %31 by %c1_i32_34 dim 1 : vector<8x256xf32>, i32 -> vector<8x256xf32>
    %52 = arith.mulf %31, %51 : vector<8x256xf32>
    %53 = arith.mulf %52, %38 : vector<8x256xf32>
    %c16_i32_35 = arith.constant 16 : i32
    %54 = tpu.dynamic_rotate %31 by %c16_i32_35 dim 1 : vector<8x256xf32>, i32 -> vector<8x256xf32>
    %55 = arith.mulf %31, %54 : vector<8x256xf32>
    %56 = arith.mulf %55, %42 : vector<8x256xf32>
    %57 = arith.subf %44, %46 : vector<8x256xf32>
    %58 = math.absf %57 : vector<8x256xf32>
    %59 = arith.mulf %58, %53 : vector<8x256xf32>
    %60 = vector.shape_cast %59 : vector<8x256xf32> to vector<1x8x256xf32>
    %cst_36 = arith.constant dense<0.000000e+00> : vector<1xf32>
    %61 = vector.multi_reduction <add>, %60, %cst_36 [1, 2] : vector<1x8x256xf32> to vector<1xf32>
    %62 = vector.shape_cast %61 : vector<1xf32> to vector<1x1x1xf32>
    %63 = vector.extract %62[0, 0, 0] : f32 from vector<1x1x1xf32>
    %cst_37 = arith.constant 5.2083336E-4 : f32
    %64 = arith.mulf %63, %cst_37 : f32
    %65 = arith.subf %48, %50 : vector<8x256xf32>
    %66 = math.absf %65 : vector<8x256xf32>
    %67 = arith.mulf %66, %56 : vector<8x256xf32>
    %68 = vector.shape_cast %67 : vector<8x256xf32> to vector<1x8x256xf32>
    %cst_38 = arith.constant dense<0.000000e+00> : vector<1xf32>
    %69 = vector.multi_reduction <add>, %68, %cst_38 [1, 2] : vector<1x8x256xf32> to vector<1xf32>
    %70 = vector.shape_cast %69 : vector<1xf32> to vector<1x1x1xf32>
    %71 = vector.extract %70[0, 0, 0] : f32 from vector<1x1x1xf32>
    %cst_39 = arith.constant 5.2083336E-4 : f32
    %72 = arith.mulf %71, %cst_39 : f32
    %73 = arith.addf %64, %72 : f32
    %74 = math.absf %46 : vector<8x256xf32>
    %75 = arith.mulf %74, %38 : vector<8x256xf32>
    %76 = math.absf %50 : vector<8x256xf32>
    %77 = arith.mulf %76, %42 : vector<8x256xf32>
    %78 = tpu.concatenate %75, %77 in 1 : vector<8x256xf32>, vector<8x256xf32> -> vector<8x512xf32>
    %cst_40 = arith.constant dense<0.000000e+00> : vector<8x512xf32>
    %79 = tpu.matmul %2, %78, %cst_40 {dimension_numbers = #tpu.dot_dimension_numbers<[1], [0], [0], [1], [0, 0, 1, 1], [], []>} : vector<8x8xf32>, vector<8x512xf32>, vector<8x512xf32> -> vector<8x512xf32>
    %80 = vector.extract_strided_slice %79 {offsets = [0, 0], sizes = [8, 256], strides = [1, 1]} : vector<8x512xf32> to vector<8x256xf32>
    %81 = vector.extract_strided_slice %79 {offsets = [0, 256], sizes = [8, 256], strides = [1, 1]} : vector<8x512xf32> to vector<8x256xf32>
    %cst_41 = arith.constant 0.000000e+00 : f32
    %82 = vector.broadcast %cst_41 : f32 to vector<8x256xf32>
    %83 = arith.subf %82, %80 : vector<8x256xf32>
    %84 = arith.mulf %83, %53 : vector<8x256xf32>
    %85 = math.exp %84 : vector<8x256xf32>
    %86 = arith.mulf %44, %85 : vector<8x256xf32>
    %cst_42 = arith.constant 0.000000e+00 : f32
    %87 = vector.broadcast %cst_42 : f32 to vector<8x256xf32>
    %88 = arith.subf %87, %81 : vector<8x256xf32>
    %89 = arith.mulf %88, %56 : vector<8x256xf32>
    %90 = math.exp %89 : vector<8x256xf32>
    %91 = arith.mulf %48, %90 : vector<8x256xf32>
    %92 = math.absf %86 : vector<8x256xf32>
    %93 = arith.mulf %92, %38 : vector<8x256xf32>
    %94 = vector.shape_cast %93 : vector<8x256xf32> to vector<1x8x256xf32>
    %cst_43 = arith.constant dense<0.000000e+00> : vector<1xf32>
    %95 = vector.multi_reduction <add>, %94, %cst_43 [1, 2] : vector<1x8x256xf32> to vector<1xf32>
    %96 = vector.shape_cast %95 : vector<1xf32> to vector<1x1x1xf32>
    %97 = vector.extract %96[0, 0, 0] : f32 from vector<1x1x1xf32>
    %cst_44 = arith.constant 5.2083336E-4 : f32
    %98 = arith.mulf %97, %cst_44 : f32
    %99 = math.absf %91 : vector<8x256xf32>
    %100 = arith.mulf %99, %42 : vector<8x256xf32>
    %101 = vector.shape_cast %100 : vector<8x256xf32> to vector<1x8x256xf32>
    %cst_45 = arith.constant dense<0.000000e+00> : vector<1xf32>
    %102 = vector.multi_reduction <add>, %101, %cst_45 [1, 2] : vector<1x8x256xf32> to vector<1xf32>
    %103 = vector.shape_cast %102 : vector<1xf32> to vector<1x1x1xf32>
    %104 = vector.extract %103[0, 0, 0] : f32 from vector<1x1x1xf32>
    %cst_46 = arith.constant 5.2083336E-4 : f32
    %105 = arith.mulf %104, %cst_46 : f32
    %106 = arith.addf %98, %105 : f32
    %cst_47 = arith.constant 9.99999997E-7 : f32
    %107 = vector.broadcast %cst_47 : f32 to vector<8x256xf32>
    %108 = arith.maximumf %1, %107 : vector<8x256xf32>
    %109 = math.log %108 : vector<8x256xf32>
    %cst_48 = arith.constant 9.99999997E-7 : f32
    %110 = vector.broadcast %cst_48 : f32 to vector<8x256xf32>
    %111 = arith.maximumf %0, %110 : vector<8x256xf32>
    %112 = math.log %111 : vector<8x256xf32>
    %113 = arith.subf %109, %112 : vector<8x256xf32>
    %114 = arith.mulf %113, %31 : vector<8x256xf32>
    %115 = vector.shape_cast %114 : vector<8x256xf32> to vector<1x8x256xf32>
    %cst_49 = arith.constant dense<0.000000e+00> : vector<1xf32>
    %116 = vector.multi_reduction <add>, %115, %cst_49 [1, 2] : vector<1x8x256xf32> to vector<1xf32>
    %117 = vector.shape_cast %116 : vector<1xf32> to vector<1x1x1xf32>
    %118 = vector.extract %117[0, 0, 0] : f32 from vector<1x1x1xf32>
    %cst_50 = arith.constant 2.048000e+03 : f32
    %119 = arith.divf %118, %cst_50 : f32
    %120 = arith.mulf %114, %114 : vector<8x256xf32>
    %121 = vector.shape_cast %120 : vector<8x256xf32> to vector<1x8x256xf32>
    %cst_51 = arith.constant dense<0.000000e+00> : vector<1xf32>
    %122 = vector.multi_reduction <add>, %121, %cst_51 [1, 2] : vector<1x8x256xf32> to vector<1xf32>
    %123 = vector.shape_cast %122 : vector<1xf32> to vector<1x1x1xf32>
    %124 = vector.extract %123[0, 0, 0] : f32 from vector<1x1x1xf32>
    %cst_52 = arith.constant 2.048000e+03 : f32
    %125 = arith.divf %124, %cst_52 : f32
    %cst_53 = arith.constant 5.000000e-01 : f32
    %126 = arith.mulf %cst_53, %119 : f32
    %127 = arith.mulf %126, %119 : f32
    %128 = arith.subf %125, %127 : f32
    %cst_54 = arith.constant 0.000000e+00 : f32
    %129 = arith.maximumf %128, %cst_54 : f32
    %130 = math.sqrt %129 : f32
    %131 = arith.subf %1, %0 : vector<8x256xf32>
    %132 = math.absf %131 : vector<8x256xf32>
    %133 = arith.mulf %132, %31 : vector<8x256xf32>
    %134 = vector.shape_cast %133 : vector<8x256xf32> to vector<1x8x256xf32>
    %cst_55 = arith.constant dense<0.000000e+00> : vector<1xf32>
    %135 = vector.multi_reduction <add>, %134, %cst_55 [1, 2] : vector<1x8x256xf32> to vector<1xf32>
    %136 = vector.shape_cast %135 : vector<1xf32> to vector<1x1x1xf32>
    %137 = vector.extract %136[0, 0, 0] : f32 from vector<1x1x1xf32>
    %cst_56 = arith.constant 2.048000e+03 : f32
    %138 = arith.divf %137, %cst_56 : f32
    tpu.wait_dma2 semaphore(%arg6 : memref<!tpu.dma_semaphore, #tpu.memory_space<semaphore_mem>>) src(%arg2 : memref<256x256xf32, #tpu.memory_space<any>>) dst(%arg5 : memref<256x256xf32, #tpu.memory_space<vmem>>)
    %c0_57 = arith.constant 0 : index
    %c0_58 = arith.constant 0 : index
    %139 = vector.load %arg5[%c0_57, %c0_58] : memref<256x256xf32, #tpu.memory_space<vmem>>, vector<256x256xf32>
    %140 = arith.mulf %0, %0 : vector<8x256xf32>
    %141 = arith.mulf %1, %1 : vector<8x256xf32>
    %142 = arith.mulf %0, %1 : vector<8x256xf32>
    %143 = tpu.concatenate %0, %1, %140, %141, %142 in 0 : vector<8x256xf32>, vector<8x256xf32>, vector<8x256xf32>, vector<8x256xf32>, vector<8x256xf32> -> vector<40x256xf32>
    %cst_59 = arith.constant dense<0.000000e+00> : vector<40x256xf32>
    %144 = tpu.matmul %143, %139, %cst_59 {dimension_numbers = #tpu.dot_dimension_numbers<[1], [0], [0], [1], [0, 0, 1, 1], [], []>} : vector<40x256xf32>, vector<256x256xf32>, vector<40x256xf32> -> vector<40x256xf32>
    %145 = vector.extract_strided_slice %144 {offsets = [0, 0], sizes = [8, 256], strides = [1, 1]} : vector<40x256xf32> to vector<8x256xf32>
    %146 = vector.extract_strided_slice %144 {offsets = [8, 0], sizes = [8, 256], strides = [1, 1]} : vector<40x256xf32> to vector<8x256xf32>
    %147 = vector.extract_strided_slice %144 {offsets = [16, 0], sizes = [8, 256], strides = [1, 1]} : vector<40x256xf32> to vector<8x256xf32>
    %148 = vector.extract_strided_slice %144 {offsets = [24, 0], sizes = [8, 256], strides = [1, 1]} : vector<40x256xf32> to vector<8x256xf32>
    %149 = vector.extract_strided_slice %144 {offsets = [32, 0], sizes = [8, 256], strides = [1, 1]} : vector<40x256xf32> to vector<8x256xf32>
    %150 = arith.mulf %145, %145 : vector<8x256xf32>
    %151 = arith.mulf %146, %146 : vector<8x256xf32>
    %152 = arith.mulf %145, %146 : vector<8x256xf32>
    %153 = arith.subf %147, %150 : vector<8x256xf32>
    %154 = arith.subf %148, %151 : vector<8x256xf32>
    %155 = arith.subf %149, %152 : vector<8x256xf32>
    %cst_60 = arith.constant 2.000000e+00 : f32
    %156 = vector.broadcast %cst_60 : f32 to vector<8x256xf32>
    %157 = arith.mulf %156, %152 : vector<8x256xf32>
    %cst_61 = arith.constant 9.99999974E-5 : f32
    %158 = vector.broadcast %cst_61 : f32 to vector<8x256xf32>
    %159 = arith.addf %157, %158 : vector<8x256xf32>
    %cst_62 = arith.constant 2.000000e+00 : f32
    %160 = vector.broadcast %cst_62 : f32 to vector<8x256xf32>
    %161 = arith.mulf %160, %155 : vector<8x256xf32>
    %cst_63 = arith.constant 8.99999984E-4 : f32
    %162 = vector.broadcast %cst_63 : f32 to vector<8x256xf32>
    %163 = arith.addf %161, %162 : vector<8x256xf32>
    %164 = arith.mulf %159, %163 : vector<8x256xf32>
    %165 = arith.addf %150, %151 : vector<8x256xf32>
    %cst_64 = arith.constant 9.99999974E-5 : f32
    %166 = vector.broadcast %cst_64 : f32 to vector<8x256xf32>
    %167 = arith.addf %165, %166 : vector<8x256xf32>
    %168 = arith.addf %153, %154 : vector<8x256xf32>
    %cst_65 = arith.constant 8.99999984E-4 : f32
    %169 = vector.broadcast %cst_65 : f32 to vector<8x256xf32>
    %170 = arith.addf %168, %169 : vector<8x256xf32>
    %171 = arith.mulf %167, %170 : vector<8x256xf32>
    %cst_66 = arith.constant 9.99999996E-13 : f32
    %172 = vector.broadcast %cst_66 : f32 to vector<8x256xf32>
    %173 = arith.addf %171, %172 : vector<8x256xf32>
    %174 = tpu.reciprocal %173 {approx = true} : vector<8x256xf32> -> vector<8x256xf32>
    %175 = arith.mulf %164, %174 : vector<8x256xf32>
    %cst_67 = arith.constant 1.000000e+00 : f32
    %176 = vector.broadcast %cst_67 : f32 to vector<8x256xf32>
    %177 = arith.subf %176, %175 : vector<8x256xf32>
    %cst_68 = arith.constant 5.000000e-01 : f32
    %178 = vector.broadcast %cst_68 : f32 to vector<8x256xf32>
    %179 = arith.mulf %178, %177 : vector<8x256xf32>
    %cst_69 = arith.constant 0.000000e+00 : f32
    %cst_70 = arith.constant 1.000000e+00 : f32
    %180 = vector.broadcast %cst_69 : f32 to vector<8x256xf32>
    %181 = arith.maximumf %180, %179 : vector<8x256xf32>
    %182 = vector.broadcast %cst_70 : f32 to vector<8x256xf32>
    %183 = arith.minimumf %182, %181 : vector<8x256xf32>
    %184 = vector.shape_cast %183 : vector<8x256xf32> to vector<1x8x256xf32>
    %cst_71 = arith.constant dense<0.000000e+00> : vector<1xf32>
    %185 = vector.multi_reduction <add>, %184, %cst_71 [1, 2] : vector<1x8x256xf32> to vector<1xf32>
    %186 = vector.shape_cast %185 : vector<1xf32> to vector<1x1x1xf32>
    %187 = vector.extract %186[0, 0, 0] : f32 from vector<1x1x1xf32>
    %cst_72 = arith.constant 2.048000e+03 : f32
    %188 = arith.divf %187, %cst_72 : f32
    %189 = vector.shape_cast %0 : vector<8x256xf32> to vector<1x8x256xf32>
    %cst_73 = arith.constant dense<0.000000e+00> : vector<1xf32>
    %190 = vector.multi_reduction <add>, %189, %cst_73 [1, 2] : vector<1x8x256xf32> to vector<1xf32>
    %191 = vector.shape_cast %190 : vector<1xf32> to vector<1x1x1xf32>
    %192 = vector.extract %191[0, 0, 0] : f32 from vector<1x1x1xf32>
    %cst_74 = arith.constant 2.048000e+03 : f32
    %193 = arith.divf %192, %cst_74 : f32
    %194 = vector.shape_cast %1 : vector<8x256xf32> to vector<1x8x256xf32>
    %cst_75 = arith.constant dense<0.000000e+00> : vector<1xf32>
    %195 = vector.multi_reduction <add>, %194, %cst_75 [1, 2] : vector<1x8x256xf32> to vector<1xf32>
    %196 = vector.shape_cast %195 : vector<1xf32> to vector<1x1x1xf32>
    %197 = vector.extract %196[0, 0, 0] : f32 from vector<1x1x1xf32>
    %cst_76 = arith.constant 2.048000e+03 : f32
    %198 = arith.divf %197, %cst_76 : f32
    %199 = vector.broadcast %193 : f32 to vector<8x256xf32>
    %200 = arith.subf %0, %199 : vector<8x256xf32>
    %201 = arith.mulf %200, %200 : vector<8x256xf32>
    %202 = vector.shape_cast %201 : vector<8x256xf32> to vector<1x8x256xf32>
    %cst_77 = arith.constant dense<0.000000e+00> : vector<1xf32>
    %203 = vector.multi_reduction <add>, %202, %cst_77 [1, 2] : vector<1x8x256xf32> to vector<1xf32>
    %204 = vector.shape_cast %203 : vector<1xf32> to vector<1x1x1xf32>
    %205 = vector.extract %204[0, 0, 0] : f32 from vector<1x1x1xf32>
    %cst_78 = arith.constant 2.047000e+03 : f32
    %206 = arith.divf %205, %cst_78 : f32
    %207 = vector.broadcast %198 : f32 to vector<8x256xf32>
    %208 = arith.subf %1, %207 : vector<8x256xf32>
    %209 = arith.mulf %208, %208 : vector<8x256xf32>
    %210 = vector.shape_cast %209 : vector<8x256xf32> to vector<1x8x256xf32>
    %cst_79 = arith.constant dense<0.000000e+00> : vector<1xf32>
    %211 = vector.multi_reduction <add>, %210, %cst_79 [1, 2] : vector<1x8x256xf32> to vector<1xf32>
    %212 = vector.shape_cast %211 : vector<1xf32> to vector<1x1x1xf32>
    %213 = vector.extract %212[0, 0, 0] : f32 from vector<1x1x1xf32>
    %cst_80 = arith.constant 2.047000e+03 : f32
    %214 = arith.divf %213, %cst_80 : f32
    %215 = arith.subf %206, %214 : f32
    %216 = arith.mulf %215, %215 : f32
    %217 = vector.shape_cast %0 : vector<8x256xf32> to vector<1x8x256xf32>
    %cst_81 = arith.constant dense<0x7F800000> : vector<1xf32>
    %218 = vector.multi_reduction <minimumf>, %217, %cst_81 [1, 2] : vector<1x8x256xf32> to vector<1xf32>
    %219 = vector.shape_cast %218 : vector<1xf32> to vector<1x1x1xf32>
    %220 = vector.extract %219[0, 0, 0] : f32 from vector<1x1x1xf32>
    %221 = vector.shape_cast %1 : vector<8x256xf32> to vector<1x8x256xf32>
    %cst_82 = arith.constant dense<0x7F800000> : vector<1xf32>
    %222 = vector.multi_reduction <minimumf>, %221, %cst_82 [1, 2] : vector<1x8x256xf32> to vector<1xf32>
    %223 = vector.shape_cast %222 : vector<1xf32> to vector<1x1x1xf32>
    %224 = vector.extract %223[0, 0, 0] : f32 from vector<1x1x1xf32>
    %225 = arith.subf %220, %224 : f32
    %226 = arith.mulf %225, %225 : f32
    %227 = vector.shape_cast %0 : vector<8x256xf32> to vector<1x8x256xf32>
    %cst_83 = arith.constant dense<0xFF800000> : vector<1xf32>
    %228 = vector.multi_reduction <maximumf>, %227, %cst_83 [1, 2] : vector<1x8x256xf32> to vector<1xf32>
    %229 = vector.shape_cast %228 : vector<1xf32> to vector<1x1x1xf32>
    %230 = vector.extract %229[0, 0, 0] : f32 from vector<1x1x1xf32>
    %231 = vector.shape_cast %1 : vector<8x256xf32> to vector<1x8x256xf32>
    %cst_84 = arith.constant dense<0xFF800000> : vector<1xf32>
    %232 = vector.multi_reduction <maximumf>, %231, %cst_84 [1, 2] : vector<1x8x256xf32> to vector<1xf32>
    %233 = vector.shape_cast %232 : vector<1xf32> to vector<1x1x1xf32>
    %234 = vector.extract %233[0, 0, 0] : f32 from vector<1x1x1xf32>
    %235 = arith.subf %230, %234 : f32
    %236 = arith.mulf %235, %235 : f32
    %237 = arith.addf %226, %236 : f32
    %cst_85 = arith.constant 5.000000e-01 : f32
    %238 = arith.mulf %cst_85, %130 : f32
    %cst_86 = arith.constant 1.000000e+01 : f32
    %239 = arith.mulf %cst_86, %73 : f32
    %240 = arith.addf %238, %239 : f32
    %cst_87 = arith.constant 5.000000e+00 : f32
    %241 = arith.mulf %cst_87, %188 : f32
    %242 = arith.addf %240, %241 : f32
    %cst_88 = arith.constant 1.000000e+01 : f32
    %243 = arith.mulf %cst_88, %106 : f32
    %244 = arith.addf %242, %243 : f32
    %cst_89 = arith.constant 1.000000e+00 : f32
    %245 = arith.mulf %cst_89, %138 : f32
    %246 = arith.addf %244, %245 : f32
    %cst_90 = arith.constant 1.000000e+00 : f32
    %247 = arith.mulf %cst_90, %216 : f32
    %248 = arith.addf %246, %247 : f32
    %cst_91 = arith.constant 1.000000e+00 : f32
    %249 = arith.mulf %cst_91, %237 : f32
    %250 = arith.addf %248, %249 : f32
    %c0_92 = arith.constant 0 : index
    %c0_93 = arith.constant 0 : index
    %251 = memref.load %arg4[%c0_92, %c0_93] : memref<1x1xf32, #tpu.memory_space<smem>>
    memref.store %250, %arg4[%c0_92, %c0_93] : memref<1x1xf32, #tpu.memory_space<smem>>
    return
  }
}

</mosaic_0001>

<bundles_post_ra>
// kernel: weighted_combined_loss.1
= control target key start
LH: loop header
LB: loop body
LE: loop exit
PB: predicated region body
PF: predicated region fallthrough
CT: control target
= control target key end

     0   :  { %9 = vsyncpa [#allocation5], 0  ;;  %s3043_s19 = smov [#allocation2]   ;;  %s4062_s0 = inlined_call_operand.vmem [shape: f32[8,256], index: 0, kind: input, shape index: {}]   ;;  %s4063_s1 = inlined_call_operand.vmem [shape: f32[8,256], index: 1, kind: input, shape index: {}]   ;;  %s4064_s2 = inlined_call_operand.hbm [shape: f32[256,256], index: 2, kind: input, shape index: {}]   ;;  %s4065_s3 = inlined_call_operand.vmem [shape: f32[8,8], index: 3, kind: input, shape index: {}]   ;;  %s4066_s4 = inlined_call_operand.hbm [shape: f32[1,1], index: 4, kind: output, shape index: {}]  }
   0x1   :  { %v3149_v0 = vld [vmem:[%s4062_s0] sm:$0xff]  ;;  %v3154_v1 = vld [vmem:[%s4062_s0 + $0x8] sm:$0xff]  ;;  %s23_s20 = sshll.u32 %s3043_s19, 4  ;;  %s2687_s28 = scalar_lea.hbm %s4064_s2, 8192  ;;  %s24_s20 = int_to_ptr.vmem [resolvable:$true] %s23_s20 }
   0x2   :  { %v3159_v2 = vld [vmem:[%s4063_s1] sm:$0xff]   ;;  %v3164_v3 = vld [vmem:[%s4063_s1 + $0x8] sm:$0xff]   ;;  %p2688_p0 = scmp.ne.s32.totalorder %s4064_s2, %s2687_s28  ;;  %p2691_p1 = scmp.lt.u32.totalorder %s2687_s28, %s4064_s2 }
   0x3   :  { %v3169_v4 = vld [vmem:[%s4065_s3] sm:$0xff] }
   0x4   :  { %p2693_p2 = pnand %p2691_p1, %p2688_p0 }
   0x6   :  { %2696 = shalt.err (!%p2693_p2)  }
   0x7   :  { %s2697_s1 = scalar_lea.vmem %s24_s20, 8192  ;;  %p2702_p4 = scmp.lt.s32.totalorder %s24_s20, %s24_s20 }
   0x8   :  { %p2698_p3 = scmp.ne.s32.totalorder %s24_s20, %s2697_s1  ;;  %p2703_p5 = scmp.lt.s32.totalorder %s2697_s1, %s2697_s1 }
   0xa   :  { %p2704_p6 = por %p2703_p5, %p2702_p4 }
   0xc   :  { %p2705_p7 = pnand %p2704_p6, %p2698_p3 }
   0xe   :  { %2708 = shalt.err (!%p2705_p7)  }
   0xf   :  { %26 = dma.hbm_to_vmem [thread:$0]  %s4064_s2, 8192, %s24_s20, [#allocation3]  ;;  %v4067_v5 = vmov %v3164_v3  ;;  %v4068_v6 = vmov %v3159_v2  ;;  %v3189_v7 = vmov 0.0   ;;  %v3191_v8 = vmov 0.0  }
  0x10   :  { %s3193_s8 = smov 0  }
  0x11 LB: > { %s3044_s2 = smov 2   ;;  %s3045_s9 = smov 1   ;;  %v52_v9 = vlaneseq  ;;  %vm42_vm1 = vcmp.eq.f32.partialorder %v3159_v2, %v2889_v6  ;;  %vm43_vm2 = vcmp.eq.f32.partialorder %v3164_v3, %v2885_v5  ;;  %v3052_v17 = vmov 0.0   ;;  %s2901_s8 = sphi %s3193_s8, %s37_s8   ;;  %v2897_v8 = vphi %v3191_v8, %v4070_v8   ;;  %v2893_v7 = vphi %v3189_v7, %v4069_v7   ;;  %v2889_v6 = vphi %v4068_v6, %v163_v6   ;;  %v2885_v5 = vphi %v4067_v5, %v162_v5  }
  0x12   : > { %65 = vrot.lane.b32.xlu1 %v2889_v6, %s3044_s2  ;;  %48 = vrot.lane.b32.xlu0 %v2889_v6, %s3045_s9  ;;  %s3046_s10 = smov 3   ;;  %s3047_s11 = smov 4   ;;  %v1999_v18 = vsel %vm42_vm1, 1.0, %v3052_v17  ;;  %v2000_v19 = vsel %vm43_vm2, 1.0, %v3052_v17 }
  0x13   : > { %s3048_s12 = smov 5   ;;  %s3049_s13 = smov 6   ;;  %v3206_v10 = vand.u32 127, %v52_v9 }
  0x14   : > { %s3050_s14 = smov 7   ;;  %s3051_s15 = smov 8  }
  0x15   : > { %vm54_vm0 = vcmp.lt.s32.totalorder %v3206_v10, 1  ;;  %vm69_vm3 = vcmp.lt.s32.totalorder %v3206_v10, 2  ;;  %vm84_vm6 = vcmp.lt.s32.totalorder %v3206_v10, 3  ;;  %vm99_vm7 = vcmp.lt.s32.totalorder %v3206_v10, 4  ;;  %s37_s8 = sadd.s32 1, %s2901_s8  }
  0x16   : > { %67 = vrot.lane.b32.xlu1 %v2885_v5, %s3044_s2  ;;  %50 = vrot.lane.b32.xlu0 %v2885_v5, %s3045_s9  ;;  %vm114_vm12 = vcmp.lt.s32.totalorder %v3206_v10, 5  ;;  %vm129_vm2 = vcmp.lt.s32.totalorder %v3206_v10, 6  ;;  %p34_p8 = scmp.ge.s32.totalorder %s37_s8, 32  }
  0x17   :  { %s3303_s16 = smov (%p34_p8), 0  }
  0x1a   : > { %82 = vrot.lane.b32.xlu1 %v2885_v5, %s3046_s10  ;;  %80 = vrot.lane.b32.xlu0 %v2889_v6, %s3046_s10 }
  0x1e   : > { %97 = vrot.lane.b32.xlu1 %v2885_v5, %s3047_s11  ;;  %95 = vrot.lane.b32.xlu0 %v2889_v6, %s3047_s11 }
  0x22   : > { %112 = vrot.lane.b32.xlu1 %v2885_v5, %s3048_s12  ;;  %110 = vrot.lane.b32.xlu0 %v2889_v6, %s3048_s12 }
  0x26   : > { %127 = vrot.lane.b32.xlu1 %v2885_v5, %s3049_s13  ;;  %125 = vrot.lane.b32.xlu0 %v2889_v6, %s3049_s13 }
  0x2a   : > { %142 = vrot.lane.b32.xlu1 %v2885_v5, %s3050_s14  ;;  %140 = vrot.lane.b32.xlu0 %v2889_v6, %s3050_s14 }
  0x2e   : > { %159 = vrot.lane.b32.xlu1 %v2885_v5, %s3051_s15  ;;  %157 = vrot.lane.b32.xlu0 %v2889_v6, %s3051_s15 }
  0x84   : > { %v66_v11 = vpop.permute.xlu1 %65  ;;  %v49_v12 = vpop.permute.xlu0 %48 }
  0x88   : > { %v68_v13 = vpop.permute.xlu1 %67  ;;  %v51_v14 = vpop.permute.xlu0 %50 }
  0x89   : > { %v55_v15 = vsel %vm54_vm0, %v49_v12, %v51_v14  ;;  %v56_v16 = vsel %vm54_vm0, %v51_v14, %v49_v12  ;;  %v70_v22 = vsel %vm69_vm3, %v66_v11, %v68_v13  ;;  %v71_v23 = vsel %vm69_vm3, %v68_v13, %v66_v11 }
  0x8a   : > { %vm57_vm4 = vcmp.eq.f32.partialorder %v3159_v2, %v56_v16  ;;  %vm58_vm5 = vcmp.eq.f32.partialorder %v3164_v3, %v55_v15  ;;  %vm72_vm8 = vcmp.eq.f32.partialorder %v3159_v2, %v71_v23  ;;  %vm73_vm9 = vcmp.eq.f32.partialorder %v3164_v3, %v70_v22 }
  0x8b   : > { %v2001_v24 = vsel %vm57_vm4, 1.0, %v3052_v17  ;;  %v2002_v25 = vsel %vm58_vm5, 1.0, %v3052_v17  ;;  %v2003_v34 = vsel %vm72_vm8, 1.0, %v3052_v17  ;;  %v2004_v35 = vsel %vm73_vm9, 1.0, %v3052_v17 }
  0x8c   : > { %v83_v20 = vpop.permute.xlu1 %82  ;;  %v81_v21 = vpop.permute.xlu0 %80  ;;  %v63_v28 = vadd.f32 %v2001_v24, %v1999_v18  ;;  %v64_v29 = vadd.f32 %v2002_v25, %v2000_v19  ;;  %vm144_vm4 = vcmp.lt.s32.totalorder %v3206_v10, 7  ;;  %vm161_vm9 = vcmp.lt.s32.totalorder %v3206_v10, 8 }
  0x8d   : > { %v85_v26 = vsel %vm84_vm6, %v81_v21, %v83_v20  ;;  %v86_v27 = vsel %vm84_vm6, %v83_v20, %v81_v21 }
  0x8e   : > { %vm87_vm10 = vcmp.eq.f32.partialorder %v3159_v2, %v86_v27  ;;  %vm88_vm11 = vcmp.eq.f32.partialorder %v3164_v3, %v85_v26  ;;  %v78_v36 = vadd.f32 %v2003_v34, %v63_v28  ;;  %v79_v37 = vadd.f32 %v2004_v35, %v64_v29 }
  0x8f   : > { %v2005_v40 = vsel %vm87_vm10, 1.0, %v3052_v17  ;;  %v2006_v41 = vsel %vm88_vm11, 1.0, %v3052_v17 }
  0x90   : > { %v98_v30 = vpop.permute.xlu1 %97  ;;  %v96_v31 = vpop.permute.xlu0 %95  ;;  %v93_v46 = vadd.f32 %v2005_v40, %v78_v36  ;;  %v94_v47 = vadd.f32 %v2006_v41, %v79_v37 }
  0x91   : > { %v100_v32 = vsel %vm99_vm7, %v96_v31, %v98_v30  ;;  %v101_v33 = vsel %vm99_vm7, %v98_v30, %v96_v31 }
  0x92   : > { %vm102_vm13 = vcmp.eq.f32.partialorder %v3159_v2, %v101_v33  ;;  %vm103_vm14 = vcmp.eq.f32.partialorder %v3164_v3, %v100_v32 }
  0x93   : > { %v2007_v44 = vsel %vm102_vm13, 1.0, %v3052_v17  ;;  %v2008_v45 = vsel %vm103_vm14, 1.0, %v3052_v17 }
  0x94   : > { %v113_v38 = vpop.permute.xlu1 %112  ;;  %v111_v39 = vpop.permute.xlu0 %110  ;;  %v108_v54 = vadd.f32 %v2007_v44, %v93_v46  ;;  %v109_v55 = vadd.f32 %v2008_v45, %v94_v47 }
  0x95   : > { %v115_v42 = vsel %vm114_vm12, %v111_v39, %v113_v38  ;;  %v116_v43 = vsel %vm114_vm12, %v113_v38, %v111_v39 }
  0x96   : > { %vm117_vm15 = vcmp.eq.f32.partialorder %v3159_v2, %v116_v43  ;;  %vm118_vm1 = vcmp.eq.f32.partialorder %v3164_v3, %v115_v42 }
  0x97   : > { %v2009_v50 = vsel %vm117_vm15, 1.0, %v3052_v17  ;;  %v2010_v51 = vsel %vm118_vm1, 1.0, %v3052_v17 }
  0x98   : > { %v128_v48 = vpop.permute.xlu1 %127  ;;  %v126_v49 = vpop.permute.xlu0 %125  ;;  %v123_v58 = vadd.f32 %v2009_v50, %v108_v54  ;;  %v124_v59 = vadd.f32 %v2010_v51, %v109_v55 }
  0x99   : > { %v130_v52 = vsel %vm129_vm2, %v126_v49, %v128_v48  ;;  %v131_v53 = vsel %vm129_vm2, %v128_v48, %v126_v49 }
  0x9a   : > { %vm132_vm5 = vcmp.eq.f32.partialorder %v3159_v2, %v131_v53  ;;  %vm133_vm8 = vcmp.eq.f32.partialorder %v3164_v3, %v130_v52 }
  0x9b   : > { %v2011_v56 = vsel %vm132_vm5, 1.0, %v3052_v17  ;;  %v2012_v57 = vsel %vm133_vm8, 1.0, %v3052_v17 }
  0x9c   : > { %v143_v60 = vpop.permute.xlu1 %142  ;;  %v141_v61 = vpop.permute.xlu0 %140  ;;  %v138_v5 = vadd.f32 %v2011_v56, %v123_v58  ;;  %v139_v6 = vadd.f32 %v2012_v57, %v124_v59 }
  0x9d   : > { %v145_v62 = vsel %vm144_vm4, %v141_v61, %v143_v60  ;;  %v146_v63 = vsel %vm144_vm4, %v143_v60, %v141_v61 }
  0x9e   : > { %vm147_vm10 = vcmp.eq.f32.partialorder %v3159_v2, %v146_v63  ;;  %vm148_vm11 = vcmp.eq.f32.partialorder %v3164_v3, %v145_v62  ;;  %36 = sbr.rel (!%p34_p8) target bundleno = 17 (0x11), region = 93 }
  0x9f   : > { %v2013_v9 = vsel %vm147_vm10, 1.0, %v3052_v17  ;;  %v2014_v11 = vsel %vm148_vm11, 1.0, %v3052_v17  ;;  %v164_v17 = vrot.slane (%p34_p8), %v3159_v2, 7  }
  0xa0   : > { %v153_v12 = vadd.f32 %v2013_v9, %v138_v5  ;;  %v154_v13 = vadd.f32 %v2014_v11, %v139_v6  ;;  %v160_v14 = vpop.permute.xlu1 %159  ;;  %v158_v15 = vpop.permute.xlu0 %157 }
  0xa1   : > { %v162_v5 = vsel %vm161_vm9, %v158_v15, %v160_v14   ;;  %v163_v6 = vsel %vm161_vm9, %v160_v14, %v158_v15  }
  0xa2   : > { %v155_v16 = vadd.f32 %v2897_v8, %v153_v12   ;;  %v156_v18 = vadd.f32 %v2893_v7, %v154_v13  }
  0xa4   : > { %v4069_v7 = vmov %v156_v18  ;;  %v4070_v8 = vmov %v155_v16 }
  0xa5   :  { %v165_v8 = vrot.slane %v3164_v3, 7  }
  0xa6 LB: > { %s3053_s17 = smov 2   ;;  %s3054_s18 = smov 1   ;;  %vm176_vm13 = vcmp.eq.f32.partialorder %v3159_v2, %v2909_v17  ;;  %vm177_vm14 = vcmp.eq.f32.partialorder %v3164_v3, %v2905_v8  ;;  %v3061_v24 = vmov 0.0   ;;  %s2921_s16 = sphi %s3303_s16, %s171_s16   ;;  %v2917_v16 = vphi %v155_v16, %v4072_v16   ;;  %v2913_v18 = vphi %v156_v18, %v4071_v18   ;;  %v2909_v17 = vphi %v164_v17, %v297_v17   ;;  %v2905_v8 = vphi %v165_v8, %v296_v8  }
  0xa7   : > { %199 = vrot.lane.b32.xlu1 %v2909_v17, %s3053_s17  ;;  %182 = vrot.lane.b32.xlu0 %v2909_v17, %s3054_s18  ;;  %s3055_s19 = smov 3   ;;  %s3056_s20 = smov 4   ;;  %v2015_v25 = vsel %vm176_vm13, 1.0, %v3061_v24  ;;  %v2016_v26 = vsel %vm177_vm14, 1.0, %v3061_v24 }
  0xa8   : > { %s3057_s21 = smov 5   ;;  %s3058_s22 = smov 6  }
  0xa9   : > { %s3059_s23 = smov 7   ;;  %s3060_s24 = smov 8  }
  0xaa   : > { %s171_s16 = sadd.s32 1, %s2921_s16  }
  0xab   : > { %201 = vrot.lane.b32.xlu1 %v2905_v8, %s3053_s17  ;;  %184 = vrot.lane.b32.xlu0 %v2905_v8, %s3054_s18  ;;  %p168_p9 = scmp.ge.s32.totalorder %s171_s16, 32  }
  0xac   :  { %s3387_s25 = smov (%p168_p9), 0  }
  0xaf   : > { %216 = vrot.lane.b32.xlu1 %v2905_v8, %s3055_s19  ;;  %214 = vrot.lane.b32.xlu0 %v2909_v17, %s3055_s19 }
  0xb3   : > { %231 = vrot.lane.b32.xlu1 %v2905_v8, %s3056_s20  ;;  %229 = vrot.lane.b32.xlu0 %v2909_v17, %s3056_s20 }
  0xb7   : > { %246 = vrot.lane.b32.xlu1 %v2905_v8, %s3057_s21  ;;  %244 = vrot.lane.b32.xlu0 %v2909_v17, %s3057_s21 }
  0xbb   : > { %261 = vrot.lane.b32.xlu1 %v2905_v8, %s3058_s22  ;;  %259 = vrot.lane.b32.xlu0 %v2909_v17, %s3058_s22 }
  0xbf   : > { %276 = vrot.lane.b32.xlu1 %v2905_v8, %s3059_s23  ;;  %274 = vrot.lane.b32.xlu0 %v2909_v17, %s3059_s23 }
  0xc3   : > { %293 = vrot.lane.b32.xlu1 %v2905_v8, %s3060_s24  ;;  %291 = vrot.lane.b32.xlu0 %v2909_v17, %s3060_s24 }
 0x119   : > { %v200_v7 = vpop.permute.xlu1 %199  ;;  %v183_v19 = vpop.permute.xlu0 %182 }
 0x11d   : > { %v202_v20 = vpop.permute.xlu1 %201  ;;  %v185_v21 = vpop.permute.xlu0 %184 }
 0x11e   : > { %v189_v22 = vsel %vm54_vm0, %v183_v19, %v185_v21  ;;  %v190_v23 = vsel %vm54_vm0, %v185_v21, %v183_v19  ;;  %v204_v29 = vsel %vm69_vm3, %v200_v7, %v202_v20  ;;  %v205_v30 = vsel %vm69_vm3, %v202_v20, %v200_v7 }
 0x11f   : > { %vm191_vm15 = vcmp.eq.f32.partialorder %v3159_v2, %v190_v23  ;;  %vm192_vm1 = vcmp.eq.f32.partialorder %v3164_v3, %v189_v22  ;;  %vm206_vm5 = vcmp.eq.f32.partialorder %v3159_v2, %v205_v30  ;;  %vm207_vm8 = vcmp.eq.f32.partialorder %v3164_v3, %v204_v29 }
 0x120   : > { %v2017_v31 = vsel %vm191_vm15, 1.0, %v3061_v24  ;;  %v2018_v32 = vsel %vm192_vm1, 1.0, %v3061_v24  ;;  %v2019_v41 = vsel %vm206_vm5, 1.0, %v3061_v24  ;;  %v2020_v42 = vsel %vm207_vm8, 1.0, %v3061_v24 }
 0x121   : > { %v217_v27 = vpop.permute.xlu1 %216  ;;  %v215_v28 = vpop.permute.xlu0 %214  ;;  %v197_v35 = vadd.f32 %v2017_v31, %v2015_v25  ;;  %v198_v36 = vadd.f32 %v2018_v32, %v2016_v26 }
 0x122   : > { %v219_v33 = vsel %vm84_vm6, %v215_v28, %v217_v27  ;;  %v220_v34 = vsel %vm84_vm6, %v217_v27, %v215_v28 }
 0x123   : > { %vm221_vm10 = vcmp.eq.f32.partialorder %v3159_v2, %v220_v34  ;;  %vm222_vm11 = vcmp.eq.f32.partialorder %v3164_v3, %v219_v33  ;;  %v212_v43 = vadd.f32 %v2019_v41, %v197_v35  ;;  %v213_v44 = vadd.f32 %v2020_v42, %v198_v36 }
 0x124   : > { %v2021_v47 = vsel %vm221_vm10, 1.0, %v3061_v24  ;;  %v2022_v48 = vsel %vm222_vm11, 1.0, %v3061_v24 }
 0x125   : > { %v232_v37 = vpop.permute.xlu1 %231  ;;  %v230_v38 = vpop.permute.xlu0 %229  ;;  %v227_v53 = vadd.f32 %v2021_v47, %v212_v43  ;;  %v228_v54 = vadd.f32 %v2022_v48, %v213_v44 }
 0x126   : > { %v234_v39 = vsel %vm99_vm7, %v230_v38, %v232_v37  ;;  %v235_v40 = vsel %vm99_vm7, %v232_v37, %v230_v38 }
 0x127   : > { %vm236_vm13 = vcmp.eq.f32.partialorder %v3159_v2, %v235_v40  ;;  %vm237_vm14 = vcmp.eq.f32.partialorder %v3164_v3, %v234_v39 }
 0x128   : > { %v2023_v51 = vsel %vm236_vm13, 1.0, %v3061_v24  ;;  %v2024_v52 = vsel %vm237_vm14, 1.0, %v3061_v24 }
 0x129   : > { %v247_v45 = vpop.permute.xlu1 %246  ;;  %v245_v46 = vpop.permute.xlu0 %244  ;;  %v242_v61 = vadd.f32 %v2023_v51, %v227_v53  ;;  %v243_v62 = vadd.f32 %v2024_v52, %v228_v54 }
 0x12a   : > { %v249_v49 = vsel %vm114_vm12, %v245_v46, %v247_v45  ;;  %v250_v50 = vsel %vm114_vm12, %v247_v45, %v245_v46 }
 0x12b   : > { %vm251_vm15 = vcmp.eq.f32.partialorder %v3159_v2, %v250_v50  ;;  %vm252_vm1 = vcmp.eq.f32.partialorder %v3164_v3, %v249_v49 }
 0x12c   : > { %v2025_v57 = vsel %vm251_vm15, 1.0, %v3061_v24  ;;  %v2026_v58 = vsel %vm252_vm1, 1.0, %v3061_v24 }
 0x12d   : > { %v262_v55 = vpop.permute.xlu1 %261  ;;  %v260_v56 = vpop.permute.xlu0 %259  ;;  %v257_v6 = vadd.f32 %v2025_v57, %v242_v61  ;;  %v258_v9 = vadd.f32 %v2026_v58, %v243_v62 }
 0x12e   : > { %v264_v59 = vsel %vm129_vm2, %v260_v56, %v262_v55  ;;  %v265_v60 = vsel %vm129_vm2, %v262_v55, %v260_v56 }
 0x12f   : > { %vm266_vm5 = vcmp.eq.f32.partialorder %v3159_v2, %v265_v60  ;;  %vm267_vm8 = vcmp.eq.f32.partialorder %v3164_v3, %v264_v59 }
 0x130   : > { %v2027_v63 = vsel %vm266_vm5, 1.0, %v3061_v24  ;;  %v2028_v5 = vsel %vm267_vm8, 1.0, %v3061_v24 }
 0x131   : > { %v277_v11 = vpop.permute.xlu1 %276  ;;  %v275_v12 = vpop.permute.xlu0 %274  ;;  %v272_v15 = vadd.f32 %v2027_v63, %v257_v6  ;;  %v273_v17 = vadd.f32 %v2028_v5, %v258_v9 }
 0x132   : > { %v279_v13 = vsel %vm144_vm4, %v275_v12, %v277_v11  ;;  %v280_v14 = vsel %vm144_vm4, %v277_v11, %v275_v12 }
 0x133   : > { %vm281_vm10 = vcmp.eq.f32.partialorder %v3159_v2, %v280_v14  ;;  %vm282_vm11 = vcmp.eq.f32.partialorder %v3164_v3, %v279_v13  ;;  %170 = sbr.rel (!%p168_p9) target bundleno = 166 (0xa6), region = 104 }
 0x134   : > { %v2029_v8 = vsel %vm281_vm10, 1.0, %v3061_v24  ;;  %v2030_v7 = vsel %vm282_vm11, 1.0, %v3061_v24  ;;  %v298_v24 = vrot.slane (%p168_p9), %v3159_v2, 6  }
 0x135   : > { %v287_v19 = vadd.f32 %v2029_v8, %v272_v15  ;;  %v288_v20 = vadd.f32 %v2030_v7, %v273_v17  ;;  %v294_v21 = vpop.permute.xlu1 %293  ;;  %v292_v22 = vpop.permute.xlu0 %291 }
 0x136   : > { %v296_v8 = vsel %vm161_vm9, %v292_v22, %v294_v21   ;;  %v297_v17 = vsel %vm161_vm9, %v294_v21, %v292_v22  }
 0x137   : > { %v289_v23 = vadd.f32 %v2917_v16, %v287_v19   ;;  %v290_v25 = vadd.f32 %v2913_v18, %v288_v20  }
 0x139   : > { %v4071_v18 = vmov %v290_v25  ;;  %v4072_v16 = vmov %v289_v23 }
 0x13a   :  { %v299_v16 = vrot.slane %v3164_v3, 6  }
 0x13b LB: > { %s3062_s26 = smov 2   ;;  %s3063_s0 = smov 1   ;;  %vm310_vm13 = vcmp.eq.f32.partialorder %v3159_v2, %v2929_v24  ;;  %vm311_vm14 = vcmp.eq.f32.partialorder %v3164_v3, %v2925_v16  ;;  %v3070_v31 = vmov 0.0   ;;  %s2941_s25 = sphi %s3387_s25, %s305_s25   ;;  %v2937_v23 = vphi %v289_v23, %v4074_v23   ;;  %v2933_v25 = vphi %v290_v25, %v4073_v25   ;;  %v2929_v24 = vphi %v298_v24, %v431_v24   ;;  %v2925_v16 = vphi %v299_v16, %v430_v16  }
 0x13c   : > { %333 = vrot.lane.b32.xlu1 %v2929_v24, %s3062_s26  ;;  %316 = vrot.lane.b32.xlu0 %v2929_v24, %s3063_s0  ;;  %s3064_s27 = smov 3   ;;  %s3065_s28 = smov 4   ;;  %v2031_v32 = vsel %vm310_vm13, 1.0, %v3070_v31  ;;  %v2032_v33 = vsel %vm311_vm14, 1.0, %v3070_v31 }
 0x13d   : > { %s3066_s29 = smov 5   ;;  %s3067_s30 = smov 6  }
 0x13e   : > { %s3068_s5 = smov 7   ;;  %s3069_s6 = smov 8  }
 0x13f   : > { %s305_s25 = sadd.s32 1, %s2941_s25  }
 0x140   : > { %335 = vrot.lane.b32.xlu1 %v2925_v16, %s3062_s26  ;;  %318 = vrot.lane.b32.xlu0 %v2925_v16, %s3063_s0  ;;  %p302_p10 = scmp.ge.s32.totalorder %s305_s25, 32  }
 0x141   :  { %s3471_s1 = smov (%p302_p10), 0  }
 0x144   : > { %350 = vrot.lane.b32.xlu1 %v2925_v16, %s3064_s27  ;;  %348 = vrot.lane.b32.xlu0 %v2929_v24, %s3064_s27 }
 0x148   : > { %365 = vrot.lane.b32.xlu1 %v2925_v16, %s3065_s28  ;;  %363 = vrot.lane.b32.xlu0 %v2929_v24, %s3065_s28 }
 0x14c   : > { %380 = vrot.lane.b32.xlu1 %v2925_v16, %s3066_s29  ;;  %378 = vrot.lane.b32.xlu0 %v2929_v24, %s3066_s29 }
 0x150   : > { %395 = vrot.lane.b32.xlu1 %v2925_v16, %s3067_s30  ;;  %393 = vrot.lane.b32.xlu0 %v2929_v24, %s3067_s30 }
 0x154   : > { %410 = vrot.lane.b32.xlu1 %v2925_v16, %s3068_s5  ;;  %408 = vrot.lane.b32.xlu0 %v2929_v24, %s3068_s5 }
 0x158   : > { %427 = vrot.lane.b32.xlu1 %v2925_v16, %s3069_s6  ;;  %425 = vrot.lane.b32.xlu0 %v2929_v24, %s3069_s6 }
 0x1ae   : > { %v334_v18 = vpop.permute.xlu1 %333  ;;  %v317_v26 = vpop.permute.xlu0 %316 }
 0x1b2   : > { %v336_v27 = vpop.permute.xlu1 %335  ;;  %v319_v28 = vpop.permute.xlu0 %318 }
 0x1b3   : > { %v323_v29 = vsel %vm54_vm0, %v317_v26, %v319_v28  ;;  %v324_v30 = vsel %vm54_vm0, %v319_v28, %v317_v26  ;;  %v338_v36 = vsel %vm69_vm3, %v334_v18, %v336_v27  ;;  %v339_v37 = vsel %vm69_vm3, %v336_v27, %v334_v18 }
 0x1b4   : > { %vm325_vm15 = vcmp.eq.f32.partialorder %v3159_v2, %v324_v30  ;;  %vm326_vm1 = vcmp.eq.f32.partialorder %v3164_v3, %v323_v29  ;;  %vm340_vm5 = vcmp.eq.f32.partialorder %v3159_v2, %v339_v37  ;;  %vm341_vm8 = vcmp.eq.f32.partialorder %v3164_v3, %v338_v36 }
 0x1b5   : > { %v2033_v38 = vsel %vm325_vm15, 1.0, %v3070_v31  ;;  %v2034_v39 = vsel %vm326_vm1, 1.0, %v3070_v31  ;;  %v2035_v48 = vsel %vm340_vm5, 1.0, %v3070_v31  ;;  %v2036_v49 = vsel %vm341_vm8, 1.0, %v3070_v31 }
 0x1b6   : > { %v351_v34 = vpop.permute.xlu1 %350  ;;  %v349_v35 = vpop.permute.xlu0 %348  ;;  %v331_v42 = vadd.f32 %v2033_v38, %v2031_v32  ;;  %v332_v43 = vadd.f32 %v2034_v39, %v2032_v33 }
 0x1b7   : > { %v353_v40 = vsel %vm84_vm6, %v349_v35, %v351_v34  ;;  %v354_v41 = vsel %vm84_vm6, %v351_v34, %v349_v35 }
 0x1b8   : > { %vm355_vm10 = vcmp.eq.f32.partialorder %v3159_v2, %v354_v41  ;;  %vm356_vm11 = vcmp.eq.f32.partialorder %v3164_v3, %v353_v40  ;;  %v346_v50 = vadd.f32 %v2035_v48, %v331_v42  ;;  %v347_v51 = vadd.f32 %v2036_v49, %v332_v43 }
 0x1b9   : > { %v2037_v54 = vsel %vm355_vm10, 1.0, %v3070_v31  ;;  %v2038_v55 = vsel %vm356_vm11, 1.0, %v3070_v31 }
 0x1ba   : > { %v366_v44 = vpop.permute.xlu1 %365  ;;  %v364_v45 = vpop.permute.xlu0 %363  ;;  %v361_v60 = vadd.f32 %v2037_v54, %v346_v50  ;;  %v362_v61 = vadd.f32 %v2038_v55, %v347_v51 }
 0x1bb   : > { %v368_v46 = vsel %vm99_vm7, %v364_v45, %v366_v44  ;;  %v369_v47 = vsel %vm99_vm7, %v366_v44, %v364_v45 }
 0x1bc   : > { %vm370_vm13 = vcmp.eq.f32.partialorder %v3159_v2, %v369_v47  ;;  %vm371_vm14 = vcmp.eq.f32.partialorder %v3164_v3, %v368_v46 }
 0x1bd   : > { %v2039_v58 = vsel %vm370_vm13, 1.0, %v3070_v31  ;;  %v2040_v59 = vsel %vm371_vm14, 1.0, %v3070_v31 }
 0x1be   : > { %v381_v52 = vpop.permute.xlu1 %380  ;;  %v379_v53 = vpop.permute.xlu0 %378  ;;  %v376_v12 = vadd.f32 %v2039_v58, %v361_v60  ;;  %v377_v13 = vadd.f32 %v2040_v59, %v362_v61 }
 0x1bf   : > { %v383_v56 = vsel %vm114_vm12, %v379_v53, %v381_v52  ;;  %v384_v57 = vsel %vm114_vm12, %v381_v52, %v379_v53 }
 0x1c0   : > { %vm385_vm15 = vcmp.eq.f32.partialorder %v3159_v2, %v384_v57  ;;  %vm386_vm1 = vcmp.eq.f32.partialorder %v3164_v3, %v383_v56 }
 0x1c1   : > { %v2041_v5 = vsel %vm385_vm15, 1.0, %v3070_v31  ;;  %v2042_v6 = vsel %vm386_vm1, 1.0, %v3070_v31 }
 0x1c2   : > { %v396_v62 = vpop.permute.xlu1 %395  ;;  %v394_v63 = vpop.permute.xlu0 %393  ;;  %v391_v17 = vadd.f32 %v2041_v5, %v376_v12  ;;  %v392_v8 = vadd.f32 %v2042_v6, %v377_v13 }
 0x1c3   : > { %v398_v9 = vsel %vm129_vm2, %v394_v63, %v396_v62  ;;  %v399_v11 = vsel %vm129_vm2, %v396_v62, %v394_v63 }
 0x1c4   : > { %vm400_vm5 = vcmp.eq.f32.partialorder %v3159_v2, %v399_v11  ;;  %vm401_vm8 = vcmp.eq.f32.partialorder %v3164_v3, %v398_v9 }
 0x1c5   : > { %v2043_v14 = vsel %vm400_vm5, 1.0, %v3070_v31  ;;  %v2044_v15 = vsel %vm401_vm8, 1.0, %v3070_v31 }
 0x1c6   : > { %v411_v7 = vpop.permute.xlu1 %410  ;;  %v409_v19 = vpop.permute.xlu0 %408  ;;  %v406_v22 = vadd.f32 %v2043_v14, %v391_v17  ;;  %v407_v24 = vadd.f32 %v2044_v15, %v392_v8 }
 0x1c7   : > { %v413_v20 = vsel %vm144_vm4, %v409_v19, %v411_v7  ;;  %v414_v21 = vsel %vm144_vm4, %v411_v7, %v409_v19 }
 0x1c8   : > { %vm415_vm10 = vcmp.eq.f32.partialorder %v3159_v2, %v414_v21  ;;  %vm416_vm11 = vcmp.eq.f32.partialorder %v3164_v3, %v413_v20  ;;  %304 = sbr.rel (!%p302_p10) target bundleno = 315 (0x13b), region = 115 }
 0x1c9   : > { %v2045_v16 = vsel %vm415_vm10, 1.0, %v3070_v31  ;;  %v2046_v18 = vsel %vm416_vm11, 1.0, %v3070_v31  ;;  %v432_v31 = vrot.slane (%p302_p10), %v3159_v2, 5  }
 0x1ca   : > { %v421_v26 = vadd.f32 %v2045_v16, %v406_v22  ;;  %v422_v27 = vadd.f32 %v2046_v18, %v407_v24  ;;  %v428_v28 = vpop.permute.xlu1 %427  ;;  %v426_v29 = vpop.permute.xlu0 %425 }
 0x1cb   : > { %v430_v16 = vsel %vm161_vm9, %v426_v29, %v428_v28   ;;  %v431_v24 = vsel %vm161_vm9, %v428_v28, %v426_v29  }
 0x1cc   : > { %v423_v30 = vadd.f32 %v2937_v23, %v421_v26   ;;  %v424_v32 = vadd.f32 %v2933_v25, %v422_v27  }
 0x1ce   : > { %v4073_v25 = vmov %v424_v32  ;;  %v4074_v23 = vmov %v423_v30 }
 0x1cf   :  { %v433_v23 = vrot.slane %v3164_v3, 5  }
 0x1d0 LB: > { %s3071_s3 = smov 2   ;;  %s3072_s7 = smov 1   ;;  %vm444_vm13 = vcmp.eq.f32.partialorder %v3159_v2, %v2949_v31  ;;  %vm445_vm14 = vcmp.eq.f32.partialorder %v3164_v3, %v2945_v23  ;;  %v3079_v38 = vmov 0.0   ;;  %s2961_s1 = sphi %s3471_s1, %s439_s1   ;;  %v2957_v30 = vphi %v423_v30, %v4076_v30   ;;  %v2953_v32 = vphi %v424_v32, %v4075_v32   ;;  %v2949_v31 = vphi %v432_v31, %v565_v31   ;;  %v2945_v23 = vphi %v433_v23, %v564_v23  }
 0x1d1   : > { %467 = vrot.lane.b32.xlu1 %v2949_v31, %s3071_s3  ;;  %450 = vrot.lane.b32.xlu0 %v2949_v31, %s3072_s7  ;;  %s3073_s8 = smov 3   ;;  %s3074_s2 = smov 4   ;;  %v2047_v39 = vsel %vm444_vm13, 1.0, %v3079_v38  ;;  %v2048_v40 = vsel %vm445_vm14, 1.0, %v3079_v38 }
 0x1d2   : > { %s3075_s9 = smov 5   ;;  %s3076_s10 = smov 6  }
 0x1d3   : > { %s3077_s11 = smov 7   ;;  %s3078_s12 = smov 8  }
 0x1d4   : > { %s439_s1 = sadd.s32 1, %s2961_s1  }
 0x1d5   : > { %469 = vrot.lane.b32.xlu1 %v2945_v23, %s3071_s3  ;;  %452 = vrot.lane.b32.xlu0 %v2945_v23, %s3072_s7  ;;  %p436_p11 = scmp.ge.s32.totalorder %s439_s1, 32  }
 0x1d6   :  { %s3555_s13 = smov (%p436_p11), 0  }
 0x1d9   : > { %484 = vrot.lane.b32.xlu1 %v2945_v23, %s3073_s8  ;;  %482 = vrot.lane.b32.xlu0 %v2949_v31, %s3073_s8 }
 0x1dd   : > { %499 = vrot.lane.b32.xlu1 %v2945_v23, %s3074_s2  ;;  %497 = vrot.lane.b32.xlu0 %v2949_v31, %s3074_s2 }
 0x1e1   : > { %514 = vrot.lane.b32.xlu1 %v2945_v23, %s3075_s9  ;;  %512 = vrot.lane.b32.xlu0 %v2949_v31, %s3075_s9 }
 0x1e5   : > { %529 = vrot.lane.b32.xlu1 %v2945_v23, %s3076_s10  ;;  %527 = vrot.lane.b32.xlu0 %v2949_v31, %s3076_s10 }
 0x1e9   : > { %544 = vrot.lane.b32.xlu1 %v2945_v23, %s3077_s11  ;;  %542 = vrot.lane.b32.xlu0 %v2949_v31, %s3077_s11 }
 0x1ed   : > { %561 = vrot.lane.b32.xlu1 %v2945_v23, %s3078_s12  ;;  %559 = vrot.lane.b32.xlu0 %v2949_v31, %s3078_s12 }
 0x243   : > { %v468_v25 = vpop.permute.xlu1 %467  ;;  %v451_v33 = vpop.permute.xlu0 %450 }
 0x247   : > { %v470_v34 = vpop.permute.xlu1 %469  ;;  %v453_v35 = vpop.permute.xlu0 %452 }
 0x248   : > { %v457_v36 = vsel %vm54_vm0, %v451_v33, %v453_v35  ;;  %v458_v37 = vsel %vm54_vm0, %v453_v35, %v451_v33  ;;  %v472_v43 = vsel %vm69_vm3, %v468_v25, %v470_v34  ;;  %v473_v44 = vsel %vm69_vm3, %v470_v34, %v468_v25 }
 0x249   : > { %vm459_vm15 = vcmp.eq.f32.partialorder %v3159_v2, %v458_v37  ;;  %vm460_vm1 = vcmp.eq.f32.partialorder %v3164_v3, %v457_v36  ;;  %vm474_vm5 = vcmp.eq.f32.partialorder %v3159_v2, %v473_v44  ;;  %vm475_vm8 = vcmp.eq.f32.partialorder %v3164_v3, %v472_v43 }
 0x24a   : > { %v2049_v45 = vsel %vm459_vm15, 1.0, %v3079_v38  ;;  %v2050_v46 = vsel %vm460_vm1, 1.0, %v3079_v38  ;;  %v2051_v55 = vsel %vm474_vm5, 1.0, %v3079_v38  ;;  %v2052_v56 = vsel %vm475_vm8, 1.0, %v3079_v38 }
 0x24b   : > { %v485_v41 = vpop.permute.xlu1 %484  ;;  %v483_v42 = vpop.permute.xlu0 %482  ;;  %v465_v49 = vadd.f32 %v2049_v45, %v2047_v39  ;;  %v466_v50 = vadd.f32 %v2050_v46, %v2048_v40 }
 0x24c   : > { %v487_v47 = vsel %vm84_vm6, %v483_v42, %v485_v41  ;;  %v488_v48 = vsel %vm84_vm6, %v485_v41, %v483_v42 }
 0x24d   : > { %vm489_vm10 = vcmp.eq.f32.partialorder %v3159_v2, %v488_v48  ;;  %vm490_vm11 = vcmp.eq.f32.partialorder %v3164_v3, %v487_v47  ;;  %v480_v57 = vadd.f32 %v2051_v55, %v465_v49  ;;  %v481_v58 = vadd.f32 %v2052_v56, %v466_v50 }
 0x24e   : > { %v2053_v61 = vsel %vm489_vm10, 1.0, %v3079_v38  ;;  %v2054_v62 = vsel %vm490_vm11, 1.0, %v3079_v38 }
 0x24f   : > { %v500_v51 = vpop.permute.xlu1 %499  ;;  %v498_v52 = vpop.permute.xlu0 %497  ;;  %v495_v11 = vadd.f32 %v2053_v61, %v480_v57  ;;  %v496_v12 = vadd.f32 %v2054_v62, %v481_v58 }
 0x250   : > { %v502_v53 = vsel %vm99_vm7, %v498_v52, %v500_v51  ;;  %v503_v54 = vsel %vm99_vm7, %v500_v51, %v498_v52 }
 0x251   : > { %vm504_vm13 = vcmp.eq.f32.partialorder %v3159_v2, %v503_v54  ;;  %vm505_vm14 = vcmp.eq.f32.partialorder %v3164_v3, %v502_v53 }
 0x252   : > { %v2055_v6 = vsel %vm504_vm13, 1.0, %v3079_v38  ;;  %v2056_v9 = vsel %vm505_vm14, 1.0, %v3079_v38 }
 0x253   : > { %v515_v59 = vpop.permute.xlu1 %514  ;;  %v513_v60 = vpop.permute.xlu0 %512  ;;  %v510_v19 = vadd.f32 %v2055_v6, %v495_v11  ;;  %v511_v20 = vadd.f32 %v2056_v9, %v496_v12 }
 0x254   : > { %v517_v63 = vsel %vm114_vm12, %v513_v60, %v515_v59  ;;  %v518_v5 = vsel %vm114_vm12, %v515_v59, %v513_v60 }
 0x255   : > { %vm519_vm15 = vcmp.eq.f32.partialorder %v3159_v2, %v518_v5  ;;  %vm520_vm1 = vcmp.eq.f32.partialorder %v3164_v3, %v517_v63 }
 0x256   : > { %v2057_v15 = vsel %vm519_vm15, 1.0, %v3079_v38  ;;  %v2058_v17 = vsel %vm520_vm1, 1.0, %v3079_v38 }
 0x257   : > { %v530_v13 = vpop.permute.xlu1 %529  ;;  %v528_v14 = vpop.permute.xlu0 %527  ;;  %v525_v24 = vadd.f32 %v2057_v15, %v510_v19  ;;  %v526_v16 = vadd.f32 %v2058_v17, %v511_v20 }
 0x258   : > { %v532_v8 = vsel %vm129_vm2, %v528_v14, %v530_v13  ;;  %v533_v7 = vsel %vm129_vm2, %v530_v13, %v528_v14 }
 0x259   : > { %vm534_vm5 = vcmp.eq.f32.partialorder %v3159_v2, %v533_v7  ;;  %vm535_vm8 = vcmp.eq.f32.partialorder %v3164_v3, %v532_v8 }
 0x25a   : > { %v2059_v21 = vsel %vm534_vm5, 1.0, %v3079_v38  ;;  %v2060_v22 = vsel %vm535_vm8, 1.0, %v3079_v38 }
 0x25b   : > { %v545_v18 = vpop.permute.xlu1 %544  ;;  %v543_v26 = vpop.permute.xlu0 %542  ;;  %v540_v29 = vadd.f32 %v2059_v21, %v525_v24  ;;  %v541_v31 = vadd.f32 %v2060_v22, %v526_v16 }
 0x25c   : > { %v547_v27 = vsel %vm144_vm4, %v543_v26, %v545_v18  ;;  %v548_v28 = vsel %vm144_vm4, %v545_v18, %v543_v26 }
 0x25d   : > { %vm549_vm10 = vcmp.eq.f32.partialorder %v3159_v2, %v548_v28  ;;  %vm550_vm11 = vcmp.eq.f32.partialorder %v3164_v3, %v547_v27  ;;  %438 = sbr.rel (!%p436_p11) target bundleno = 464 (0x1d0), region = 126 }
 0x25e   : > { %v2061_v23 = vsel %vm549_vm10, 1.0, %v3079_v38  ;;  %v2062_v25 = vsel %vm550_vm11, 1.0, %v3079_v38  ;;  %v566_v38 = vrot.slane (%p436_p11), %v3159_v2, 4  }
 0x25f   : > { %v555_v33 = vadd.f32 %v2061_v23, %v540_v29  ;;  %v556_v34 = vadd.f32 %v2062_v25, %v541_v31  ;;  %v562_v35 = vpop.permute.xlu1 %561  ;;  %v560_v36 = vpop.permute.xlu0 %559 }
 0x260   : > { %v564_v23 = vsel %vm161_vm9, %v560_v36, %v562_v35   ;;  %v565_v31 = vsel %vm161_vm9, %v562_v35, %v560_v36  }
 0x261   : > { %v557_v37 = vadd.f32 %v2957_v30, %v555_v33   ;;  %v558_v39 = vadd.f32 %v2953_v32, %v556_v34  }
 0x263   : > { %v4075_v32 = vmov %v558_v39  ;;  %v4076_v30 = vmov %v557_v37 }
 0x264   :  { %v567_v30 = vrot.slane %v3164_v3, 4  }
 0x265 LB: > { %s3080_s14 = smov 2   ;;  %s3081_s15 = smov 1   ;;  %vm578_vm13 = vcmp.eq.f32.partialorder %v3159_v2, %v2969_v38  ;;  %vm579_vm14 = vcmp.eq.f32.partialorder %v3164_v3, %v2965_v30  ;;  %v3088_v45 = vmov 0.0   ;;  %s2981_s13 = sphi %s3555_s13, %s573_s13   ;;  %v2977_v37 = vphi %v557_v37, %v4078_v37   ;;  %v2973_v39 = vphi %v558_v39, %v4077_v39   ;;  %v2969_v38 = vphi %v566_v38, %v699_v38   ;;  %v2965_v30 = vphi %v567_v30, %v698_v30  }
 0x266   : > { %601 = vrot.lane.b32.xlu1 %v2969_v38, %s3080_s14  ;;  %584 = vrot.lane.b32.xlu0 %v2969_v38, %s3081_s15  ;;  %s3082_s16 = smov 3   ;;  %s3083_s17 = smov 4   ;;  %v2063_v46 = vsel %vm578_vm13, 1.0, %v3088_v45  ;;  %v2064_v47 = vsel %vm579_vm14, 1.0, %v3088_v45 }
 0x267   : > { %s3084_s18 = smov 5   ;;  %s3085_s19 = smov 6  }
 0x268   : > { %s3086_s20 = smov 7   ;;  %s3087_s21 = smov 8  }
 0x269   : > { %s573_s13 = sadd.s32 1, %s2981_s13  }
 0x26a   : > { %603 = vrot.lane.b32.xlu1 %v2965_v30, %s3080_s14  ;;  %586 = vrot.lane.b32.xlu0 %v2965_v30, %s3081_s15  ;;  %p570_p12 = scmp.ge.s32.totalorder %s573_s13, 32  }
 0x26b   :  { %s3639_s22 = smov (%p570_p12), 0  }
 0x26e   : > { %618 = vrot.lane.b32.xlu1 %v2965_v30, %s3082_s16  ;;  %616 = vrot.lane.b32.xlu0 %v2969_v38, %s3082_s16 }
 0x272   : > { %633 = vrot.lane.b32.xlu1 %v2965_v30, %s3083_s17  ;;  %631 = vrot.lane.b32.xlu0 %v2969_v38, %s3083_s17 }
 0x276   : > { %648 = vrot.lane.b32.xlu1 %v2965_v30, %s3084_s18  ;;  %646 = vrot.lane.b32.xlu0 %v2969_v38, %s3084_s18 }
 0x27a   : > { %663 = vrot.lane.b32.xlu1 %v2965_v30, %s3085_s19  ;;  %661 = vrot.lane.b32.xlu0 %v2969_v38, %s3085_s19 }
 0x27e   : > { %678 = vrot.lane.b32.xlu1 %v2965_v30, %s3086_s20  ;;  %676 = vrot.lane.b32.xlu0 %v2969_v38, %s3086_s20 }
 0x282   : > { %695 = vrot.lane.b32.xlu1 %v2965_v30, %s3087_s21  ;;  %693 = vrot.lane.b32.xlu0 %v2969_v38, %s3087_s21 }
 0x2d8   : > { %v602_v32 = vpop.permute.xlu1 %601  ;;  %v585_v40 = vpop.permute.xlu0 %584 }
 0x2dc   : > { %v604_v41 = vpop.permute.xlu1 %603  ;;  %v587_v42 = vpop.permute.xlu0 %586 }
 0x2dd   : > { %v591_v43 = vsel %vm54_vm0, %v585_v40, %v587_v42  ;;  %v592_v44 = vsel %vm54_vm0, %v587_v42, %v585_v40  ;;  %v606_v50 = vsel %vm69_vm3, %v602_v32, %v604_v41  ;;  %v607_v51 = vsel %vm69_vm3, %v604_v41, %v602_v32 }
 0x2de   : > { %vm593_vm15 = vcmp.eq.f32.partialorder %v3159_v2, %v592_v44  ;;  %vm594_vm1 = vcmp.eq.f32.partialorder %v3164_v3, %v591_v43  ;;  %vm608_vm5 = vcmp.eq.f32.partialorder %v3159_v2, %v607_v51  ;;  %vm609_vm8 = vcmp.eq.f32.partialorder %v3164_v3, %v606_v50 }
 0x2df   : > { %v2065_v52 = vsel %vm593_vm15, 1.0, %v3088_v45  ;;  %v2066_v53 = vsel %vm594_vm1, 1.0, %v3088_v45  ;;  %v2067_v62 = vsel %vm608_vm5, 1.0, %v3088_v45  ;;  %v2068_v63 = vsel %vm609_vm8, 1.0, %v3088_v45 }
 0x2e0   : > { %v619_v48 = vpop.permute.xlu1 %618  ;;  %v617_v49 = vpop.permute.xlu0 %616  ;;  %v599_v56 = vadd.f32 %v2065_v52, %v2063_v46  ;;  %v600_v57 = vadd.f32 %v2066_v53, %v2064_v47 }
 0x2e1   : > { %v621_v54 = vsel %vm84_vm6, %v617_v49, %v619_v48  ;;  %v622_v55 = vsel %vm84_vm6, %v619_v48, %v617_v49 }
 0x2e2   : > { %vm623_vm10 = vcmp.eq.f32.partialorder %v3159_v2, %v622_v55  ;;  %vm624_vm11 = vcmp.eq.f32.partialorder %v3164_v3, %v621_v54  ;;  %v614_v5 = vadd.f32 %v2067_v62, %v599_v56  ;;  %v615_v6 = vadd.f32 %v2068_v63, %v600_v57 }
 0x2e3   : > { %v2069_v12 = vsel %vm623_vm10, 1.0, %v3088_v45  ;;  %v2070_v13 = vsel %vm624_vm11, 1.0, %v3088_v45 }
 0x2e4   : > { %v634_v58 = vpop.permute.xlu1 %633  ;;  %v632_v59 = vpop.permute.xlu0 %631  ;;  %v629_v7 = vadd.f32 %v2069_v12, %v614_v5  ;;  %v630_v19 = vadd.f32 %v2070_v13, %v615_v6 }
 0x2e5   : > { %v636_v60 = vsel %vm99_vm7, %v632_v59, %v634_v58  ;;  %v637_v61 = vsel %vm99_vm7, %v634_v58, %v632_v59 }
 0x2e6   : > { %vm638_vm13 = vcmp.eq.f32.partialorder %v3159_v2, %v637_v61  ;;  %vm639_vm14 = vcmp.eq.f32.partialorder %v3164_v3, %v636_v60 }
 0x2e7   : > { %v2071_v17 = vsel %vm638_vm13, 1.0, %v3088_v45  ;;  %v2072_v8 = vsel %vm639_vm14, 1.0, %v3088_v45 }
 0x2e8   : > { %v649_v9 = vpop.permute.xlu1 %648  ;;  %v647_v11 = vpop.permute.xlu0 %646  ;;  %v644_v26 = vadd.f32 %v2071_v17, %v629_v7  ;;  %v645_v27 = vadd.f32 %v2072_v8, %v630_v19 }
 0x2e9   : > { %v651_v14 = vsel %vm114_vm12, %v647_v11, %v649_v9  ;;  %v652_v15 = vsel %vm114_vm12, %v649_v9, %v647_v11 }
 0x2ea   : > { %vm653_vm15 = vcmp.eq.f32.partialorder %v3159_v2, %v652_v15  ;;  %vm654_vm1 = vcmp.eq.f32.partialorder %v3164_v3, %v651_v14 }
 0x2eb   : > { %v2073_v22 = vsel %vm653_vm15, 1.0, %v3088_v45  ;;  %v2074_v24 = vsel %vm654_vm1, 1.0, %v3088_v45 }
 0x2ec   : > { %v664_v20 = vpop.permute.xlu1 %663  ;;  %v662_v21 = vpop.permute.xlu0 %661  ;;  %v659_v31 = vadd.f32 %v2073_v22, %v644_v26  ;;  %v660_v23 = vadd.f32 %v2074_v24, %v645_v27 }
 0x2ed   : > { %v666_v16 = vsel %vm129_vm2, %v662_v21, %v664_v20  ;;  %v667_v18 = vsel %vm129_vm2, %v664_v20, %v662_v21 }
 0x2ee   : > { %vm668_vm5 = vcmp.eq.f32.partialorder %v3159_v2, %v667_v18  ;;  %vm669_vm8 = vcmp.eq.f32.partialorder %v3164_v3, %v666_v16 }
 0x2ef   : > { %v2075_v28 = vsel %vm668_vm5, 1.0, %v3088_v45  ;;  %v2076_v29 = vsel %vm669_vm8, 1.0, %v3088_v45 }
 0x2f0   : > { %v679_v25 = vpop.permute.xlu1 %678  ;;  %v677_v33 = vpop.permute.xlu0 %676  ;;  %v674_v36 = vadd.f32 %v2075_v28, %v659_v31  ;;  %v675_v38 = vadd.f32 %v2076_v29, %v660_v23 }
 0x2f1   : > { %v681_v34 = vsel %vm144_vm4, %v677_v33, %v679_v25  ;;  %v682_v35 = vsel %vm144_vm4, %v679_v25, %v677_v33 }
 0x2f2   : > { %vm683_vm10 = vcmp.eq.f32.partialorder %v3159_v2, %v682_v35  ;;  %vm684_vm11 = vcmp.eq.f32.partialorder %v3164_v3, %v681_v34  ;;  %572 = sbr.rel (!%p570_p12) target bundleno = 613 (0x265), region = 137 }
 0x2f3   : > { %v2077_v30 = vsel %vm683_vm10, 1.0, %v3088_v45  ;;  %v2078_v32 = vsel %vm684_vm11, 1.0, %v3088_v45  ;;  %v700_v45 = vrot.slane (%p570_p12), %v3159_v2, 3  }
 0x2f4   : > { %v689_v40 = vadd.f32 %v2077_v30, %v674_v36  ;;  %v690_v41 = vadd.f32 %v2078_v32, %v675_v38  ;;  %v696_v42 = vpop.permute.xlu1 %695  ;;  %v694_v43 = vpop.permute.xlu0 %693 }
 0x2f5   : > { %v698_v30 = vsel %vm161_vm9, %v694_v43, %v696_v42   ;;  %v699_v38 = vsel %vm161_vm9, %v696_v42, %v694_v43  }
 0x2f6   : > { %v691_v44 = vadd.f32 %v2977_v37, %v689_v40   ;;  %v692_v46 = vadd.f32 %v2973_v39, %v690_v41  }
 0x2f8   : > { %v4077_v39 = vmov %v692_v46  ;;  %v4078_v37 = vmov %v691_v44 }
 0x2f9   :  { %v701_v37 = vrot.slane %v3164_v3, 3  }
 0x2fa LB: > { %s3089_s23 = smov 2   ;;  %s3090_s24 = smov 1   ;;  %vm712_vm13 = vcmp.eq.f32.partialorder %v3159_v2, %v2989_v45  ;;  %vm713_vm14 = vcmp.eq.f32.partialorder %v3164_v3, %v2985_v37  ;;  %v3097_v52 = vmov 0.0   ;;  %s3001_s22 = sphi %s3639_s22, %s707_s22   ;;  %v2997_v44 = vphi %v691_v44, %v4080_v44   ;;  %v2993_v46 = vphi %v692_v46, %v4079_v46   ;;  %v2989_v45 = vphi %v700_v45, %v833_v45   ;;  %v2985_v37 = vphi %v701_v37, %v832_v37  }
 0x2fb   : > { %735 = vrot.lane.b32.xlu1 %v2989_v45, %s3089_s23  ;;  %718 = vrot.lane.b32.xlu0 %v2989_v45, %s3090_s24  ;;  %s3091_s25 = smov 3   ;;  %s3092_s26 = smov 4   ;;  %v2079_v53 = vsel %vm712_vm13, 1.0, %v3097_v52  ;;  %v2080_v54 = vsel %vm713_vm14, 1.0, %v3097_v52 }
 0x2fc   : > { %s3093_s0 = smov 5   ;;  %s3094_s27 = smov 6  }
 0x2fd   : > { %s3095_s28 = smov 7   ;;  %s3096_s29 = smov 8  }
 0x2fe   : > { %s707_s22 = sadd.s32 1, %s3001_s22  }
 0x2ff   : > { %737 = vrot.lane.b32.xlu1 %v2985_v37, %s3089_s23  ;;  %720 = vrot.lane.b32.xlu0 %v2985_v37, %s3090_s24  ;;  %p704_p13 = scmp.ge.s32.totalorder %s707_s22, 32  }
 0x300   :  { %s3723_s30 = smov (%p704_p13), 0  }
 0x303   : > { %752 = vrot.lane.b32.xlu1 %v2985_v37, %s3091_s25  ;;  %750 = vrot.lane.b32.xlu0 %v2989_v45, %s3091_s25 }
 0x307   : > { %767 = vrot.lane.b32.xlu1 %v2985_v37, %s3092_s26  ;;  %765 = vrot.lane.b32.xlu0 %v2989_v45, %s3092_s26 }
 0x30b   : > { %782 = vrot.lane.b32.xlu1 %v2985_v37, %s3093_s0  ;;  %780 = vrot.lane.b32.xlu0 %v2989_v45, %s3093_s0 }
 0x30f   : > { %797 = vrot.lane.b32.xlu1 %v2985_v37, %s3094_s27  ;;  %795 = vrot.lane.b32.xlu0 %v2989_v45, %s3094_s27 }
 0x313   : > { %812 = vrot.lane.b32.xlu1 %v2985_v37, %s3095_s28  ;;  %810 = vrot.lane.b32.xlu0 %v2989_v45, %s3095_s28 }
 0x317   : > { %829 = vrot.lane.b32.xlu1 %v2985_v37, %s3096_s29  ;;  %827 = vrot.lane.b32.xlu0 %v2989_v45, %s3096_s29 }
 0x36d   : > { %v736_v39 = vpop.permute.xlu1 %735  ;;  %v719_v47 = vpop.permute.xlu0 %718 }
 0x371   : > { %v738_v48 = vpop.permute.xlu1 %737  ;;  %v721_v49 = vpop.permute.xlu0 %720 }
 0x372   : > { %v725_v50 = vsel %vm54_vm0, %v719_v47, %v721_v49  ;;  %v726_v51 = vsel %vm54_vm0, %v721_v49, %v719_v47  ;;  %v740_v57 = vsel %vm69_vm3, %v736_v39, %v738_v48  ;;  %v741_v58 = vsel %vm69_vm3, %v738_v48, %v736_v39 }
 0x373   : > { %vm727_vm15 = vcmp.eq.f32.partialorder %v3159_v2, %v726_v51  ;;  %vm728_vm1 = vcmp.eq.f32.partialorder %v3164_v3, %v725_v50  ;;  %vm742_vm5 = vcmp.eq.f32.partialorder %v3159_v2, %v741_v58  ;;  %vm743_vm8 = vcmp.eq.f32.partialorder %v3164_v3, %v740_v57 }
 0x374   : > { %v2081_v59 = vsel %vm727_vm15, 1.0, %v3097_v52  ;;  %v2082_v60 = vsel %vm728_vm1, 1.0, %v3097_v52  ;;  %v2083_v13 = vsel %vm742_vm5, 1.0, %v3097_v52  ;;  %v2084_v14 = vsel %vm743_vm8, 1.0, %v3097_v52 }
 0x375   : > { %v753_v55 = vpop.permute.xlu1 %752  ;;  %v751_v56 = vpop.permute.xlu0 %750  ;;  %v733_v63 = vadd.f32 %v2081_v59, %v2079_v53  ;;  %v734_v5 = vadd.f32 %v2082_v60, %v2080_v54 }
 0x376   : > { %v755_v61 = vsel %vm84_vm6, %v751_v56, %v753_v55  ;;  %v756_v62 = vsel %vm84_vm6, %v753_v55, %v751_v56 }
 0x377   : > { %vm757_vm10 = vcmp.eq.f32.partialorder %v3159_v2, %v756_v62  ;;  %vm758_vm11 = vcmp.eq.f32.partialorder %v3164_v3, %v755_v61  ;;  %v748_v15 = vadd.f32 %v2083_v13, %v733_v63  ;;  %v749_v17 = vadd.f32 %v2084_v14, %v734_v5 }
 0x378   : > { %v2085_v19 = vsel %vm757_vm10, 1.0, %v3097_v52  ;;  %v2086_v20 = vsel %vm758_vm11, 1.0, %v3097_v52 }
 0x379   : > { %v768_v6 = vpop.permute.xlu1 %767  ;;  %v766_v9 = vpop.permute.xlu0 %765  ;;  %v763_v18 = vadd.f32 %v2085_v19, %v748_v15  ;;  %v764_v26 = vadd.f32 %v2086_v20, %v749_v17 }
 0x37a   : > { %v770_v11 = vsel %vm99_vm7, %v766_v9, %v768_v6  ;;  %v771_v12 = vsel %vm99_vm7, %v768_v6, %v766_v9 }
 0x37b   : > { %vm772_vm13 = vcmp.eq.f32.partialorder %v3159_v2, %v771_v12  ;;  %vm773_vm14 = vcmp.eq.f32.partialorder %v3164_v3, %v770_v11 }
 0x37c   : > { %v2087_v24 = vsel %vm772_vm13, 1.0, %v3097_v52  ;;  %v2088_v16 = vsel %vm773_vm14, 1.0, %v3097_v52 }
 0x37d   : > { %v783_v8 = vpop.permute.xlu1 %782  ;;  %v781_v7 = vpop.permute.xlu0 %780  ;;  %v778_v33 = vadd.f32 %v2087_v24, %v763_v18  ;;  %v779_v34 = vadd.f32 %v2088_v16, %v764_v26 }
 0x37e   : > { %v785_v21 = vsel %vm114_vm12, %v781_v7, %v783_v8  ;;  %v786_v22 = vsel %vm114_vm12, %v783_v8, %v781_v7 }
 0x37f   : > { %vm787_vm15 = vcmp.eq.f32.partialorder %v3159_v2, %v786_v22  ;;  %vm788_vm1 = vcmp.eq.f32.partialorder %v3164_v3, %v785_v21 }
 0x380   : > { %v2089_v29 = vsel %vm787_vm15, 1.0, %v3097_v52  ;;  %v2090_v31 = vsel %vm788_vm1, 1.0, %v3097_v52 }
 0x381   : > { %v798_v27 = vpop.permute.xlu1 %797  ;;  %v796_v28 = vpop.permute.xlu0 %795  ;;  %v793_v38 = vadd.f32 %v2089_v29, %v778_v33  ;;  %v794_v30 = vadd.f32 %v2090_v31, %v779_v34 }
 0x382   : > { %v800_v23 = vsel %vm129_vm2, %v796_v28, %v798_v27  ;;  %v801_v25 = vsel %vm129_vm2, %v798_v27, %v796_v28 }
 0x383   : > { %vm802_vm5 = vcmp.eq.f32.partialorder %v3159_v2, %v801_v25  ;;  %vm803_vm8 = vcmp.eq.f32.partialorder %v3164_v3, %v800_v23 }
 0x384   : > { %v2091_v35 = vsel %vm802_vm5, 1.0, %v3097_v52  ;;  %v2092_v36 = vsel %vm803_vm8, 1.0, %v3097_v52 }
 0x385   : > { %v813_v32 = vpop.permute.xlu1 %812  ;;  %v811_v40 = vpop.permute.xlu0 %810  ;;  %v808_v43 = vadd.f32 %v2091_v35, %v793_v38  ;;  %v809_v45 = vadd.f32 %v2092_v36, %v794_v30 }
 0x386   : > { %v815_v41 = vsel %vm144_vm4, %v811_v40, %v813_v32  ;;  %v816_v42 = vsel %vm144_vm4, %v813_v32, %v811_v40 }
 0x387   : > { %vm817_vm10 = vcmp.eq.f32.partialorder %v3159_v2, %v816_v42  ;;  %vm818_vm11 = vcmp.eq.f32.partialorder %v3164_v3, %v815_v41  ;;  %706 = sbr.rel (!%p704_p13) target bundleno = 762 (0x2fa), region = 148 }
 0x388   : > { %v2093_v37 = vsel %vm817_vm10, 1.0, %v3097_v52  ;;  %v2094_v39 = vsel %vm818_vm11, 1.0, %v3097_v52  ;;  %v834_v52 = vrot.slane (%p704_p13), %v3159_v2, 2  }
 0x389   : > { %v823_v47 = vadd.f32 %v2093_v37, %v808_v43  ;;  %v824_v48 = vadd.f32 %v2094_v39, %v809_v45  ;;  %v830_v49 = vpop.permute.xlu1 %829  ;;  %v828_v50 = vpop.permute.xlu0 %827 }
 0x38a   : > { %v832_v37 = vsel %vm161_vm9, %v828_v50, %v830_v49   ;;  %v833_v45 = vsel %vm161_vm9, %v830_v49, %v828_v50  }
 0x38b   : > { %v825_v51 = vadd.f32 %v2997_v44, %v823_v47   ;;  %v826_v53 = vadd.f32 %v2993_v46, %v824_v48  }
 0x38d   : > { %v4079_v46 = vmov %v826_v53  ;;  %v4080_v44 = vmov %v825_v51 }
 0x38e   :  { %v835_v44 = vrot.slane %v3164_v3, 2  }
 0x38f LB: > { %s3098_s5 = smov 2   ;;  %s3099_s6 = smov 1   ;;  %vm846_vm13 = vcmp.eq.f32.partialorder %v3159_v2, %v3009_v52  ;;  %vm847_vm14 = vcmp.eq.f32.partialorder %v3164_v3, %v3005_v44  ;;  %v3106_v59 = vmov 0.0   ;;  %s3021_s30 = sphi %s3723_s30, %s841_s30   ;;  %v3017_v51 = vphi %v825_v51, %v4082_v51   ;;  %v3013_v53 = vphi %v826_v53, %v4081_v53   ;;  %v3009_v52 = vphi %v834_v52, %v967_v52   ;;  %v3005_v44 = vphi %v835_v44, %v966_v44  }
 0x390   : > { %869 = vrot.lane.b32.xlu1 %v3009_v52, %s3098_s5  ;;  %852 = vrot.lane.b32.xlu0 %v3009_v52, %s3099_s6  ;;  %s3100_s1 = smov 3   ;;  %s3101_s3 = smov 4   ;;  %v2095_v60 = vsel %vm846_vm13, 1.0, %v3106_v59  ;;  %v2096_v61 = vsel %vm847_vm14, 1.0, %v3106_v59 }
 0x391   : > { %s3102_s7 = smov 5   ;;  %s3103_s8 = smov 6  }
 0x392   : > { %s3104_s2 = smov 7   ;;  %s3105_s9 = smov 8  }
 0x393   : > { %s841_s30 = sadd.s32 1, %s3021_s30  }
 0x394   : > { %871 = vrot.lane.b32.xlu1 %v3005_v44, %s3098_s5  ;;  %854 = vrot.lane.b32.xlu0 %v3005_v44, %s3099_s6  ;;  %p838_p0 = scmp.ge.s32.totalorder %s841_s30, 32  }
 0x395   :  { %s3807_s10 = smov (%p838_p0), 0  }
 0x398   : > { %886 = vrot.lane.b32.xlu1 %v3005_v44, %s3100_s1  ;;  %884 = vrot.lane.b32.xlu0 %v3009_v52, %s3100_s1 }
 0x39c   : > { %901 = vrot.lane.b32.xlu1 %v3005_v44, %s3101_s3  ;;  %899 = vrot.lane.b32.xlu0 %v3009_v52, %s3101_s3 }
 0x3a0   : > { %916 = vrot.lane.b32.xlu1 %v3005_v44, %s3102_s7  ;;  %914 = vrot.lane.b32.xlu0 %v3009_v52, %s3102_s7 }
 0x3a4   : > { %931 = vrot.lane.b32.xlu1 %v3005_v44, %s3103_s8  ;;  %929 = vrot.lane.b32.xlu0 %v3009_v52, %s3103_s8 }
 0x3a8   : > { %946 = vrot.lane.b32.xlu1 %v3005_v44, %s3104_s2  ;;  %944 = vrot.lane.b32.xlu0 %v3009_v52, %s3104_s2 }
 0x3ac   : > { %963 = vrot.lane.b32.xlu1 %v3005_v44, %s3105_s9  ;;  %961 = vrot.lane.b32.xlu0 %v3009_v52, %s3105_s9 }
 0x402   : > { %v870_v46 = vpop.permute.xlu1 %869  ;;  %v853_v54 = vpop.permute.xlu0 %852 }
 0x406   : > { %v872_v55 = vpop.permute.xlu1 %871  ;;  %v855_v56 = vpop.permute.xlu0 %854 }
 0x407   : > { %v859_v57 = vsel %vm54_vm0, %v853_v54, %v855_v56  ;;  %v860_v58 = vsel %vm54_vm0, %v855_v56, %v853_v54  ;;  %v874_v5 = vsel %vm69_vm3, %v870_v46, %v872_v55  ;;  %v875_v6 = vsel %vm69_vm3, %v872_v55, %v870_v46 }
 0x408   : > { %vm861_vm15 = vcmp.eq.f32.partialorder %v3159_v2, %v860_v58  ;;  %vm862_vm1 = vcmp.eq.f32.partialorder %v3164_v3, %v859_v57  ;;  %vm876_vm5 = vcmp.eq.f32.partialorder %v3159_v2, %v875_v6  ;;  %vm877_vm8 = vcmp.eq.f32.partialorder %v3164_v3, %v874_v5 }
 0x409   : > { %v2097_v9 = vsel %vm861_vm15, 1.0, %v3106_v59  ;;  %v2098_v11 = vsel %vm862_vm1, 1.0, %v3106_v59  ;;  %v2099_v20 = vsel %vm876_vm5, 1.0, %v3106_v59  ;;  %v2100_v21 = vsel %vm877_vm8, 1.0, %v3106_v59 }
 0x40a   : > { %v887_v62 = vpop.permute.xlu1 %886  ;;  %v885_v63 = vpop.permute.xlu0 %884  ;;  %v867_v14 = vadd.f32 %v2097_v9, %v2095_v60  ;;  %v868_v15 = vadd.f32 %v2098_v11, %v2096_v61 }
 0x40b   : > { %v889_v12 = vsel %vm84_vm6, %v885_v63, %v887_v62  ;;  %v890_v13 = vsel %vm84_vm6, %v887_v62, %v885_v63 }
 0x40c   : > { %vm891_vm10 = vcmp.eq.f32.partialorder %v3159_v2, %v890_v13  ;;  %vm892_vm11 = vcmp.eq.f32.partialorder %v3164_v3, %v889_v12  ;;  %v882_v22 = vadd.f32 %v2099_v20, %v867_v14  ;;  %v883_v24 = vadd.f32 %v2100_v21, %v868_v15 }
 0x40d   : > { %v2101_v26 = vsel %vm891_vm10, 1.0, %v3106_v59  ;;  %v2102_v27 = vsel %vm892_vm11, 1.0, %v3106_v59 }
 0x40e   : > { %v902_v17 = vpop.permute.xlu1 %901  ;;  %v900_v8 = vpop.permute.xlu0 %899  ;;  %v897_v25 = vadd.f32 %v2101_v26, %v882_v22  ;;  %v898_v33 = vadd.f32 %v2102_v27, %v883_v24 }
 0x40f   : > { %v904_v7 = vsel %vm99_vm7, %v900_v8, %v902_v17  ;;  %v905_v19 = vsel %vm99_vm7, %v902_v17, %v900_v8 }
 0x410   : > { %vm906_vm13 = vcmp.eq.f32.partialorder %v3159_v2, %v905_v19  ;;  %vm907_vm14 = vcmp.eq.f32.partialorder %v3164_v3, %v904_v7 }
 0x411   : > { %v2103_v31 = vsel %vm906_vm13, 1.0, %v3106_v59  ;;  %v2104_v23 = vsel %vm907_vm14, 1.0, %v3106_v59 }
 0x412   : > { %v917_v16 = vpop.permute.xlu1 %916  ;;  %v915_v18 = vpop.permute.xlu0 %914  ;;  %v912_v40 = vadd.f32 %v2103_v31, %v897_v25  ;;  %v913_v41 = vadd.f32 %v2104_v23, %v898_v33 }
 0x413   : > { %v919_v28 = vsel %vm114_vm12, %v915_v18, %v917_v16  ;;  %v920_v29 = vsel %vm114_vm12, %v917_v16, %v915_v18 }
 0x414   : > { %vm921_vm15 = vcmp.eq.f32.partialorder %v3159_v2, %v920_v29  ;;  %vm922_vm1 = vcmp.eq.f32.partialorder %v3164_v3, %v919_v28 }
 0x415   : > { %v2105_v36 = vsel %vm921_vm15, 1.0, %v3106_v59  ;;  %v2106_v38 = vsel %vm922_vm1, 1.0, %v3106_v59 }
 0x416   : > { %v932_v34 = vpop.permute.xlu1 %931  ;;  %v930_v35 = vpop.permute.xlu0 %929  ;;  %v927_v45 = vadd.f32 %v2105_v36, %v912_v40  ;;  %v928_v37 = vadd.f32 %v2106_v38, %v913_v41 }
 0x417   : > { %v934_v30 = vsel %vm129_vm2, %v930_v35, %v932_v34  ;;  %v935_v32 = vsel %vm129_vm2, %v932_v34, %v930_v35 }
 0x418   : > { %vm936_vm5 = vcmp.eq.f32.partialorder %v3159_v2, %v935_v32  ;;  %vm937_vm8 = vcmp.eq.f32.partialorder %v3164_v3, %v934_v30 }
 0x419   : > { %v2107_v42 = vsel %vm936_vm5, 1.0, %v3106_v59  ;;  %v2108_v43 = vsel %vm937_vm8, 1.0, %v3106_v59 }
 0x41a   : > { %v947_v39 = vpop.permute.xlu1 %946  ;;  %v945_v47 = vpop.permute.xlu0 %944  ;;  %v942_v50 = vadd.f32 %v2107_v42, %v927_v45  ;;  %v943_v52 = vadd.f32 %v2108_v43, %v928_v37 }
 0x41b   : > { %v949_v48 = vsel %vm144_vm4, %v945_v47, %v947_v39  ;;  %v950_v49 = vsel %vm144_vm4, %v947_v39, %v945_v47 }
 0x41c   : > { %vm951_vm10 = vcmp.eq.f32.partialorder %v3159_v2, %v950_v49  ;;  %vm952_vm11 = vcmp.eq.f32.partialorder %v3164_v3, %v949_v48  ;;  %840 = sbr.rel (!%p838_p0) target bundleno = 911 (0x38f), region = 159 }
 0x41d   : > { %v2109_v44 = vsel %vm951_vm10, 1.0, %v3106_v59  ;;  %v2110_v46 = vsel %vm952_vm11, 1.0, %v3106_v59  ;;  %v968_v59 = vrot.slane (%p838_p0), %v3159_v2, 1  }
 0x41e   : > { %v957_v54 = vadd.f32 %v2109_v44, %v942_v50  ;;  %v958_v55 = vadd.f32 %v2110_v46, %v943_v52  ;;  %v964_v56 = vpop.permute.xlu1 %963  ;;  %v962_v57 = vpop.permute.xlu0 %961 }
 0x41f   : > { %v966_v44 = vsel %vm161_vm9, %v962_v57, %v964_v56   ;;  %v967_v52 = vsel %vm161_vm9, %v964_v56, %v962_v57  }
 0x420   : > { %v959_v58 = vadd.f32 %v3017_v51, %v957_v54   ;;  %v960_v60 = vadd.f32 %v3013_v53, %v958_v55  }
 0x422   : > { %v4081_v53 = vmov %v960_v60  ;;  %v4082_v51 = vmov %v959_v58 }
 0x423   :  { %v969_v51 = vrot.slane %v3164_v3, 1  }
 0x424 LB: > { %s3107_s11 = smov 2   ;;  %s3108_s12 = smov 1   ;;  %vm980_vm13 = vcmp.eq.f32.partialorder %v3159_v2, %v3029_v59  ;;  %vm981_vm14 = vcmp.eq.f32.partialorder %v3164_v3, %v3025_v51  ;;  %v3115_v9 = vmov 0.0   ;;  %s3041_s10 = sphi %s3807_s10, %s975_s10   ;;  %v3037_v58 = vphi %v959_v58, %v4084_v58   ;;  %v3033_v60 = vphi %v960_v60, %v4083_v60   ;;  %v3029_v59 = vphi %v968_v59, %v1101_v59   ;;  %v3025_v51 = vphi %v969_v51, %v1100_v51  }
 0x425   : > { %1003 = vrot.lane.b32.xlu1 %v3029_v59, %s3107_s11  ;;  %986 = vrot.lane.b32.xlu0 %v3029_v59, %s3108_s12  ;;  %s3109_s13 = smov 3   ;;  %s3110_s14 = smov 4   ;;  %v2111_v11 = vsel %vm980_vm13, 1.0, %v3115_v9  ;;  %v2112_v12 = vsel %vm981_vm14, 1.0, %v3115_v9 }
 0x426   : > { %s3111_s15 = smov 5   ;;  %s3112_s16 = smov 6  }
 0x427   : > { %s3113_s17 = smov 7   ;;  %s3114_s18 = smov 8  }
 0x428   : > { %s975_s10 = sadd.s32 1, %s3041_s10  }
 0x429   : > { %1005 = vrot.lane.b32.xlu1 %v3025_v51, %s3107_s11  ;;  %988 = vrot.lane.b32.xlu0 %v3025_v51, %s3108_s12  ;;  %p972_p1 = scmp.ge.s32.totalorder %s975_s10, 32  }
 0x42a   :  { %s3116_s19 = smov (%p972_p1), 16   ;;  %s3117_s20 = smov (%p972_p1), 1  }
 0x42b   :  { %s3119_s2 = smov (%p972_p1), 0.0  }
 0x42d   : > { %1020 = vrot.lane.b32.xlu1 %v3025_v51, %s3109_s13  ;;  %1018 = vrot.lane.b32.xlu0 %v3029_v59, %s3109_s13 }
 0x431   : > { %1035 = vrot.lane.b32.xlu1 %v3025_v51, %s3110_s14  ;;  %1033 = vrot.lane.b32.xlu0 %v3029_v59, %s3110_s14 }
 0x435   : > { %1050 = vrot.lane.b32.xlu1 %v3025_v51, %s3111_s15  ;;  %1048 = vrot.lane.b32.xlu0 %v3029_v59, %s3111_s15 }
 0x439   : > { %1065 = vrot.lane.b32.xlu1 %v3025_v51, %s3112_s16  ;;  %1063 = vrot.lane.b32.xlu0 %v3029_v59, %s3112_s16 }
 0x43d   : > { %1080 = vrot.lane.b32.xlu1 %v3025_v51, %s3113_s17  ;;  %1078 = vrot.lane.b32.xlu0 %v3029_v59, %s3113_s17 }
 0x441   : > { %1097 = vrot.lane.b32.xlu1 %v3025_v51, %s3114_s18  ;;  %1095 = vrot.lane.b32.xlu0 %v3029_v59, %s3114_s18 }
 0x445   :  { %1151 = vrot.lane.b32.xlu1 (%p972_p1), %v3159_v2, %s3116_s19  ;;  %1134 = vrot.lane.b32.xlu0 (%p972_p1), %v3159_v2, %s3117_s20 }
 0x449   :  { %1153 = vrot.lane.b32.xlu1 (%p972_p1), %v3164_v3, %s3116_s19  ;;  %1136 = vrot.lane.b32.xlu0 (%p972_p1), %v3164_v3, %s3117_s20 }
 0x497   : > { %v1004_v53 = vpop.permute.xlu1 %1003  ;;  %v987_v61 = vpop.permute.xlu0 %986 }
 0x49b   : > { %v1006_v62 = vpop.permute.xlu1 %1005  ;;  %v989_v63 = vpop.permute.xlu0 %988 }
 0x49c   : > { %v993_v5 = vsel %vm54_vm0, %v987_v61, %v989_v63  ;;  %v994_v6 = vsel %vm54_vm0, %v989_v63, %v987_v61  ;;  %v1008_v15 = vsel %vm69_vm3, %v1004_v53, %v1006_v62  ;;  %v1009_v17 = vsel %vm69_vm3, %v1006_v62, %v1004_v53 }
 0x49d   : > { %vm995_vm15 = vcmp.eq.f32.partialorder %v3159_v2, %v994_v6  ;;  %vm996_vm1 = vcmp.eq.f32.partialorder %v3164_v3, %v993_v5  ;;  %vm1010_vm5 = vcmp.eq.f32.partialorder %v3159_v2, %v1009_v17  ;;  %vm1011_vm8 = vcmp.eq.f32.partialorder %v3164_v3, %v1008_v15 }
 0x49e   : > { %v2113_v8 = vsel %vm995_vm15, 1.0, %v3115_v9  ;;  %v2114_v7 = vsel %vm996_vm1, 1.0, %v3115_v9  ;;  %v2115_v27 = vsel %vm1010_vm5, 1.0, %v3115_v9  ;;  %v2116_v28 = vsel %vm1011_vm8, 1.0, %v3115_v9 }
 0x49f   : > { %v1021_v13 = vpop.permute.xlu1 %1020  ;;  %v1019_v14 = vpop.permute.xlu0 %1018  ;;  %v1001_v21 = vadd.f32 %v2113_v8, %v2111_v11  ;;  %v1002_v22 = vadd.f32 %v2114_v7, %v2112_v12  ;;  %v1110_v17 = vadd.s32 (%p972_p1), 128, %v3206_v10  ;;  %vm1146_vm3 = vcmp.lt.s32.totalorder (%p972_p1), %v3206_v10, 16 }
 0x4a0   : > { %v1023_v19 = vsel %vm84_vm6, %v1019_v14, %v1021_v13  ;;  %v1024_v20 = vsel %vm84_vm6, %v1021_v13, %v1019_v14 }
 0x4a1   : > { %vm1025_vm10 = vcmp.eq.f32.partialorder %v3159_v2, %v1024_v20  ;;  %vm1026_vm11 = vcmp.eq.f32.partialorder %v3164_v3, %v1023_v19  ;;  %v1016_v29 = vadd.f32 %v2115_v27, %v1001_v21  ;;  %v1017_v31 = vadd.f32 %v2116_v28, %v1002_v22 }
 0x4a2   : > { %v2117_v33 = vsel %vm1025_vm10, 1.0, %v3115_v9  ;;  %v2118_v34 = vsel %vm1026_vm11, 1.0, %v3115_v9  ;;  %v1112_v19 = vand.u32 (%p972_p1), 15, %v1110_v17  ;;  %v1111_v20 = vand.u32 (%p972_p1), 15, %v3206_v10 }
 0x4a3   : > { %v1036_v24 = vpop.permute.xlu1 %1035  ;;  %v1034_v16 = vpop.permute.xlu0 %1033  ;;  %v1031_v32 = vadd.f32 %v2117_v33, %v1016_v29  ;;  %v1032_v40 = vadd.f32 %v2118_v34, %v1017_v31 }
 0x4a4   : > { %v1038_v18 = vsel %vm99_vm7, %v1034_v16, %v1036_v24  ;;  %v1039_v26 = vsel %vm99_vm7, %v1036_v24, %v1034_v16  ;;  %vm1114_vm6 = vcmp.ne.s32.totalorder (%p972_p1), %v1112_v19, 0  ;;  %vm1119_vm7 = vcmp.ge.s32.totalorder (%p972_p1), %v3206_v10, 16 }
 0x4a5   : > { %vm1040_vm13 = vcmp.eq.f32.partialorder %v3159_v2, %v1039_v26  ;;  %vm1041_vm14 = vcmp.eq.f32.partialorder %v3164_v3, %v1038_v18 }
 0x4a6   : > { %v2119_v38 = vsel %vm1040_vm13, 1.0, %v3115_v9  ;;  %v2120_v30 = vsel %vm1041_vm14, 1.0, %v3115_v9 }
 0x4a7   : > { %v1051_v23 = vpop.permute.xlu1 %1050  ;;  %v1049_v25 = vpop.permute.xlu0 %1048  ;;  %v1046_v47 = vadd.f32 %v2119_v38, %v1031_v32  ;;  %v1047_v48 = vadd.f32 %v2120_v30, %v1032_v40 }
 0x4a8   : > { %v1053_v35 = vsel %vm114_vm12, %v1049_v25, %v1051_v23  ;;  %v1054_v36 = vsel %vm114_vm12, %v1051_v23, %v1049_v25  ;;  %vm1113_vm12 = vcmp.ne.s32.totalorder (%p972_p1), %v1111_v20, 0 }
 0x4a9   : > { %vm1055_vm15 = vcmp.eq.f32.partialorder %v3159_v2, %v1054_v36  ;;  %vm1056_vm1 = vcmp.eq.f32.partialorder %v3164_v3, %v1053_v35 }
 0x4aa   : > { %v2121_v43 = vsel %vm1055_vm15, 1.0, %v3115_v9  ;;  %v2122_v45 = vsel %vm1056_vm1, 1.0, %v3115_v9 }
 0x4ab   : > { %v1066_v41 = vpop.permute.xlu1 %1065  ;;  %v1064_v42 = vpop.permute.xlu0 %1063  ;;  %v1061_v52 = vadd.f32 %v2121_v43, %v1046_v47  ;;  %v1062_v44 = vadd.f32 %v2122_v45, %v1047_v48 }
 0x4ac   : > { %v1068_v37 = vsel %vm129_vm2, %v1064_v42, %v1066_v41  ;;  %v1069_v39 = vsel %vm129_vm2, %v1066_v41, %v1064_v42  ;;  %vm1222_vm2 = vcmask (%p972_p1), 64512  }
 0x4ad   : > { %vm1070_vm5 = vcmp.eq.f32.partialorder %v3159_v2, %v1069_v39  ;;  %vm1071_vm8 = vcmp.eq.f32.partialorder %v3164_v3, %v1068_v37 }
 0x4ae   : > { %v2123_v49 = vsel %vm1070_vm5, 1.0, %v3115_v9  ;;  %v2124_v50 = vsel %vm1071_vm8, 1.0, %v3115_v9 }
 0x4af   : > { %v1081_v46 = vpop.permute.xlu1 %1080  ;;  %v1079_v54 = vpop.permute.xlu0 %1078  ;;  %v1076_v57 = vadd.f32 %v2123_v49, %v1061_v52  ;;  %v1077_v59 = vadd.f32 %v2124_v50, %v1062_v44 }
 0x4b0   : > { %v1083_v55 = vsel %vm144_vm4, %v1079_v54, %v1081_v46  ;;  %v1084_v56 = vsel %vm144_vm4, %v1081_v46, %v1079_v54 }
 0x4b1   : > { %vm1085_vm10 = vcmp.eq.f32.partialorder %v3159_v2, %v1084_v56  ;;  %vm1086_vm11 = vcmp.eq.f32.partialorder %v3164_v3, %v1083_v55  ;;  %974 = sbr.rel (!%p972_p1) target bundleno = 1060 (0x424), region = 170 }
 0x4b2   : > { %v2125_v51 = vsel %vm1085_vm10, 1.0, %v3115_v9  ;;  %v2126_v53 = vsel %vm1086_vm11, 1.0, %v3115_v9 }
 0x4b3   : > { %v1091_v61 = vadd.f32 %v2125_v51, %v1076_v57  ;;  %v1092_v62 = vadd.f32 %v2126_v53, %v1077_v59  ;;  %v1098_v63 = vpop.permute.xlu1 %1097  ;;  %v1096_v5 = vpop.permute.xlu0 %1095 }
 0x4b4   : > { %v1100_v51 = vsel %vm161_vm9, %v1096_v5, %v1098_v63   ;;  %v1101_v59 = vsel %vm161_vm9, %v1098_v63, %v1096_v5  }
 0x4b5   : > { %v1093_v6 = vadd.f32 %v3037_v58, %v1091_v61   ;;  %v1094_v11 = vadd.f32 %v3033_v60, %v1092_v62  }
 0x4b7   : > { %v4083_v60 = vmov %v1094_v11  ;;  %v4084_v58 = vmov %v1093_v6  ;;  %v1103_v9 = vmax.f32 (%p972_p1), %v1094_v11, 1.0  ;;  %v1102_v12 = vmax.f32 (%p972_p1), %v1093_v6, 1.0  ;;  %v1152_v8 = vpop.permute.xlu1 (%p972_p1), %1151  ;;  %v1135_v7 = vpop.permute.xlu0 (%p972_p1), %1134 }
 0x4b8   :  { %v3118_v58 = vmov 0.0  }
 0x4b9   :  { %2661 = vrcp.f32 %v1103_v9  ;;  %1361 = vmatprep.mubr.f32.mxu1 %v3118_v58  ;;  %1290 = vmatprep.mubr.f32.mxu0 %v3118_v58  ;;  %v3913_v23 = vsel %vm1114_vm6, 1.0, %v3118_v58  ;;  %v3915_v25 = vsel %vm1119_vm7, 1.0, %v3118_v58  ;;  %v3917_v33 = vsel %vm1113_vm12, 1.0, %v3118_v58 }
 0x4ba   :  { %2663 = vrcp.f32 %v1102_v12 }
 0x4bb   :  { %v1154_v21 = vpop.permute.xlu1 %1153  ;;  %v1137_v22 = vpop.permute.xlu0 %1136 }
 0x4bc   :  { %v1155_v24 = vsel %vm1146_vm3, %v1152_v8, %v1154_v21  ;;  %v1156_v16 = vsel %vm1146_vm3, %v1154_v21, %v1152_v8  ;;  %v1138_v18 = vsel %vm54_vm0, %v1135_v7, %v1137_v22  ;;  %v1139_v26 = vsel %vm54_vm0, %v1137_v22, %v1135_v7 }
 0x4bd   :  { %v1157_v27 = vsub.f32 %v3159_v2, %v1156_v16  ;;  %v1140_v28 = vsub.f32 %v3159_v2, %v1139_v26  ;;  %v1141_v29 = vsub.f32 %v3164_v3, %v1138_v18  ;;  %v1158_v31 = vsub.f32 %v3164_v3, %v1155_v24 }
 0x4be   :  { %v1419_v16 = vmax.f32 %v3159_v2, 1e-06  ;;  %v1420_v18 = vmax.f32 %v3164_v3, 1e-06  ;;  %v1425_v26 = vmax.f32 %v3149_v0, 1e-06 }
 0x4bf   :  { %v1219_v34 = vand.u32 2147483647, %v1158_v31  ;;  %v1215_v35 = vand.u32 2147483647, %v1141_v29  ;;  %v1218_v36 = vand.u32 2147483647, %v1157_v27 }
 0x4c0   :  { %v1214_v38 = vand.u32 2147483647, %v1140_v28  ;;  %2665 = vlog2.f32 %v1419_v16 }
 0x4c1   :  { %1297 = vmatprep.subr.mxu1 %v1219_v34  ;;  %v1217_v30 = vmul.f32 %v3913_v23, %v1215_v35  ;;  %v1220_v32 = vmul.f32 %v3915_v25, %v1218_v36  ;;  %2667 = vlog2.f32 %v1420_v18 }
 0x4c2   :  { %v1216_v40 = vmul.f32 %v3917_v33, %v1214_v38  ;;  %2669 = vlog2.f32 %v1425_v26 }
 0x4c3   :  { %v2662_v13 = vpop.eup %2661  ;;  %1226 = vmatprep.subr.mxu0 %v1217_v30  ;;  %1298 = vmatpush1.msra.mxu1 %v1220_v32 }
 0x4c4   :  { %v2664_v14 = vpop.eup %2663  ;;  %v3885_v15 = vmul.f32 255.0, %v2662_v13  ;;  %1227 = vmatpush1.msra.mxu0 %v1216_v40  ;;  %2131 = vmatmul.mubr.msk.f32.vlgmr.msra.gmra.mrb[0].mxu1 %vm1222_vm2, %v3169_v4 }
 0x4c5   :  { %v3887_v60 = vmul.f32 255.0, %v2664_v14  ;;  %2130 = vmatmul.mubr.msk.f32.vlgmr.msra.gmra.mrb[0].mxu0 %vm1222_vm2, %v3169_v4 }
 0x4c6   :  { %1161 = vrot.lane.b32.xlu1 %v3885_v15, %s3117_s20 }
 0x4c7   :  { %1159 = vrot.lane.b32.xlu0 %v3887_v60, %s3117_s20 }
 0x4ca   :  { %1171 = vrot.lane.b32.xlu1 %v3885_v15, %s3116_s19 }
 0x4cb   :  { %1169 = vrot.lane.b32.xlu0 %v3887_v60, %s3116_s19 }
 0x4ce   :  { %1127 = vrot.lane.b32.xlu1 %v3154_v1, %s3117_s20 }
 0x4cf   :  { %1125 = vrot.lane.b32.xlu0 %v3149_v0, %s3117_s20 }
 0x4d2   :  { %1144 = vrot.lane.b32.xlu1 %v3154_v1, %s3116_s19 }
 0x4d3   :  { %1142 = vrot.lane.b32.xlu0 %v3149_v0, %s3116_s19 }
 0x538   :  { %v1162_v41 = vpop.permute.xlu1 %1161 }
 0x539   :  { %v1160_v42 = vpop.permute.xlu0 %1159 }
 0x53a   :  { %v1164_v45 = vsel %vm54_vm0, %v1162_v41, %v1160_v42  ;;  %v1163_v39 = vsel %vm54_vm0, %v1160_v42, %v1162_v41 }
 0x53b   :  { %v1165_v47 = vmul.f32 %v1164_v45, %v3887_v60  ;;  %v1166_v49 = vmul.f32 %v1163_v39, %v3885_v15 }
 0x53c   :  { %v1172_v43 = vpop.permute.xlu1 %1171 }
 0x53d   :  { %v1170_v37 = vpop.permute.xlu0 %1169  ;;  %v3943_v55 = vmul.f32 %v3917_v33, %v1165_v47  ;;  %v3947_v59 = vmul.f32 %v3913_v23, %v1166_v49  ;;  %v1476_v47 = vsub.f32 %v3159_v2, %v3149_v0 }
 0x53e   :  { %v1174_v50 = vsel %vm1146_vm3, %v1172_v43, %v1170_v37  ;;  %v1173_v51 = vsel %vm1146_vm3, %v1170_v37, %v1172_v43 }
 0x53f   :  { %v1175_v56 = vmul.f32 %v1174_v50, %v3887_v60  ;;  %v3964_v58 = vmul.f32 %v1173_v51, %v3885_v15  ;;  %v1478_v49 = vand.u32 2147483647, %v1476_v47 }
 0x540   :  { %v1128_v48 = vpop.permute.xlu1 %1127 }
 0x541   :  { %v1126_v52 = vpop.permute.xlu0 %1125  ;;  %v3967_v13 = vmul.f32 %v3915_v25, %v1175_v56 }
 0x542   :  { %v1130_v4 = vsel %vm54_vm0, %v1126_v52, %v1128_v48  ;;  %v1131_v44 = vsel %vm54_vm0, %v1128_v48, %v1126_v52  ;;  %v1477_v48 = vsub.f32 %v3164_v3, %v3154_v1  ;;  %v1480_v52 = vmul.f32 %v1478_v49, %v3887_v60 }
 0x543   :  { %v3937_v46 = vsub.f32 %v3149_v0, %v1131_v44  ;;  %v3940_v54 = vsub.f32 %v3154_v1, %v1130_v4 }
 0x544   :  { %v1145_v57 = vpop.permute.xlu1 %1144  ;;  %v1479_v50 = vand.u32 2147483647, %v1477_v48 }
 0x545   :  { %v1179_v53 = vsub.f32 %v3937_v46, %v1140_v28  ;;  %v1180_v61 = vsub.f32 %v3940_v54, %v1141_v29  ;;  %v1143_v62 = vpop.permute.xlu0 %1142  ;;  %v2666_v28 = vpop.eup %2665 }
 0x546   :  { %v1147_v63 = vsel %vm1146_vm3, %v1143_v62, %v1145_v57  ;;  %v1148_v5 = vsel %vm1146_vm3, %v1145_v57, %v1143_v62  ;;  %v2668_v29 = vpop.eup %2667  ;;  %v1481_v4 = vmul.f32 %v1479_v50, %v3885_v15 }
 0x547   :  { %v1181_v6 = vand.u32 2147483647, %v1179_v53  ;;  %v1182_v11 = vand.u32 2147483647, %v1180_v61  ;;  %v3958_v9 = vsub.f32 %v3149_v0, %v1148_v5  ;;  %v3961_v12 = vsub.f32 %v3154_v1, %v1147_v63  ;;  %v2670_v34 = vpop.eup %2669 }
 0x548   :  { %v1424_v35 = vmul.f32 0.6931472, %v2668_v29  ;;  %v1428_v38 = vmul.f32 0.6931472, %v2670_v34  ;;  %v1482_v44 = vadd.f32 %v1481_v4, %v1480_v52 }
 0x549   :  { %v1196_v14 = vsub.f32 %v3958_v9, %v1157_v27  ;;  %v1197_v17 = vsub.f32 %v3961_v12, %v1158_v31  ;;  %v1183_v10 = vmul.f32 %v1181_v6, %v3943_v55  ;;  %v1184_v8 = vmul.f32 %v1182_v11, %v3947_v59 }
 0x54a   :  { %v1426_v27 = vmax.f32 %v3154_v1, 1e-06  ;;  %v1422_v31 = vmul.f32 0.6931472, %v2666_v28 }
 0x54b   :  { %v1198_v7 = vand.u32 2147483647, %v1196_v14  ;;  %v1199_v19 = vand.u32 2147483647, %v1197_v17  ;;  %v1185_v20 = vadd.f32 %v1184_v8, %v1183_v10 }
 0x54c   :  { %2671 = vlog2.f32 %v1426_v27  ;;  %v1431_v32 = vsub.f32 %v1422_v31, %v1428_v38 }
 0x54d   :  { %1186 = vadd.xlane.f32.xlu0 %v1185_v20  ;;  %v1200_v21 = vmul.f32 %v1198_v7, %v3967_v13  ;;  %v1201_v22 = vmul.f32 %v1199_v19, %v3964_v58 }
 0x54e   :  { %v1433_v41 = vmul.f32 %v1431_v32, %v3887_v60 }
 0x54f   :  { %v1202_v24 = vadd.f32 %v1201_v22, %v1200_v21 }
 0x550   :  { %v1448_v45 = vmul.f32 %v1433_v41, %v1433_v41 }
 0x551   :  { %1203 = vadd.xlane.f32.xlu1 %v1202_v24 }
 0x556   :  { %v2672_v36 = vpop.eup %2671 }
 0x557   :  { %v1430_v30 = vmul.f32 0.6931472, %v2672_v36 }
 0x559   :  { %v1432_v40 = vsub.f32 %v1424_v35, %v1430_v30 }
 0x55b   :  { %v1434_v42 = vmul.f32 %v1432_v40, %v3885_v15 }
 0x55d   :  { %v1435_v43 = vadd.f32 %v1434_v42, %v1433_v41  ;;  %v1449_v37 = vmul.f32 %v1434_v42, %v1434_v42 }
 0x55f   :  { %1436 = vadd.xlane.f32.xlu1 %v1435_v43  ;;  %v3981_v39 = vadd.f32 %v1449_v37, %v1448_v45 }
 0x563   :  { %1483 = vadd.xlane.f32.xlu1 %v1482_v44 }
 0x597   :  { %v1363_v60 = vpop.f32.mrb[0].mxu1 }
 0x598   :  { %v1378_v15 = vsub.f32 0.0, %v1363_v60  ;;  %v1292_v7 = vpop.f32.mrb[0].mxu0  ;;  %v1365_v19 = vpop.f32.mrb[1].mxu1 }
 0x599   :  { %v1368_v20 = vsub.f32 0.0, %v1292_v7  ;;  %v1379_v21 = vsub.f32 0.0, %v1365_v19  ;;  %v1294_v22 = vpop.f32.mrb[1].mxu0 }
 0x59a   :  { %v1380_v24 = vmul.f32 %v1378_v15, %v3967_v13  ;;  %v1369_v16 = vsub.f32 0.0, %v1294_v22 }
 0x59b   :  { %v1370_v18 = vmul.f32 %v1368_v20, %v3943_v55  ;;  %v1381_v26 = vmul.f32 %v1379_v21, %v3964_v58 }
 0x59c   :  { %v1382_v27 = vmul.f32 1.442695, %v1380_v24  ;;  %v1371_v28 = vmul.f32 %v1369_v16, %v3947_v59 }
 0x59d   :  { %v1372_v29 = vmul.f32 1.442695, %v1370_v18  ;;  %v1384_v31 = vmul.f32 1.442695, %v1381_v26 }
 0x59e   :  { %2673 = vpow2.f32 %v1382_v27  ;;  %v1374_v34 = vmul.f32 1.442695, %v1371_v28 }
 0x59f   :  { %2675 = vpow2.f32 %v1372_v29 }
 0x5a0   :  { %2677 = vpow2.f32 %v1384_v31 }
 0x5a1   :  { %2679 = vpow2.f32 %v1374_v34 }
 0x5a8   :  { %v2674_v35 = vpop.eup %2673 }
 0x5a9   :  { %v2676_v36 = vpop.eup %2675  ;;  %v1386_v13 = vmul.f32 %v2674_v35, %v3958_v9 }
 0x5aa   :  { %v2678_v55 = vpop.eup %2677  ;;  %v1376_v58 = vmul.f32 %v2676_v36, %v3937_v46 }
 0x5ab   :  { %v2680_v38 = vpop.eup %2679  ;;  %v1387_v59 = vmul.f32 %v2678_v55, %v3961_v12  ;;  %v1403_v30 = vand.u32 2147483647, %v1386_v13 }
 0x5ac   :  { %v1377_v32 = vmul.f32 %v2680_v38, %v3940_v54  ;;  %v1388_v40 = vand.u32 2147483647, %v1376_v58 }
 0x5ad   :  { %v1404_v41 = vand.u32 2147483647, %v1387_v59  ;;  %v1405_v42 = vmul.f32 %v3915_v25, %v1403_v30 }
 0x5ae   :  { %v1389_v43 = vand.u32 2147483647, %v1377_v32  ;;  %v1390_v45 = vmul.f32 %v3917_v33, %v1388_v40 }
 0x5af   :  { %v1407_v9 = vadd.f32 %v1405_v42, %v1404_v41 }
 0x5b0   :  { %v1391_v37 = vmul.f32 %v3913_v23, %v1389_v43 }
 0x5b1   :  { %1408 = vadd.xlane.f32.xlu0 %v1407_v9 }
 0x5b2   :  { %v1392_v46 = vadd.f32 %v1391_v37, %v1390_v45 }
 0x5b5   :  { %1393 = vadd.xlane.f32.xlu0 %v1392_v46 }
 0x5b9   :  { %1451 = vadd.xlane.f32.xlu0 %v3981_v39 }
 0x5da   :  { %v1187_v56 = vpop.xlane.xlu0 %1186 }
 0x5db   :  { %v1188_v57 = vrot.slane %v1187_v56, 4 }
 0x5dd   :  { %v1189_v51 = vadd.f32 %v1188_v57, %v1187_v56 }
 0x5de   :  { %v1204_v53 = vpop.xlane.xlu1 %1203 }
 0x5df   :  { %v1190_v61 = vrot.slane %v1189_v51, 2  ;;  %v1205_v62 = vrot.slane %v1204_v53, 4 }
 0x5e1   :  { %v1206_v63 = vadd.f32 %v1205_v62, %v1204_v53  ;;  %v1191_v5 = vadd.f32 %v1190_v61, %v1189_v51 }
 0x5e3   :  { %v1207_v6 = vrot.slane %v1206_v63, 2  ;;  %v1192_v11 = vrot.slane %v1191_v5, 1 }
 0x5e5   :  { %v1193_v14 = vadd.f32 %v1192_v11, %v1191_v5  ;;  %v1208_v17 = vadd.f32 %v1207_v6, %v1206_v63 }
 0x5e7   :  { %2229 = vpush %v1193_v14  ;;  %v1209_v10 = vrot.slane %v1208_v17, 1 }
 0x5e9   :  { %v1210_v8 = vadd.f32 %v1209_v10, %v1208_v17 }
 0x5eb   :  { %2231 = vpush %v1210_v8 }
 0x5ec   :  { %v1437_v12 = vpop.xlane.xlu1 %1436 }
 0x5ed   :  { %v1438_v47 = vrot.slane %v1437_v12, 4 }
 0x5ef   :  { %v1439_v49 = vadd.f32 %v1438_v47, %v1437_v12 }
 0x5f0   :  { %v1484_v15 = vpop.xlane.xlu1 %1483 }
 0x5f1   :  { %v1440_v4 = vrot.slane %v1439_v49, 2  ;;  %v1485_v7 = vrot.slane %v1484_v15, 4 }
 0x5f3   :  { %v1441_v53 = vadd.f32 %v1440_v4, %v1439_v49  ;;  %v1486_v19 = vadd.f32 %v1485_v7, %v1484_v15 }
 0x5f5   :  { %v1442_v6 = vrot.slane %v1441_v53, 1  ;;  %v1487_v21 = vrot.slane %v1486_v19, 2 }
 0x5f7   :  { %v1443_v10 = vadd.f32 %v1442_v6, %v1441_v53  ;;  %v1488_v22 = vadd.f32 %v1487_v21, %v1486_v19 }
 0x5f9   :  { %v1489_v16 = vrot.slane %v1488_v22, 1 }
 0x5fb   :  { %v1490_v29 = vadd.f32 %v1489_v16, %v1488_v22 }
 0x618   :  { %s2230_s21 = spop %2229 }
 0x619   :  { %s1195_s22 = smul.f32 0.00052083336, %s2230_s21 }
 0x61c   :  { %s2232_s23 = spop %2231 }
 0x61d   :  { %s1212_s24 = smul.f32 0.00052083336, %s2232_s23 }
 0x61f   :  { %s3996_s25 = sadd.f32 %s1212_s24, %s1195_s22 }
 0x63e   :  { %v1409_v48 = vpop.xlane.xlu0 %1408 }
 0x63f   :  { %v1410_v54 = vrot.slane %v1409_v48, 4 }
 0x641   :  { %v1411_v50 = vadd.f32 %v1410_v54, %v1409_v48 }
 0x642   :  { %v1394_v52 = vpop.xlane.xlu0 %1393 }
 0x643   :  { %v1412_v25 = vrot.slane %v1411_v50, 2  ;;  %v1395_v44 = vrot.slane %v1394_v52, 4 }
 0x645   :  { %v1396_v56 = vadd.f32 %v1395_v44, %v1394_v52  ;;  %v1413_v57 = vadd.f32 %v1412_v25, %v1411_v50 }
 0x646   :  { %v1452_v33 = vpop.xlane.xlu0 %1451 }
 0x647   :  { %v1397_v51 = vrot.slane %v1396_v56, 2  ;;  %v1453_v23 = vrot.slane %v1452_v33, 4  ;;  %v1414_v63 = vrot.slane %v1413_v57, 1 }
 0x649   :  { %v1454_v61 = vadd.f32 %v1453_v23, %v1452_v33  ;;  %v1398_v62 = vadd.f32 %v1397_v51, %v1396_v56  ;;  %v1415_v17 = vadd.f32 %v1414_v63, %v1413_v57 }
 0x64b   :  { %v1455_v39 = vrot.slane %v1454_v61, 2  ;;  %v1399_v5 = vrot.slane %v1398_v62, 1 }
 0x64d   :  { %v1456_v11 = vadd.f32 %v1455_v39, %v1454_v61  ;;  %v1400_v14 = vadd.f32 %v1399_v5, %v1398_v62 }
 0x64f   :  { %2233 = vpush %v1400_v14  ;;  %v1457_v8 = vrot.slane %v1456_v11, 1 }
 0x650   :  { %2235 = vpush %v1415_v17 }
 0x651   :  { %2237 = vpush %v1443_v10  ;;  %v1458_v60 = vadd.f32 %v1457_v8, %v1456_v11 }
 0x653   :  { %2239 = vpush %v1458_v60 }
 0x680   :  { %s2234_s26 = spop %2233 }
 0x681   :  { %s1402_s0 = smul.f32 0.00052083336, %s2234_s26  ;;  %s2236_s27 = spop %2235 }
 0x682   :  { %s1417_s28 = smul.f32 0.00052083336, %s2236_s27  ;;  %s2238_s29 = spop %2237 }
 0x683   :  { %s1447_s30 = smul.f32 0.00048828125, %s2238_s29 }
 0x684   :  { %s4003_s5 = sadd.f32 %s1417_s28, %s1402_s0  ;;  %s2240_s6 = spop %2239 }
 0x685   :  { %s1463_s1 = smul.f32 0.5, %s1447_s30 }
 0x686   :  { %s1462_s3 = smul.f32 0.00048828125, %s2240_s6 }
 0x687   :  { %s1464_s7 = smul.f32 %s1463_s1, %s1447_s30 }
 0x689   :  { %s1465_s8 = ssub.f32 %s1462_s3, %s1464_s7 }
 0x68b   :  { %s1466_s9 = smax.f32 %s3119_s2, %s1465_s8 }
 0x68c   :  { %v1467_v20 = vstv %s1466_s9 }
 0x68d   :  { %2681 = vrsqrt.f32 %v1467_v20  ;;  %vm1470_vm0 = vcmp.eq.f32.partialorder %v1467_v20, inf  ;;  %v1473_v26 = vand.u32 2147483648, %v1467_v20  ;;  %vm1472_vm4 = vcmp.eq.f32.partialorder %v1467_v20, 0.0 }
 0x697   :  { %v2682_v24 = vpop.eup %2681 }
 0x698   :  { %v1469_v18 = vmul.f32 %v2682_v24, %v1467_v20 }
 0x69a   :  { %v1471_v27 = vsel %vm1470_vm0, %v1467_v20, %v1469_v18 }
 0x69b   :  { %v1474_v28 = vsel %vm1472_vm4, %v1473_v26, %v1471_v27 }
 0x69c   :  { %2241 = vpush %v1474_v28 }
 0x69d   :  { %2243 = vpush %v1490_v29 }
 0x6cd   :  { %s4005_s10 = spop %2241 }
 0x6ce   :  { %s4007_s11 = spop %2243 }
 0x6cf   :  { %s1494_s12 = smul.f32 0.00048828125, %s4007_s11 }
 0x6d0   :  { %2879 = dma.done.wait [#allocation3], 8192 }
 0x6d1   :  { %2880 = vsyncadd [#allocation3], 4294959104  ;;  %1633 = vmatprep.mubr.f32.mxu0 %v3154_v1  ;;  %v1566_v31 = vmul.f32 %v3164_v3, %v3164_v3  ;;  %v1500_v34 = vld [vmem:[#allocation2 + $0x8] sm:$0xff]  ;;  %v1502_v35 = vld [vmem:[#allocation2 + $0x18] sm:$0xff]  ;;  %s1832_s18 = smul.f32 0.5, %s4005_s10 }
 0x6d2   :  { %v1499_v36 = vld [vmem:[#allocation2] sm:$0xff]  ;;  %v2133_v13 = vpack.c.bf16 %v1502_v35, %v1500_v34  ;;  %v1501_v55 = vld [vmem:[#allocation2 + $0x10] sm:$0xff]  ;;  %v1504_v58 = vld [vmem:[#allocation2 + $0x28] sm:$0xff]  ;;  %s1833_s19 = smul.f32 10.0, %s3996_s25 }
 0x6d3   :  { %1651 = vmatprep.mubr.f32.mxu1 %v1566_v31  ;;  %v1506_v38 = vld [vmem:[#allocation2 + $0x38] sm:$0xff]  ;;  %v2135_v59 = vpack.c.bf16 %v1501_v55, %v1499_v36  ;;  %v1503_v32 = vld [vmem:[#allocation2 + $0x20] sm:$0xff]  ;;  %v1505_v40 = vld [vmem:[#allocation2 + $0x30] sm:$0xff]  ;;  %s1837_s23 = smul.f32 10.0, %s4003_s5 }
 0x6d4   :  { %v2137_v30 = vpack.c.bf16 %v1506_v38, %v1504_v58  ;;  %v1508_v41 = vld [vmem:[#allocation2 + $0x48] sm:$0xff]  ;;  %2134 = vmatprep.subr.bf16.mxu0 %v2133_v13  ;;  %2197 = vmatprep.subr.bf16.mxu1 %v2133_v13  ;;  %v1510_v42 = vld [vmem:[#allocation2 + $0x58] sm:$0xff]  ;;  %v2139_v43 = vpack.c.bf16 %v1505_v40, %v1503_v32  ;;  %v1507_v9 = vld [vmem:[#allocation2 + $0x40] sm:$0xff]  ;;  %s1834_s21 = sadd.f32 %s1833_s19, %s1832_s18  ;;  %s2709_s18 = scalar_lea.hbm %s4066_s4, 16 }
 0x6d5   :  { %2136 = vmatpush1.bf16.msra.mxu0 %v2135_v59  ;;  %2213 = vmatpush1.bf16.msra.mxu1 %v2135_v59  ;;  %v2141_v45 = vpack.c.bf16 %v1510_v42, %v1508_v41  ;;  %v1509_v37 = vld [vmem:[#allocation2 + $0x50] sm:$0xff]  ;;  %v1512_v46 = vld [vmem:[#allocation2 + $0x68] sm:$0xff]  ;;  %v1514_v12 = vld [vmem:[#allocation2 + $0x78] sm:$0xff]  ;;  %p2710_p2 = scmp.ne.s32.totalorder %s4066_s4, %s2709_s18  ;;  %p2713_p3 = scmp.lt.u32.totalorder %s2709_s18, %s4066_s4 }
 0x6d6   :  { %2138 = vmatprep.subr.bf16.mxu0 %v2137_v30  ;;  %2198 = vmatprep.subr.bf16.mxu1 %v2137_v30  ;;  %v2143_v47 = vpack.c.bf16 %v1509_v37, %v1507_v9  ;;  %v2145_v48 = vpack.c.bf16 %v1514_v12, %v1512_v46  ;;  %v1511_v49 = vld [vmem:[#allocation2 + $0x60] sm:$0xff]  ;;  %v1513_v54 = vld [vmem:[#allocation2 + $0x70] sm:$0xff]  ;;  %v1516_v50 = vld [vmem:[#allocation2 + $0x88] sm:$0xff] }
 0x6d7   :  { %v1518_v52 = vld [vmem:[#allocation2 + $0x98] sm:$0xff]  ;;  %v2147_v4 = vpack.c.bf16 %v1513_v54, %v1511_v49  ;;  %v1515_v44 = vld [vmem:[#allocation2 + $0x80] sm:$0xff]  ;;  %v1517_v56 = vld [vmem:[#allocation2 + $0x90] sm:$0xff]  ;;  %p2715_p4 = pnand %p2713_p3, %p2710_p2 }
 0x6d8   :  { %v2149_v25 = vpack.c.bf16 %v1518_v52, %v1516_v50  ;;  %v1520_v33 = vld [vmem:[#allocation2 + $0xa8] sm:$0xff]  ;;  %v1522_v57 = vld [vmem:[#allocation2 + $0xb8] sm:$0xff]  ;;  %v2151_v51 = vpack.c.bf16 %v1517_v56, %v1515_v44  ;;  %v1519_v53 = vld [vmem:[#allocation2 + $0xa0] sm:$0xff] }
 0x6d9   :  { %2140 = vmatpush1.bf16.msra.mxu0 %v2139_v43  ;;  %2214 = vmatpush1.bf16.msra.mxu1 %v2139_v43  ;;  %v2153_v23 = vpack.c.bf16 %v1522_v57, %v1520_v33  ;;  %v1521_v61 = vld [vmem:[#allocation2 + $0xb0] sm:$0xff]  ;;  %v1524_v62 = vld [vmem:[#allocation2 + $0xc8] sm:$0xff]  ;;  %v1526_v63 = vld [vmem:[#allocation2 + $0xd8] sm:$0xff] }
 0x6da   :  { %2142 = vmatprep.subr.bf16.mxu0 %v2141_v45  ;;  %2199 = vmatprep.subr.bf16.mxu1 %v2141_v45  ;;  %v2155_v39 = vpack.c.bf16 %v1521_v61, %v1519_v53  ;;  %v2157_v5 = vpack.c.bf16 %v1526_v63, %v1524_v62  ;;  %v1523_v6 = vld [vmem:[#allocation2 + $0xc0] sm:$0xff]  ;;  %v1525_v11 = vld [vmem:[#allocation2 + $0xd0] sm:$0xff]  ;;  %v1528_v14 = vld [vmem:[#allocation2 + $0xe8] sm:$0xff]  ;;  %v1565_v63 = vmul.f32 %v3159_v2, %v3159_v2 }
 0x6db   :  { %v1530_v17 = vld [vmem:[#allocation2 + $0xf8] sm:$0xff]  ;;  %v2159_v10 = vpack.c.bf16 %v1525_v11, %v1523_v6  ;;  %v1527_v60 = vld [vmem:[#allocation2 + $0xe0] sm:$0xff]  ;;  %v1529_v15 = vld [vmem:[#allocation2 + $0xf0] sm:$0xff]  ;;  %v1564_v6 = vmul.f32 %v3154_v1, %v3154_v1  ;;  %v1563_v11 = vmul.f32 %v3149_v0, %v3149_v0 }
 0x6dc   :  { %v2161_v8 = vpack.c.bf16 %v1530_v17, %v1528_v14  ;;  %v1532_v7 = vld [vmem:[#allocation2 + $0x108] sm:$0xff]  ;;  %v1534_v19 = vld [vmem:[#allocation2 + $0x118] sm:$0xff]  ;;  %v2163_v20 = vpack.c.bf16 %v1529_v15, %v1527_v60  ;;  %v1531_v22 = vld [vmem:[#allocation2 + $0x100] sm:$0xff]  ;;  %v1736_v14 = vadd.f32 %v3164_v3, %v3159_v2 }
 0x6dd   :  { %2144 = vmatpush1.bf16.msra.mxu0 %v2143_v47  ;;  %2215 = vmatpush1.bf16.msra.mxu1 %v2143_v47  ;;  %v2165_v21 = vpack.c.bf16 %v1534_v19, %v1532_v7  ;;  %v1533_v24 = vld [vmem:[#allocation2 + $0x110] sm:$0xff]  ;;  %v1536_v16 = vld [vmem:[#allocation2 + $0x128] sm:$0xff]  ;;  %v1538_v18 = vld [vmem:[#allocation2 + $0x138] sm:$0xff] }
 0x6de   :  { %2146 = vmatprep.subr.bf16.mxu0 %v2145_v48  ;;  %2200 = vmatprep.subr.bf16.mxu1 %v2145_v48  ;;  %v2167_v26 = vpack.c.bf16 %v1533_v24, %v1531_v22  ;;  %v2169_v27 = vpack.c.bf16 %v1538_v18, %v1536_v16  ;;  %v1535_v28 = vld [vmem:[#allocation2 + $0x120] sm:$0xff]  ;;  %v1537_v29 = vld [vmem:[#allocation2 + $0x130] sm:$0xff]  ;;  %v1540_v31 = vld [vmem:[#allocation2 + $0x148] sm:$0xff] }
 0x6df   :  { %v1542_v34 = vld [vmem:[#allocation2 + $0x158] sm:$0xff]  ;;  %v2171_v35 = vpack.c.bf16 %v1537_v29, %v1535_v28  ;;  %v1539_v13 = vld [vmem:[#allocation2 + $0x140] sm:$0xff]  ;;  %v1541_v55 = vld [vmem:[#allocation2 + $0x150] sm:$0xff]  ;;  %1737 = vadd.xlane.f32.xlu1 %v1736_v14  ;;  %v1797_v14 = vmin.f32 %v3159_v2, %v3164_v3 }
 0x6e0   :  { %v2173_v36 = vpack.c.bf16 %v1542_v34, %v1540_v31  ;;  %v1544_v58 = vld [vmem:[#allocation2 + $0x168] sm:$0xff]  ;;  %v1546_v38 = vld [vmem:[#allocation2 + $0x178] sm:$0xff]  ;;  %v2175_v59 = vpack.c.bf16 %v1541_v55, %v1539_v13  ;;  %v1543_v32 = vld [vmem:[#allocation2 + $0x160] sm:$0xff] }
 0x6e1   :  { %2148 = vmatpush1.bf16.msra.mxu0 %v2147_v4  ;;  %2216 = vmatpush1.bf16.msra.mxu1 %v2147_v4  ;;  %v2177_v30 = vpack.c.bf16 %v1546_v38, %v1544_v58  ;;  %v1545_v40 = vld [vmem:[#allocation2 + $0x170] sm:$0xff]  ;;  %v1548_v41 = vld [vmem:[#allocation2 + $0x188] sm:$0xff]  ;;  %v1550_v42 = vld [vmem:[#allocation2 + $0x198] sm:$0xff] }
 0x6e2   :  { %2150 = vmatprep.subr.bf16.mxu0 %v2149_v25  ;;  %2201 = vmatprep.subr.bf16.mxu1 %v2149_v25  ;;  %v2179_v43 = vpack.c.bf16 %v1545_v40, %v1543_v32  ;;  %v2181_v45 = vpack.c.bf16 %v1550_v42, %v1548_v41  ;;  %v1547_v9 = vld [vmem:[#allocation2 + $0x180] sm:$0xff]  ;;  %v1549_v37 = vld [vmem:[#allocation2 + $0x190] sm:$0xff]  ;;  %v1552_v46 = vld [vmem:[#allocation2 + $0x1a8] sm:$0xff] }
 0x6e3   :  { %v1554_v12 = vld [vmem:[#allocation2 + $0x1b8] sm:$0xff]  ;;  %v2183_v47 = vpack.c.bf16 %v1549_v37, %v1547_v9  ;;  %v1551_v49 = vld [vmem:[#allocation2 + $0x1a0] sm:$0xff]  ;;  %v1553_v54 = vld [vmem:[#allocation2 + $0x1b0] sm:$0xff] }
 0x6e4   :  { %v2185_v48 = vpack.c.bf16 %v1554_v12, %v1552_v46  ;;  %v1556_v50 = vld [vmem:[#allocation2 + $0x1c8] sm:$0xff]  ;;  %v1558_v52 = vld [vmem:[#allocation2 + $0x1d8] sm:$0xff]  ;;  %v2187_v4 = vpack.c.bf16 %v1553_v54, %v1551_v49  ;;  %v1555_v44 = vld [vmem:[#allocation2 + $0x1c0] sm:$0xff] }
 0x6e5   :  { %2152 = vmatpush1.bf16.msra.mxu0 %v2151_v51  ;;  %2217 = vmatpush1.bf16.msra.mxu1 %v2151_v51  ;;  %v2189_v25 = vpack.c.bf16 %v1558_v52, %v1556_v50  ;;  %v1557_v56 = vld [vmem:[#allocation2 + $0x1d0] sm:$0xff]  ;;  %v1560_v33 = vld [vmem:[#allocation2 + $0x1e8] sm:$0xff]  ;;  %v1562_v57 = vld [vmem:[#allocation2 + $0x1f8] sm:$0xff] }
 0x6e6   :  { %2154 = vmatprep.subr.bf16.mxu0 %v2153_v23  ;;  %2202 = vmatprep.subr.bf16.mxu1 %v2153_v23  ;;  %v2191_v51 = vpack.c.bf16 %v1557_v56, %v1555_v44  ;;  %v2193_v23 = vpack.c.bf16 %v1562_v57, %v1560_v33  ;;  %v1559_v53 = vld [vmem:[#allocation2 + $0x1e0] sm:$0xff]  ;;  %v1561_v61 = vld [vmem:[#allocation2 + $0x1f0] sm:$0xff] }
 0x6e7   :  { %v2195_v62 = vpack.c.bf16 %v1561_v61, %v1559_v53 }
 0x6e9   :  { %2156 = vmatpush1.bf16.msra.mxu0 %v2155_v39  ;;  %2218 = vmatpush1.bf16.msra.mxu1 %v2155_v39  ;;  %v1568_v39 = vmul.f32 %v3164_v3, %v3154_v1 }
 0x6ea   :  { %2158 = vmatprep.subr.bf16.mxu0 %v2157_v5  ;;  %2203 = vmatprep.subr.bf16.mxu1 %v2157_v5  ;;  %v1567_v5 = vmul.f32 %v3159_v2, %v3149_v0 }
 0x6ed   :  { %2160 = vmatpush1.bf16.msra.mxu0 %v2159_v10  ;;  %2219 = vmatpush1.bf16.msra.mxu1 %v2159_v10 }
 0x6ee   :  { %2162 = vmatprep.subr.bf16.mxu0 %v2161_v8  ;;  %2204 = vmatprep.subr.bf16.mxu1 %v2161_v8 }
 0x6f1   :  { %2164 = vmatpush1.bf16.msra.mxu0 %v2163_v20  ;;  %2220 = vmatpush1.bf16.msra.mxu1 %v2163_v20 }
 0x6f2   :  { %2166 = vmatprep.subr.bf16.mxu0 %v2165_v21  ;;  %2205 = vmatprep.subr.bf16.mxu1 %v2165_v21 }
 0x6f5   :  { %2168 = vmatpush1.bf16.msra.mxu0 %v2167_v26  ;;  %2221 = vmatpush1.bf16.msra.mxu1 %v2167_v26 }
 0x6f6   :  { %2170 = vmatprep.subr.bf16.mxu0 %v2169_v27  ;;  %2206 = vmatprep.subr.bf16.mxu1 %v2169_v27 }
 0x6f9   :  { %2172 = vmatpush1.bf16.msra.mxu0 %v2171_v35  ;;  %2222 = vmatpush1.bf16.msra.mxu1 %v2171_v35 }
 0x6fa   :  { %2174 = vmatprep.subr.bf16.mxu0 %v2173_v36  ;;  %2207 = vmatprep.subr.bf16.mxu1 %v2173_v36 }
 0x6fd   :  { %2176 = vmatpush1.bf16.msra.mxu0 %v2175_v59  ;;  %2223 = vmatpush1.bf16.msra.mxu1 %v2175_v59 }
 0x6fe   :  { %2178 = vmatprep.subr.bf16.mxu0 %v2177_v30  ;;  %2208 = vmatprep.subr.bf16.mxu1 %v2177_v30 }
 0x701   :  { %2180 = vmatpush1.bf16.msra.mxu0 %v2179_v43  ;;  %2224 = vmatpush1.bf16.msra.mxu1 %v2179_v43 }
 0x702   :  { %2182 = vmatprep.subr.bf16.mxu0 %v2181_v45  ;;  %2209 = vmatprep.subr.bf16.mxu1 %v2181_v45 }
 0x705   :  { %2184 = vmatpush1.bf16.msra.mxu0 %v2183_v47  ;;  %2225 = vmatpush1.bf16.msra.mxu1 %v2183_v47 }
 0x706   :  { %2186 = vmatprep.subr.bf16.mxu0 %v2185_v48  ;;  %2210 = vmatprep.subr.bf16.mxu1 %v2185_v48 }
 0x709   :  { %2188 = vmatpush1.bf16.msra.mxu0 %v2187_v4  ;;  %2226 = vmatpush1.bf16.msra.mxu1 %v2187_v4 }
 0x70a   :  { %2190 = vmatprep.subr.bf16.mxu0 %v2189_v25  ;;  %2211 = vmatprep.subr.bf16.mxu1 %v2189_v25 }
 0x70d   :  { %2192 = vmatpush1.bf16.msra.mxu0 %v2191_v51  ;;  %2227 = vmatpush1.bf16.msra.mxu1 %v2191_v51 }
 0x70e   :  { %2194 = vmatprep.subr.bf16.mxu0 %v2193_v23  ;;  %2212 = vmatprep.subr.bf16.mxu1 %v2193_v23 }
 0x711   :  { %2196 = vmatpush1.bf16.msra.mxu0 %v2195_v62  ;;  %2228 = vmatpush1.bf16.msra.mxu1 %v2195_v62 }
 0x714   :  { %1634 = vmatmul.mubr.f32.vlgmr.msra.gmra.mrb[2].mxu0 %v3149_v0  ;;  %1652 = vmatmul.mubr.f32.vlgmr.msra.gmra.mrb[2].mxu1 %v1565_v63 }
 0x715   :  { %1639 = vmatprep.mubr.f32.mxu0 %v3164_v3  ;;  %1657 = vmatprep.mubr.f32.mxu1 %v1568_v39 }
 0x718   :  { %1640 = vmatmul.mubr.f32.gmra.mrb[4].mxu0 %v3159_v2  ;;  %1658 = vmatmul.mubr.f32.gmra.mrb[4].mxu1 %v1567_v5 }
 0x719   :  { %1645 = vmatprep.mubr.f32.mxu0 %v1564_v6  ;;  %v1723_v6 = vadd.f32 %v3154_v1, %v3149_v0 }
 0x71c   :  { %1646 = vmatmul.mubr.f32.gmra.mrb[6].mxu0 %v1563_v11  ;;  %v1787_v11 = vmin.f32 %v3149_v0, %v3154_v1 }
 0x71e   :  { %1788 = vmin.xlane.f32.xlu1 %v1787_v11 }
 0x7e7   :  { %v1635_v17 = vpop.f32.mrb[2].mxu0  ;;  %v1653_v10 = vpop.f32.mrb[2].mxu1 }
 0x7e8   :  { %v1637_v8 = vpop.f32.mrb[3].mxu0  ;;  %v1655_v60 = vpop.f32.mrb[3].mxu1  ;;  %v1664_v19 = vmul.f32 %v1635_v17, %v1635_v17 }
 0x7e9   :  { %v1665_v16 = vmul.f32 %v1637_v8, %v1637_v8 }
 0x7eb   :  { %v1641_v15 = vpop.f32.mrb[4].mxu0  ;;  %v1659_v7 = vpop.f32.mrb[4].mxu1 }
 0x7ec   :  { %v1666_v20 = vmul.f32 %v1641_v15, %v1641_v15  ;;  %v1668_v21 = vmul.f32 %v1641_v15, %v1635_v17  ;;  %v1643_v22 = vpop.f32.mrb[5].mxu0  ;;  %v1661_v24 = vpop.f32.mrb[5].mxu1 }
 0x7ed   :  { %v1667_v18 = vmul.f32 %v1643_v22, %v1643_v22  ;;  %v1669_v26 = vmul.f32 %v1643_v22, %v1637_v8  ;;  %v1738_v17 = vpop.xlane.xlu1 %1737 }
 0x7ee   :  { %v1676_v27 = vmul.f32 2.0, %v1668_v21  ;;  %v1686_v28 = vadd.f32 %v1666_v20, %v1664_v19  ;;  %v1672_v29 = vsub.f32 %v1653_v10, %v1666_v20  ;;  %v1674_v31 = vsub.f32 %v1659_v7, %v1668_v21 }
 0x7ef   :  { %v1677_v34 = vmul.f32 2.0, %v1669_v26  ;;  %v1687_v35 = vadd.f32 %v1667_v18, %v1665_v16  ;;  %v1673_v36 = vsub.f32 %v1655_v60, %v1667_v18  ;;  %v1675_v13 = vsub.f32 %v1661_v24, %v1669_v26  ;;  %v1647_v55 = vpop.f32.mrb[6].mxu0 }
 0x7f0   :  { %v1680_v58 = vmul.f32 2.0, %v1674_v31  ;;  %v1670_v38 = vsub.f32 %v1647_v55, %v1664_v19  ;;  %v1649_v59 = vpop.f32.mrb[7].mxu0  ;;  %v1678_v40 = vadd.f32 0.0001, %v1676_v27  ;;  %v1688_v37 = vadd.f32 0.0001, %v1686_v28 }
 0x7f1   :  { %v1681_v30 = vmul.f32 2.0, %v1675_v13  ;;  %v1671_v32 = vsub.f32 %v1649_v59, %v1665_v16  ;;  %v1679_v43 = vadd.f32 0.0001, %v1677_v34  ;;  %v1689_v47 = vadd.f32 0.0001, %v1687_v35 }
 0x7f2   :  { %v1682_v41 = vadd.f32 0.0009, %v1680_v58  ;;  %v1690_v42 = vadd.f32 %v1672_v29, %v1670_v38  ;;  %v1739_v10 = vrot.slane %v1738_v17, 4 }
 0x7f3   :  { %v1683_v45 = vadd.f32 0.0009, %v1681_v30  ;;  %v1691_v9 = vadd.f32 %v1673_v36, %v1671_v32 }
 0x7f4   :  { %v1684_v46 = vmul.f32 %v1682_v41, %v1678_v40  ;;  %v1692_v12 = vadd.f32 0.0009, %v1690_v42  ;;  %v1740_v8 = vadd.f32 %v1739_v10, %v1738_v17 }
 0x7f5   :  { %v1685_v48 = vmul.f32 %v1683_v45, %v1679_v43  ;;  %v1693_v49 = vadd.f32 0.0009, %v1691_v9  ;;  %v1809_v9 = vmax.f32 %v3149_v0, %v3154_v1 }
 0x7f6   :  { %v1694_v54 = vmul.f32 %v1692_v12, %v1688_v37  ;;  %v1741_v19 = vrot.slane %v1740_v8, 2  ;;  %v1819_v37 = vmax.f32 %v3159_v2, %v3164_v3 }
 0x7f7   :  { %v1695_v50 = vmul.f32 %v1693_v49, %v1689_v47 }
 0x7f8   :  { %v1696_v52 = vadd.f32 1e-12, %v1694_v54  ;;  %v1742_v18 = vadd.f32 %v1741_v19, %v1740_v8 }
 0x7f9   :  { %v1697_v4 = vadd.f32 1e-12, %v1695_v50 }
 0x7fa   :  { %2683 = vrcp.f32 %v1696_v52  ;;  %v1743_v31 = vrot.slane %v1742_v18, 1 }
 0x7fb   :  { %2685 = vrcp.f32 %v1697_v4 }
 0x7fc   :  { %v1744_v36 = vadd.f32 %v1743_v31, %v1742_v18 }
 0x804   :  { %v2684_v25 = vpop.eup %2683 }
 0x805   :  { %v2686_v44 = vpop.eup %2685  ;;  %v1700_v56 = vmul.f32 %v2684_v25, %v1684_v46  ;;  %v1789_v46 = vpop.xlane.xlu1 %1788 }
 0x806   :  { %v1701_v33 = vmul.f32 %v2686_v44, %v1685_v48  ;;  %v1790_v47 = vrot.slane %v1789_v46, 4 }
 0x807   :  { %v1702_v57 = vsub.f32 1.0, %v1700_v56 }
 0x808   :  { %v1703_v51 = vsub.f32 1.0, %v1701_v33  ;;  %v1791_v49 = vmin.f32 %v1789_v46, %v1790_v47 }
 0x809   :  { %v1704_v23 = vmul.f32 0.5, %v1702_v57 }
 0x80a   :  { %v1705_v53 = vmul.f32 0.5, %v1703_v51  ;;  %v1792_v4 = vrot.slane %v1791_v49, 2 }
 0x80b   :  { %v1706_v61 = vmax.f32 %v1704_v23, 0.0 }
 0x80c   :  { %v1707_v62 = vmax.f32 %v1705_v53, 0.0 }
 0x80d   :  { %v1708_v63 = vmin.f32 %v1706_v61, 1.0 }
 0x80e   :  { %v1709_v39 = vmin.f32 %v1707_v62, 1.0 }
 0x810   :  { %v1710_v5 = vadd.f32 %v1709_v39, %v1708_v63 }
 0x812   :  { %1711 = vadd.xlane.f32.xlu0 %v1710_v5 }
 0x816   :  { %1724 = vadd.xlane.f32.xlu0 %v1723_v6 }
 0x81a   :  { %1798 = vmin.xlane.f32.xlu0 %v1797_v14 }
 0x89f   :  { %v1712_v60 = vpop.xlane.xlu0 %1711 }
 0x8a0   :  { %v1713_v15 = vrot.slane %v1712_v60, 4 }
 0x8a2   :  { %v1714_v7 = vadd.f32 %v1713_v15, %v1712_v60 }
 0x8a3   :  { %v1725_v20 = vpop.xlane.xlu0 %1724 }
 0x8a4   :  { %v1715_v21 = vrot.slane %v1714_v7, 2  ;;  %v1726_v22 = vrot.slane %v1725_v20, 4 }
 0x8a6   :  { %v1727_v24 = vadd.f32 %v1726_v22, %v1725_v20  ;;  %v1716_v16 = vadd.f32 %v1715_v21, %v1714_v7 }
 0x8a7   :  { %v1799_v12 = vpop.xlane.xlu0 %1798 }
 0x8a8   :  { %v1728_v26 = vrot.slane %v1727_v24, 2  ;;  %v1717_v27 = vrot.slane %v1716_v16, 1  ;;  %v1800_v48 = vrot.slane %v1799_v12, 4 }
 0x8aa   :  { %v1718_v28 = vadd.f32 %v1717_v27, %v1716_v16  ;;  %v1729_v29 = vadd.f32 %v1728_v26, %v1727_v24  ;;  %v1801_v54 = vmin.f32 %v1799_v12, %v1800_v48 }
 0x8ac   :  { %2245 = vpush %v1718_v28  ;;  %v1730_v34 = vrot.slane %v1729_v29, 1  ;;  %v1802_v25 = vrot.slane %v1801_v54, 2 }
 0x8ae   :  { %v1731_v35 = vadd.f32 %v1730_v34, %v1729_v29  ;;  %v1803_v23 = vmin.f32 %v1801_v54, %v1802_v25 }
 0x8b0   :  { %2247 = vpush %v1731_v35  ;;  %v1804_v17 = vrot.slane %v1803_v23, 1 }
 0x8b1   :  { %2249 = vpush %v1744_v36 }
 0x8b2   :  { %v1805_v22 = vmin.f32 %v1803_v23, %v1804_v17 }
 0x8dd   :  { %s4034_s13 = spop %2245 }
 0x8de   :  { %s1722_s20 = smul.f32 0.00048828125, %s4034_s13 }
 0x8e0   :  { %s1835_s22 = smul.f32 5.0, %s1722_s20 }
 0x8e1   :  { %s2248_s14 = spop %2247 }
 0x8e2   :  { %s1735_s15 = smul.f32 0.00048828125, %s2248_s14  ;;  %s2250_s16 = spop %2249 }
 0x8e3   :  { %s1748_s17 = smul.f32 0.00048828125, %s2250_s16  ;;  %s1836_s24 = sadd.f32 %s1835_s22, %s1834_s21 }
 0x8e4   :  { %v1749_v13 = vstv %s1735_s15 }
 0x8e5   :  { %v1750_v55 = vsub.f32 %v3149_v0, %v1749_v13  ;;  %v1751_v58 = vsub.f32 %v3154_v1, %v1749_v13  ;;  %v1767_v38 = vstv %s1748_s17  ;;  %s1838_s30 = sadd.f32 %s1837_s23, %s1836_s24 }
 0x8e6   :  { %v1768_v32 = vsub.f32 %v3159_v2, %v1767_v38  ;;  %v1769_v40 = vsub.f32 %v3164_v3, %v1767_v38  ;;  %v1793_v3 = vmin.f32 %v1791_v49, %v1792_v4 }
 0x8e7   :  { %v1752_v59 = vmul.f32 %v1750_v55, %v1750_v55  ;;  %v1753_v30 = vmul.f32 %v1751_v58, %v1751_v58  ;;  %s1839_s25 = sadd.f32 %s1838_s30, %s1494_s12 }
 0x8e8   :  { %v1770_v41 = vmul.f32 %v1768_v32, %v1768_v32  ;;  %v1771_v42 = vmul.f32 %v1769_v40, %v1769_v40  ;;  %v1794_v14 = vrot.slane %v1793_v3, 1 }
 0x8e9   :  { %v1754_v43 = vadd.f32 %v1753_v30, %v1752_v59 }
 0x8ea   :  { %v1772_v45 = vadd.f32 %v1771_v42, %v1770_v41  ;;  %v1795_v21 = vmin.f32 %v1793_v3, %v1794_v14 }
 0x8eb   :  { %1755 = vadd.xlane.f32.xlu1 %v1754_v43 }
 0x8ec   :  { %1773 = vadd.xlane.f32.xlu0 %v1772_v45 }
 0x8ef   :  { %1810 = vmax.xlane.f32.xlu1 %v1809_v9 }
 0x8f0   :  { %1820 = vmax.xlane.f32.xlu0 %v1819_v37 }
 0x978   :  { %v1756_v50 = vpop.xlane.xlu1 %1755 }
 0x979   :  { %v1757_v52 = vrot.slane %v1756_v50, 4  ;;  %v1774_v44 = vpop.xlane.xlu0 %1773 }
 0x97a   :  { %v1775_v33 = vrot.slane %v1774_v44, 4 }
 0x97b   :  { %v1758_v56 = vadd.f32 %v1757_v52, %v1756_v50 }
 0x97c   :  { %v1811_v0 = vpop.xlane.xlu1 %1810  ;;  %v1776_v57 = vadd.f32 %v1775_v33, %v1774_v44 }
 0x97d   :  { %v1759_v1 = vrot.slane %v1758_v56, 2  ;;  %v1812_v51 = vrot.slane %v1811_v0, 4  ;;  %v1821_v2 = vpop.xlane.xlu0 %1820 }
 0x97e   :  { %v1777_v53 = vrot.slane %v1776_v57, 2  ;;  %v1822_v62 = vrot.slane %v1821_v2, 4 }
 0x97f   :  { %v1813_v61 = vmax.f32 %v1811_v0, %v1812_v51  ;;  %v1760_v63 = vadd.f32 %v1759_v1, %v1758_v56 }
 0x980   :  { %v1823_v5 = vmax.f32 %v1821_v2, %v1822_v62  ;;  %v1778_v11 = vadd.f32 %v1777_v53, %v1776_v57 }
 0x981   :  { %v1814_v39 = vrot.slane %v1813_v61, 2  ;;  %v1761_v6 = vrot.slane %v1760_v63, 1 }
 0x982   :  { %v1824_v8 = vrot.slane %v1823_v5, 2  ;;  %v1779_v15 = vrot.slane %v1778_v11, 1 }
 0x983   :  { %v1815_v10 = vmax.f32 %v1813_v61, %v1814_v39  ;;  %v1762_v60 = vadd.f32 %v1761_v6, %v1760_v63 }
 0x984   :  { %v1825_v7 = vmax.f32 %v1823_v5, %v1824_v8  ;;  %v1780_v19 = vadd.f32 %v1779_v15, %v1778_v11 }
 0x985   :  { %2251 = vpush %v1762_v60  ;;  %v1816_v20 = vrot.slane %v1815_v10, 1 }
 0x986   :  { %2253 = vpush %v1780_v19  ;;  %v1826_v16 = vrot.slane %v1825_v7, 1 }
 0x987   :  { %v1817_v24 = vmax.f32 %v1815_v10, %v1816_v20  ;;  %2255 = vpush %v1795_v21 }
 0x988   :  { %2257 = vpush %v1805_v22  ;;  %v1827_v18 = vmax.f32 %v1825_v7, %v1826_v16 }
 0x989   :  { %2259 = vpush %v1817_v24 }
 0x98a   :  { %2261 = vpush %v1827_v18 }
 0x9b6   :  { %s2252_s26 = spop %2251 }
 0x9b7   :  { %s1766_s0 = smul.f32 0.0004885198, %s2252_s26  ;;  %s2254_s27 = spop %2253 }
 0x9b8   :  { %s1784_s28 = smul.f32 0.0004885198, %s2254_s27  ;;  %s2256_s29 = spop %2255 }
 0x9b9   :  { %s2258_s6 = spop %2257 }
 0x9ba   :  { %s1785_s1 = ssub.f32 %s1766_s0, %s1784_s28  ;;  %s2260_s3 = spop %2259 }
 0x9bb   :  { %s1807_s7 = ssub.f32 %s2256_s29, %s2258_s6  ;;  %s2262_s8 = spop %2261 }
 0x9bc   :  { %s1786_s2 = smul.f32 %s1785_s1, %s1785_s1  ;;  %s1829_s9 = ssub.f32 %s2260_s3, %s2262_s8 }
 0x9bd   :  { %s1808_s10 = smul.f32 %s1807_s7, %s1807_s7 }
 0x9be   :  { %s1830_s13 = smul.f32 %s1829_s9, %s1829_s9  ;;  %s1840_s14 = sadd.f32 %s1839_s25, %s1786_s2 }
 0x9c0   :  { %s1831_s5 = sadd.f32 %s1830_s13, %s1808_s10 }
 0x9c2   :  { %s1841_s15 = sadd.f32 %s1840_s14, %s1831_s5 }
 0x9c4   :  { %1843 = sst [smem:[#allocation4]] %s1841_s15 }
 0x9c5   :  { %2718 = shalt.err (!%p2715_p4)
}
 0x9c6   :  { %s3120_s11 = smov [#allocation4]  }
 0x9c7   :  { %1851 = dma.smem_to_hbm %s3120_s11, 16, %s4066_s4, [#allocation5]  }
 0x9c8   :  { %2881 = dma.done.wait [#allocation5], 16  }
 0x9c9   :  { %2882 = vsyncadd [#allocation5], 4294967280 }
 0x9ca   :  { %1855 = sfence }
 0x9cb   :  { %1856 = vsyncpa [#allocation5], 1 }
 0x9cc   :  { %1857 = vsyncmov [#allocation3] }
 0x9cf   :  { %s1858_s24 = vpop.sfrf %1857 }
 0x9d0   :  { %p2132_p5 = scmp.ne.s32.totalorder %s1858_s24, 0 }
 0x9d2   :  { %1862 = shalt.err (%p2132_p5)  }

</bundles_post_ra>
